<compile_context>
chip_gen: v6e
topology: v6e:2x2x1
jax: 0.10.0
libtpu: 0.0.40
codegen_flags: <defaults>
</compile_context>

<pallas_src>
import functools

import numpy as np
import jax
import jax.numpy as jnp
from jax import lax
from jax.experimental import pallas as pl
from jax.experimental.pallas import tpu as pltpu

# Matmul operand dtype.  Kept at f32 so the kernel matches the f32 reference
# within 1e-3 (the LSTM recurrence compounds rounding).  On v6e/v7x flip to
# jnp.bfloat16 for ~2-3x MXU throughput if a looser tolerance is acceptable;
# accumulation stays f32 either way (preferred_element_type below).
_MXU_DTYPE = jnp.float32


def _dot(a, b):
    return jnp.dot(a.astype(_MXU_DTYPE), b.astype(_MXU_DTYPE),
                   preferred_element_type=jnp.float32)


def _boundary_masks(B, L):
    # Compile-time (B*L, 1) f32 multiplicative masks (row layout is batch-major
    # flat: row = b*L + l).  prev_keep zeroes rows with l == 0 (the x[l-1] tap
    # would read the previous sample); next_keep zeroes rows with l == L-1.
    l_of_row = np.arange(B * L) % L
    prev_keep = (l_of_row != 0).astype(np.float32).reshape(B * L, 1)
    next_keep = (l_of_row != (L - 1)).astype(np.float32).reshape(B * L, 1)
    return prev_keep, next_keep


def _conv3_relu(x, w_ref, b_ref, prev_keep, next_keep):
    # Conv1d(kernel_size=3, padding=1) + ReLU on batch-major flat rows, as a
    # 3-matmul shifted decomposition: y[l] = x[l-1]@w0 + x[l]@w1 + x[l+1]@w2.
    # The shifted operands are built with a 1-sublane shift (zero-row concat)
    # and the batch-boundary rows masked multiplicatively.
    Cin = x.shape[-1]
    zero = jnp.zeros((1, Cin), jnp.float32)
    xp = jnp.concatenate([zero, x[:-1]], axis=0) * prev_keep   # x[l-1]
    xn = jnp.concatenate([x[1:], zero], axis=0) * next_keep    # x[l+1]
    y = (_dot(xp, w_ref[0]) + _dot(x, w_ref[1]) + _dot(xn, w_ref[2])
         + b_ref[...])
    return jnp.maximum(y, 0.0)


# -----------------------------------------------------------------------------
# Fused kernel: conv block -> time-major reorder -> stacked LSTM -> fc head
# -----------------------------------------------------------------------------
def _fused_forward_kernel(x_ref, w1_ref, b1_ref, w2_ref, b2_ref,
                          m1p_ref, m1n_ref, m2p_ref, m2n_ref, *refs,
                          num_layers, B, T, H):
    # refs: [wih_0(4,Din,H), whh_0(4,H,H), b_0(4,1,H), ...,
    #        fc1_w, fc1_b, fc2_w, fc2_b, o_ref, y1_s, y2_s]
    fc1_w_ref, fc1_b_ref, fc2_w_ref, fc2_b_ref = refs[3 * num_layers:3 * num_layers + 4]
    o_ref = refs[3 * num_layers + 4]
    y1_s = refs[3 * num_layers + 5]   # VMEM scratch (B*T,   C1)
    y2_s = refs[3 * num_layers + 6]   # VMEM scratch (B*T//2, C2)

    # ----------------------- conv block (whole batch) ------------------------
    x = x_ref[...].astype(jnp.float32)                              # (B*T, Cin)
    y1_s[...] = _conv3_relu(x, w1_ref, b1_ref, m1p_ref[...], m1n_ref[...])

    # MaxPool1d(2): strided sublane reads from scratch, no reshape relayout.
    half1 = (B * T) // 2
    p1 = jnp.maximum(y1_s[pl.ds(0, half1, stride=2), :],
                     y1_s[pl.ds(1, half1, stride=2), :])            # (B*T/2, C1)

    y2_s[...] = _conv3_relu(p1, w2_ref, b2_ref, m2p_ref[...], m2n_ref[...])

    L1 = T // 2
    T2 = T // 4
    # MaxPool1d(2) fused with the batch-major -> time-major reorder: for time
    # step t, batch b lives at y2 rows b*L1 + 2t and b*L1 + 2t + 1.
    p2_tm = jnp.concatenate(
        [jnp.maximum(y2_s[pl.ds(2 * t, B, stride=L1), :],
                     y2_s[pl.ds(2 * t + 1, B, stride=L1), :])
         for t in range(T2)], axis=0)                               # (T2*B, C2)

    # TODO(synk): nn.Dropout(0.5) is identity in eval/inference mode; skipped.

    # ----------------------- stacked LSTM (PyTorch i,f,g,o, zero init) -------
    wih0_ref, whh0_ref, b0_ref = refs[0], refs[1], refs[2]
    # Hoisted layer-0 input projection: one matmul per gate over the whole
    # sequence.  Per-gate weights keep i/f/g/o lane-separated, so the serial
    # recurrence below never extracts 32-lane sub-slices of a 128-lane vreg.
    gx0 = [_dot(p2_tm, wih0_ref[g]) + b0_ref[g] for g in range(4)]  # 4x(T2*B,H)

    h = [jnp.zeros((B, H), jnp.float32) for _ in range(num_layers)]
    c = [jnp.zeros((B, H), jnp.float32) for _ in range(num_layers)]

    # Fully unrolled (T2, num_layers are small statics).  Layers > 0 project
    # h[l-1] per step (not hoisted), so step (l, t) only depends on (l-1, t)
    # and (l, t-1): a (T2 + num_layers - 1)-deep wavefront for the scheduler.
    for t in range(T2):
        for l in range(num_layers):
            whh_ref = refs[3 * l + 1]
            if l == 0:
                z = [gx0[g][t * B:(t + 1) * B] + _dot(h[0], whh_ref[g])
                     for g in range(4)]
            else:
                wih_ref = refs[3 * l]
                bl_ref = refs[3 * l + 2]
                z = [_dot(h[l - 1], wih_ref[g]) + bl_ref[g] + _dot(h[l], whh_ref[g])
                     for g in range(4)]
            i_g = jax.nn.sigmoid(z[0])
            f_g = jax.nn.sigmoid(z[1])
            g_g = jnp.tanh(z[2])
            o_g = jax.nn.sigmoid(z[3])
            c[l] = f_g * c[l] + i_g * g_g
            h[l] = o_g * jnp.tanh(c[l])

    # ----------------------- fc1 -> ReLU -> fc2 on last timestep -------------
    z1 = jnp.maximum(_dot(h[-1], fc1_w_ref[...]) + fc1_b_ref[...], 0.0)
    o_ref[...] = (_dot(z1, fc2_w_ref[...]) + fc2_b_ref[...]).astype(o_ref.dtype)


def _split_gates(a, H):
    # (..., 4H) -> (4, ..., H), preserving PyTorch gate order (i, f, g, o).
    return jnp.stack([a[..., g * H:(g + 1) * H] for g in range(4)], axis=0)


def fused_forward(x_flat, conv_args, masks, lstm_args, fc_args,
                  *, num_layers, B, T, H, out_size):
    # TODO(synk): at scaled-up B/T/H, add a batch grid with BlockSpec
    # pipelining + dimension_semantics=("parallel",...) (v7x has 2 TCs and only
    # 64 MiB VMEM); unnecessary at these toy sizes.
    w1, b1, w2, b2 = conv_args
    C1 = w1.shape[-1]
    C2 = w2.shape[-1]
    return pl.pallas_call(
        functools.partial(_fused_forward_kernel,
                          num_layers=num_layers, B=B, T=T, H=H),
        out_shape=jax.ShapeDtypeStruct((B, out_size), x_flat.dtype),
        scratch_shapes=[pltpu.VMEM((B * T, C1), jnp.float32),
                        pltpu.VMEM((B * T // 2, C2), jnp.float32)],
    )(x_flat, w1, b1, w2, b2, *masks, *lstm_args, *fc_args)


# -----------------------------------------------------------------------------
# Parameters (deterministic synthetic init) and full forward
# -----------------------------------------------------------------------------
def init_params(key, input_size, hidden_size, num_layers, output_size):
    keys = jax.random.split(key, 8 + 4 * num_layers)

    def u(k, shape, scale):
        return jax.random.uniform(k, shape, jnp.float32, -scale, scale)

    params = {
        # PyTorch conv weight (Cout, Cin, K) stored here as (K, Cin, Cout)
        "conv1_w": u(keys[0], (3, input_size, 64), 0.2),
        "conv1_b": u(keys[1], (1, 64), 0.2),
        "conv2_w": u(keys[2], (3, 64, 128), 0.1),
        "conv2_b": u(keys[3], (1, 128), 0.1),
    }
    lstm = []
    kidx = 4
    for layer in range(num_layers):
        din = 128 if layer == 0 else hidden_size
        wih = u(keys[kidx], (din, 4 * hidden_size), 0.1); kidx += 1          # W_ih^T
        whh = u(keys[kidx], (hidden_size, 4 * hidden_size), 0.1); kidx += 1  # W_hh^T
        bih = u(keys[kidx], (1, 4 * hidden_size), 0.1); kidx += 1
        bhh = u(keys[kidx], (1, 4 * hidden_size), 0.1); kidx += 1
        lstm.append((wih, whh, bih + bhh))
    params["lstm"] = lstm
    params["fc1_w"] = u(keys[kidx], (hidden_size, 64), 0.1)
    params["fc1_b"] = u(keys[kidx + 1], (1, 64), 0.1)
    params["fc2_w"] = u(keys[kidx + 2], (64, output_size), 0.1)
    params["fc2_b"] = u(keys[kidx + 3], (1, output_size), 0.1)
    return params


def forward(params, x):
    # x: (B, T, input_size) — same as the PyTorch batch_first input.
    B, T, Cin = x.shape
    assert T % 4 == 0, "two MaxPool1d(2) stages require T % 4 == 0"
    H = params["lstm"][0][1].shape[0]
    num_layers = len(params["lstm"])
    out_size = params["fc2_w"].shape[1]

    # Compile-time batch-boundary masks for the shifted conv taps.
    m1p, m1n = _boundary_masks(B, T)
    m2p, m2n = _boundary_masks(B, T // 2)

    # Per-gate weight split (done once on tiny weights; keeps the kernel's
    # serial recurrence free of 32-lane gate extraction).
    lstm_args = []
    for (wih, whh, b) in params["lstm"]:
        lstm_args += [_split_gates(wih, H), _split_gates(whh, H), _split_gates(b, H)]

    return fused_forward(
        x.reshape(B * T, Cin),
        (params["conv1_w"], params["conv1_b"], params["conv2_w"], params["conv2_b"]),
        (m1p, m1n, m2p, m2n),
        lstm_args,
        (params["fc1_w"], params["fc1_b"], params["fc2_w"], params["fc2_b"]),
        num_layers=num_layers, B=B, T=T, H=H, out_size=out_size)


# -----------------------------------------------------------------------------
# Pure-JAX reference (same math, no Pallas) for a correctness check
# -----------------------------------------------------------------------------
def forward_ref(params, x):
    def conv_ref(x, w, b):
        B, L, Cin = x.shape
        zero = jnp.zeros((B, 1, Cin), x.dtype)
        xp = jnp.concatenate([zero, x[:, :-1]], axis=1)
        xn = jnp.concatenate([x[:, 1:], zero], axis=1)
        y = (jnp.einsum("blc,cd->bld", xp, w[0])
             + jnp.einsum("blc,cd->bld", x, w[1])
             + jnp.einsum("blc,cd->bld", xn, w[2]) + b[0])
        y = jnp.maximum(y, 0.0)
        return jnp.max(y.reshape(B, L // 2, 2, -1), axis=2)

    def lstm_ref(x_tm, wih, whh, b):
        T, B, _ = x_tm.shape
        H = whh.shape[0]

        def step(carry, x_t):
            h, c = carry
            g = x_t @ wih + h @ whh + b[0]
            i = jax.nn.sigmoid(g[:, :H])
            f = jax.nn.sigmoid(g[:, H:2 * H])
            gg = jnp.tanh(g[:, 2 * H:3 * H])
            o = jax.nn.sigmoid(g[:, 3 * H:])
            c = f * c + i * gg
            h = o * jnp.tanh(c)
            return (h, c), h

        (_, _), hs = lax.scan(step, (jnp.zeros((B, H)), jnp.zeros((B, H))), x_tm)
        return hs

    h = conv_ref(x, params["conv1_w"], params["conv1_b"])
    h = conv_ref(h, params["conv2_w"], params["conv2_b"])
    h = jnp.transpose(h, (1, 0, 2))
    for (wih, whh, b) in params["lstm"]:
        h = lstm_ref(h, wih, whh, b)
    last = h[-1]
    hh = jnp.maximum(last @ params["fc1_w"] + params["fc1_b"][0], 0.0)
    return hh @ params["fc2_w"] + params["fc2_b"][0]


if __name__ == "__main__":
    input_size, hidden_size, num_layers, output_size = 8, 32, 2, 4
    B, T = 2, 16

    key = jax.random.PRNGKey(0)
    pkey, xkey = jax.random.split(key)
    params = init_params(pkey, input_size, hidden_size, num_layers, output_size)
    x = jax.random.normal(xkey, (B, T, input_size), jnp.float32)

    out = jax.jit(forward)(params, x)
    out = jax.block_until_ready(out)
    assert out.shape == (B, output_size), out.shape

    ref = forward_ref(params, x)
    assert jnp.allclose(out, ref, atol=1e-3, rtol=1e-3), (out, ref)

    print("KERNEL_OK")
</pallas_src>

<mosaic_0001>
module attributes {stable_mosaic.version = 11 : i64} {
  func.func @_fused_forward_kernel(%arg0: memref<32x8xf32, #tpu.memory_space<vmem>>, %arg1: memref<3x8x64xf32, #tpu.memory_space<vmem>>, %arg2: memref<1x64xf32, #tpu.memory_space<vmem>>, %arg3: memref<3x64x128xf32, #tpu.memory_space<vmem>>, %arg4: memref<1x128xf32, #tpu.memory_space<vmem>>, %arg5: memref<32x1xf32, #tpu.memory_space<vmem>>, %arg6: memref<32x1xf32, #tpu.memory_space<vmem>>, %arg7: memref<16x1xf32, #tpu.memory_space<vmem>>, %arg8: memref<16x1xf32, #tpu.memory_space<vmem>>, %arg9: memref<4x128x32xf32, #tpu.memory_space<vmem>>, %arg10: memref<4x32x32xf32, #tpu.memory_space<vmem>>, %arg11: memref<4x1x32xf32, #tpu.memory_space<vmem>>, %arg12: memref<4x32x32xf32, #tpu.memory_space<vmem>>, %arg13: memref<4x32x32xf32, #tpu.memory_space<vmem>>, %arg14: memref<4x1x32xf32, #tpu.memory_space<vmem>>, %arg15: memref<32x64xf32, #tpu.memory_space<vmem>>, %arg16: memref<1x64xf32, #tpu.memory_space<vmem>>, %arg17: memref<64x4xf32, #tpu.memory_space<vmem>>, %arg18: memref<1x4xf32, #tpu.memory_space<vmem>>, %arg19: memref<2x4xf32, #tpu.memory_space<vmem>>, %arg20: memref<32x64xf32, #tpu.memory_space<vmem>>, %arg21: memref<16x128xf32, #tpu.memory_space<vmem>>) attributes {dimension_semantics = [], scalar_prefetch = 0 : i64, scratch_operands = 2 : i64, tpu.core_type = #tpu.core_type<tc>} {
    %c0 = arith.constant 0 : index
    %c0_0 = arith.constant 0 : index
    %0 = vector.load %arg0[%c0, %c0_0] : memref<32x8xf32, #tpu.memory_space<vmem>>, vector<32x8xf32>
    %c0_1 = arith.constant 0 : index
    %c0_2 = arith.constant 0 : index
    %1 = vector.load %arg5[%c0_1, %c0_2] : memref<32x1xf32, #tpu.memory_space<vmem>>, vector<32x1xf32>
    %c0_3 = arith.constant 0 : index
    %c0_4 = arith.constant 0 : index
    %2 = vector.load %arg6[%c0_3, %c0_4] : memref<32x1xf32, #tpu.memory_space<vmem>>, vector<32x1xf32>
    %cst = arith.constant 0.000000e+00 : f32
    %3 = vector.broadcast %cst : f32 to vector<1x8xf32>
    %4 = vector.extract_strided_slice %0 {offsets = [0, 0], sizes = [31, 8], strides = [1, 1]} : vector<32x8xf32> to vector<31x8xf32>
    %5 = tpu.concatenate %3, %4 in 0 : vector<1x8xf32>, vector<31x8xf32> -> vector<32x8xf32>
    %6 = vector.broadcast %1 : vector<32x1xf32> to vector<32x8xf32>
    %7 = arith.mulf %5, %6 : vector<32x8xf32>
    %8 = vector.extract_strided_slice %0 {offsets = [1, 0], sizes = [31, 8], strides = [1, 1]} : vector<32x8xf32> to vector<31x8xf32>
    %9 = tpu.concatenate %8, %3 in 0 : vector<31x8xf32>, vector<1x8xf32> -> vector<32x8xf32>
    %10 = vector.broadcast %2 : vector<32x1xf32> to vector<32x8xf32>
    %11 = arith.mulf %9, %10 : vector<32x8xf32>
    %c0_5 = arith.constant 0 : index
    %c0_6 = arith.constant 0 : index
    %c0_7 = arith.constant 0 : index
    %12 = vector.load %arg1[%c0_5, %c0_6, %c0_7] : memref<3x8x64xf32, #tpu.memory_space<vmem>>, vector<1x8x64xf32>
    %13 = vector.shape_cast %12 : vector<1x8x64xf32> to vector<8x64xf32>
    %cst_8 = arith.constant dense<0.000000e+00> : vector<32x64xf32>
    %14 = tpu.matmul %7, %13, %cst_8 {dimension_numbers = #tpu.dot_dimension_numbers<[1], [0], [0], [1], [0, 0, 1, 1], [], []>} : vector<32x8xf32>, vector<8x64xf32>, vector<32x64xf32> -> vector<32x64xf32>
    %c1 = arith.constant 1 : index
    %c0_9 = arith.constant 0 : index
    %c0_10 = arith.constant 0 : index
    %15 = vector.load %arg1[%c1, %c0_9, %c0_10] : memref<3x8x64xf32, #tpu.memory_space<vmem>>, vector<1x8x64xf32>
    %16 = vector.shape_cast %15 : vector<1x8x64xf32> to vector<8x64xf32>
    %cst_11 = arith.constant dense<0.000000e+00> : vector<32x64xf32>
    %17 = tpu.matmul %0, %16, %cst_11 {dimension_numbers = #tpu.dot_dimension_numbers<[1], [0], [0], [1], [0, 0, 1, 1], [], []>} : vector<32x8xf32>, vector<8x64xf32>, vector<32x64xf32> -> vector<32x64xf32>
    %18 = arith.addf %14, %17 : vector<32x64xf32>
    %c2 = arith.constant 2 : index
    %c0_12 = arith.constant 0 : index
    %c0_13 = arith.constant 0 : index
    %19 = vector.load %arg1[%c2, %c0_12, %c0_13] : memref<3x8x64xf32, #tpu.memory_space<vmem>>, vector<1x8x64xf32>
    %20 = vector.shape_cast %19 : vector<1x8x64xf32> to vector<8x64xf32>
    %cst_14 = arith.constant dense<0.000000e+00> : vector<32x64xf32>
    %21 = tpu.matmul %11, %20, %cst_14 {dimension_numbers = #tpu.dot_dimension_numbers<[1], [0], [0], [1], [0, 0, 1, 1], [], []>} : vector<32x8xf32>, vector<8x64xf32>, vector<32x64xf32> -> vector<32x64xf32>
    %22 = arith.addf %18, %21 : vector<32x64xf32>
    %c0_15 = arith.constant 0 : index
    %c0_16 = arith.constant 0 : index
    %23 = vector.load %arg2[%c0_15, %c0_16] : memref<1x64xf32, #tpu.memory_space<vmem>>, vector<1x64xf32>
    %24 = vector.broadcast %23 : vector<1x64xf32> to vector<32x64xf32>
    %25 = arith.addf %22, %24 : vector<32x64xf32>
    %cst_17 = arith.constant 0.000000e+00 : f32
    %26 = vector.broadcast %cst_17 : f32 to vector<32x64xf32>
    %27 = arith.maximumf %25, %26 : vector<32x64xf32>
    %c0_18 = arith.constant 0 : index
    %c0_19 = arith.constant 0 : index
    %28 = vector.load %arg20[%c0_18, %c0_19] : memref<32x64xf32, #tpu.memory_space<vmem>>, vector<32x64xf32>
    tpu.vector_store %arg20[%c0_18, %c0_19], %27 {strides = array<i32>} : memref<32x64xf32, #tpu.memory_space<vmem>>, vector<32x64xf32>,
    %c0_20 = arith.constant 0 : index
    %c0_21 = arith.constant 0 : index
    %29 = tpu.strided_load %arg20[%c0_20, %c0_21] {strides = array<i32: 2, 1>} : memref<32x64xf32, #tpu.memory_space<vmem>>, vector<16x64xf32>
    %c1_22 = arith.constant 1 : index
    %c0_23 = arith.constant 0 : index
    %30 = tpu.strided_load %arg20[%c1_22, %c0_23] {strides = array<i32: 2, 1>} : memref<32x64xf32, #tpu.memory_space<vmem>>, vector<16x64xf32>
    %31 = arith.maximumf %29, %30 : vector<16x64xf32>
    %c0_24 = arith.constant 0 : index
    %c0_25 = arith.constant 0 : index
    %32 = vector.load %arg7[%c0_24, %c0_25] : memref<16x1xf32, #tpu.memory_space<vmem>>, vector<16x1xf32>
    %c0_26 = arith.constant 0 : index
    %c0_27 = arith.constant 0 : index
    %33 = vector.load %arg8[%c0_26, %c0_27] : memref<16x1xf32, #tpu.memory_space<vmem>>, vector<16x1xf32>
    %cst_28 = arith.constant 0.000000e+00 : f32
    %34 = vector.broadcast %cst_28 : f32 to vector<1x64xf32>
    %35 = vector.extract_strided_slice %31 {offsets = [0, 0], sizes = [15, 64], strides = [1, 1]} : vector<16x64xf32> to vector<15x64xf32>
    %36 = tpu.concatenate %34, %35 in 0 : vector<1x64xf32>, vector<15x64xf32> -> vector<16x64xf32>
    %37 = vector.broadcast %32 : vector<16x1xf32> to vector<16x64xf32>
    %38 = arith.mulf %36, %37 : vector<16x64xf32>
    %39 = vector.extract_strided_slice %31 {offsets = [1, 0], sizes = [15, 64], strides = [1, 1]} : vector<16x64xf32> to vector<15x64xf32>
    %40 = tpu.concatenate %39, %34 in 0 : vector<15x64xf32>, vector<1x64xf32> -> vector<16x64xf32>
    %41 = vector.broadcast %33 : vector<16x1xf32> to vector<16x64xf32>
    %42 = arith.mulf %40, %41 : vector<16x64xf32>
    %c0_29 = arith.constant 0 : index
    %c0_30 = arith.constant 0 : index
    %c0_31 = arith.constant 0 : index
    %43 = vector.load %arg3[%c0_29, %c0_30, %c0_31] : memref<3x64x128xf32, #tpu.memory_space<vmem>>, vector<1x64x128xf32>
    %44 = vector.shape_cast %43 : vector<1x64x128xf32> to vector<64x128xf32>
    %cst_32 = arith.constant dense<0.000000e+00> : vector<16x128xf32>
    %45 = tpu.matmul %38, %44, %cst_32 {dimension_numbers = #tpu.dot_dimension_numbers<[1], [0], [0], [1], [0, 0, 1, 1], [], []>} : vector<16x64xf32>, vector<64x128xf32>, vector<16x128xf32> -> vector<16x128xf32>
    %c1_33 = arith.constant 1 : index
    %c0_34 = arith.constant 0 : index
    %c0_35 = arith.constant 0 : index
    %46 = vector.load %arg3[%c1_33, %c0_34, %c0_35] : memref<3x64x128xf32, #tpu.memory_space<vmem>>, vector<1x64x128xf32>
    %47 = vector.shape_cast %46 : vector<1x64x128xf32> to vector<64x128xf32>
    %cst_36 = arith.constant dense<0.000000e+00> : vector<16x128xf32>
    %48 = tpu.matmul %31, %47, %cst_36 {dimension_numbers = #tpu.dot_dimension_numbers<[1], [0], [0], [1], [0, 0, 1, 1], [], []>} : vector<16x64xf32>, vector<64x128xf32>, vector<16x128xf32> -> vector<16x128xf32>
    %49 = arith.addf %45, %48 : vector<16x128xf32>
    %c2_37 = arith.constant 2 : index
    %c0_38 = arith.constant 0 : index
    %c0_39 = arith.constant 0 : index
    %50 = vector.load %arg3[%c2_37, %c0_38, %c0_39] : memref<3x64x128xf32, #tpu.memory_space<vmem>>, vector<1x64x128xf32>
    %51 = vector.shape_cast %50 : vector<1x64x128xf32> to vector<64x128xf32>
    %cst_40 = arith.constant dense<0.000000e+00> : vector<16x128xf32>
    %52 = tpu.matmul %42, %51, %cst_40 {dimension_numbers = #tpu.dot_dimension_numbers<[1], [0], [0], [1], [0, 0, 1, 1], [], []>} : vector<16x64xf32>, vector<64x128xf32>, vector<16x128xf32> -> vector<16x128xf32>
    %53 = arith.addf %49, %52 : vector<16x128xf32>
    %c0_41 = arith.constant 0 : index
    %c0_42 = arith.constant 0 : index
    %54 = vector.load %arg4[%c0_41, %c0_42] : memref<1x128xf32, #tpu.memory_space<vmem>>, vector<1x128xf32>
    %55 = vector.broadcast %54 : vector<1x128xf32> to vector<16x128xf32>
    %56 = arith.addf %53, %55 : vector<16x128xf32>
    %cst_43 = arith.constant 0.000000e+00 : f32
    %57 = vector.broadcast %cst_43 : f32 to vector<16x128xf32>
    %58 = arith.maximumf %56, %57 : vector<16x128xf32>
    %c0_44 = arith.constant 0 : index
    %c0_45 = arith.constant 0 : index
    %59 = vector.load %arg21[%c0_44, %c0_45] : memref<16x128xf32, #tpu.memory_space<vmem>>, vector<16x128xf32>
    tpu.vector_store %arg21[%c0_44, %c0_45], %58 {strides = array<i32>} : memref<16x128xf32, #tpu.memory_space<vmem>>, vector<16x128xf32>,
    %c0_46 = arith.constant 0 : index
    %c0_47 = arith.constant 0 : index
    %60 = tpu.strided_load %arg21[%c0_46, %c0_47] {strides = array<i32: 8, 1>} : memref<16x128xf32, #tpu.memory_space<vmem>>, vector<2x128xf32>
    %c1_48 = arith.constant 1 : index
    %c0_49 = arith.constant 0 : index
    %61 = tpu.strided_load %arg21[%c1_48, %c0_49] {strides = array<i32: 8, 1>} : memref<16x128xf32, #tpu.memory_space<vmem>>, vector<2x128xf32>
    %62 = arith.maximumf %60, %61 : vector<2x128xf32>
    %c2_50 = arith.constant 2 : index
    %c0_51 = arith.constant 0 : index
    %63 = tpu.strided_load %arg21[%c2_50, %c0_51] {strides = array<i32: 8, 1>} : memref<16x128xf32, #tpu.memory_space<vmem>>, vector<2x128xf32>
    %c3 = arith.constant 3 : index
    %c0_52 = arith.constant 0 : index
    %64 = tpu.strided_load %arg21[%c3, %c0_52] {strides = array<i32: 8, 1>} : memref<16x128xf32, #tpu.memory_space<vmem>>, vector<2x128xf32>
    %65 = arith.maximumf %63, %64 : vector<2x128xf32>
    %c4 = arith.constant 4 : index
    %c0_53 = arith.constant 0 : index
    %66 = tpu.strided_load %arg21[%c4, %c0_53] {strides = array<i32: 8, 1>} : memref<16x128xf32, #tpu.memory_space<vmem>>, vector<2x128xf32>
    %c5 = arith.constant 5 : index
    %c0_54 = arith.constant 0 : index
    %67 = tpu.strided_load %arg21[%c5, %c0_54] {strides = array<i32: 8, 1>} : memref<16x128xf32, #tpu.memory_space<vmem>>, vector<2x128xf32>
    %68 = arith.maximumf %66, %67 : vector<2x128xf32>
    %c6 = arith.constant 6 : index
    %c0_55 = arith.constant 0 : index
    %69 = tpu.strided_load %arg21[%c6, %c0_55] {strides = array<i32: 8, 1>} : memref<16x128xf32, #tpu.memory_space<vmem>>, vector<2x128xf32>
    %c7 = arith.constant 7 : index
    %c0_56 = arith.constant 0 : index
    %70 = tpu.strided_load %arg21[%c7, %c0_56] {strides = array<i32: 8, 1>} : memref<16x128xf32, #tpu.memory_space<vmem>>, vector<2x128xf32>
    %71 = arith.maximumf %69, %70 : vector<2x128xf32>
    %72 = tpu.concatenate %62, %65, %68, %71 in 0 : vector<2x128xf32>, vector<2x128xf32>, vector<2x128xf32>, vector<2x128xf32> -> vector<8x128xf32>
    %c0_57 = arith.constant 0 : index
    %c0_58 = arith.constant 0 : index
    %c0_59 = arith.constant 0 : index
    %73 = vector.load %arg9[%c0_57, %c0_58, %c0_59] : memref<4x128x32xf32, #tpu.memory_space<vmem>>, vector<1x128x32xf32>
    %74 = vector.shape_cast %73 : vector<1x128x32xf32> to vector<128x32xf32>
    %cst_60 = arith.constant dense<0.000000e+00> : vector<8x32xf32>
    %75 = tpu.matmul %72, %74, %cst_60 {dimension_numbers = #tpu.dot_dimension_numbers<[1], [0], [0], [1], [0, 0, 1, 1], [], []>} : vector<8x128xf32>, vector<128x32xf32>, vector<8x32xf32> -> vector<8x32xf32>
    %c0_61 = arith.constant 0 : index
    %c0_62 = arith.constant 0 : index
    %c0_63 = arith.constant 0 : index
    %76 = vector.load %arg11[%c0_61, %c0_62, %c0_63] : memref<4x1x32xf32, #tpu.memory_space<vmem>>, vector<1x1x32xf32>
    %77 = vector.shape_cast %76 : vector<1x1x32xf32> to vector<1x32xf32>
    %78 = vector.broadcast %77 : vector<1x32xf32> to vector<8x32xf32>
    %79 = arith.addf %75, %78 : vector<8x32xf32>
    %c1_64 = arith.constant 1 : index
    %c0_65 = arith.constant 0 : index
    %c0_66 = arith.constant 0 : index
    %80 = vector.load %arg9[%c1_64, %c0_65, %c0_66] : memref<4x128x32xf32, #tpu.memory_space<vmem>>, vector<1x128x32xf32>
    %81 = vector.shape_cast %80 : vector<1x128x32xf32> to vector<128x32xf32>
    %cst_67 = arith.constant dense<0.000000e+00> : vector<8x32xf32>
    %82 = tpu.matmul %72, %81, %cst_67 {dimension_numbers = #tpu.dot_dimension_numbers<[1], [0], [0], [1], [0, 0, 1, 1], [], []>} : vector<8x128xf32>, vector<128x32xf32>, vector<8x32xf32> -> vector<8x32xf32>
    %c1_68 = arith.constant 1 : index
    %c0_69 = arith.constant 0 : index
    %c0_70 = arith.constant 0 : index
    %83 = vector.load %arg11[%c1_68, %c0_69, %c0_70] : memref<4x1x32xf32, #tpu.memory_space<vmem>>, vector<1x1x32xf32>
    %84 = vector.shape_cast %83 : vector<1x1x32xf32> to vector<1x32xf32>
    %85 = vector.broadcast %84 : vector<1x32xf32> to vector<8x32xf32>
    %86 = arith.addf %82, %85 : vector<8x32xf32>
    %c2_71 = arith.constant 2 : index
    %c0_72 = arith.constant 0 : index
    %c0_73 = arith.constant 0 : index
    %87 = vector.load %arg9[%c2_71, %c0_72, %c0_73] : memref<4x128x32xf32, #tpu.memory_space<vmem>>, vector<1x128x32xf32>
    %88 = vector.shape_cast %87 : vector<1x128x32xf32> to vector<128x32xf32>
    %cst_74 = arith.constant dense<0.000000e+00> : vector<8x32xf32>
    %89 = tpu.matmul %72, %88, %cst_74 {dimension_numbers = #tpu.dot_dimension_numbers<[1], [0], [0], [1], [0, 0, 1, 1], [], []>} : vector<8x128xf32>, vector<128x32xf32>, vector<8x32xf32> -> vector<8x32xf32>
    %c2_75 = arith.constant 2 : index
    %c0_76 = arith.constant 0 : index
    %c0_77 = arith.constant 0 : index
    %90 = vector.load %arg11[%c2_75, %c0_76, %c0_77] : memref<4x1x32xf32, #tpu.memory_space<vmem>>, vector<1x1x32xf32>
    %91 = vector.shape_cast %90 : vector<1x1x32xf32> to vector<1x32xf32>
    %92 = vector.broadcast %91 : vector<1x32xf32> to vector<8x32xf32>
    %93 = arith.addf %89, %92 : vector<8x32xf32>
    %c3_78 = arith.constant 3 : index
    %c0_79 = arith.constant 0 : index
    %c0_80 = arith.constant 0 : index
    %94 = vector.load %arg9[%c3_78, %c0_79, %c0_80] : memref<4x128x32xf32, #tpu.memory_space<vmem>>, vector<1x128x32xf32>
    %95 = vector.shape_cast %94 : vector<1x128x32xf32> to vector<128x32xf32>
    %cst_81 = arith.constant dense<0.000000e+00> : vector<8x32xf32>
    %96 = tpu.matmul %72, %95, %cst_81 {dimension_numbers = #tpu.dot_dimension_numbers<[1], [0], [0], [1], [0, 0, 1, 1], [], []>} : vector<8x128xf32>, vector<128x32xf32>, vector<8x32xf32> -> vector<8x32xf32>
    %c3_82 = arith.constant 3 : index
    %c0_83 = arith.constant 0 : index
    %c0_84 = arith.constant 0 : index
    %97 = vector.load %arg11[%c3_82, %c0_83, %c0_84] : memref<4x1x32xf32, #tpu.memory_space<vmem>>, vector<1x1x32xf32>
    %98 = vector.shape_cast %97 : vector<1x1x32xf32> to vector<1x32xf32>
    %99 = vector.broadcast %98 : vector<1x32xf32> to vector<8x32xf32>
    %100 = arith.addf %96, %99 : vector<8x32xf32>
    %cst_85 = arith.constant 0.000000e+00 : f32
    %101 = vector.broadcast %cst_85 : f32 to vector<2x32xf32>
    %cst_86 = arith.constant 0.000000e+00 : f32
    %102 = vector.broadcast %cst_86 : f32 to vector<2x32xf32>
    %cst_87 = arith.constant 0.000000e+00 : f32
    %103 = vector.broadcast %cst_87 : f32 to vector<2x32xf32>
    %cst_88 = arith.constant 0.000000e+00 : f32
    %104 = vector.broadcast %cst_88 : f32 to vector<2x32xf32>
    %105 = vector.extract_strided_slice %79 {offsets = [0, 0], sizes = [2, 32], strides = [1, 1]} : vector<8x32xf32> to vector<2x32xf32>
    %c0_89 = arith.constant 0 : index
    %c0_90 = arith.constant 0 : index
    %c0_91 = arith.constant 0 : index
    %106 = vector.load %arg10[%c0_89, %c0_90, %c0_91] : memref<4x32x32xf32, #tpu.memory_space<vmem>>, vector<1x32x32xf32>
    %107 = vector.shape_cast %106 : vector<1x32x32xf32> to vector<32x32xf32>
    %cst_92 = arith.constant dense<0.000000e+00> : vector<2x32xf32>
    %108 = tpu.matmul %101, %107, %cst_92 {dimension_numbers = #tpu.dot_dimension_numbers<[1], [0], [0], [1], [0, 0, 1, 1], [], []>} : vector<2x32xf32>, vector<32x32xf32>, vector<2x32xf32> -> vector<2x32xf32>
    %109 = arith.addf %105, %108 : vector<2x32xf32>
    %110 = vector.extract_strided_slice %86 {offsets = [0, 0], sizes = [2, 32], strides = [1, 1]} : vector<8x32xf32> to vector<2x32xf32>
    %c1_93 = arith.constant 1 : index
    %c0_94 = arith.constant 0 : index
    %c0_95 = arith.constant 0 : index
    %111 = vector.load %arg10[%c1_93, %c0_94, %c0_95] : memref<4x32x32xf32, #tpu.memory_space<vmem>>, vector<1x32x32xf32>
    %112 = vector.shape_cast %111 : vector<1x32x32xf32> to vector<32x32xf32>
    %cst_96 = arith.constant dense<0.000000e+00> : vector<2x32xf32>
    %113 = tpu.matmul %101, %112, %cst_96 {dimension_numbers = #tpu.dot_dimension_numbers<[1], [0], [0], [1], [0, 0, 1, 1], [], []>} : vector<2x32xf32>, vector<32x32xf32>, vector<2x32xf32> -> vector<2x32xf32>
    %114 = arith.addf %110, %113 : vector<2x32xf32>
    %115 = vector.extract_strided_slice %93 {offsets = [0, 0], sizes = [2, 32], strides = [1, 1]} : vector<8x32xf32> to vector<2x32xf32>
    %c2_97 = arith.constant 2 : index
    %c0_98 = arith.constant 0 : index
    %c0_99 = arith.constant 0 : index
    %116 = vector.load %arg10[%c2_97, %c0_98, %c0_99] : memref<4x32x32xf32, #tpu.memory_space<vmem>>, vector<1x32x32xf32>
    %117 = vector.shape_cast %116 : vector<1x32x32xf32> to vector<32x32xf32>
    %cst_100 = arith.constant dense<0.000000e+00> : vector<2x32xf32>
    %118 = tpu.matmul %101, %117, %cst_100 {dimension_numbers = #tpu.dot_dimension_numbers<[1], [0], [0], [1], [0, 0, 1, 1], [], []>} : vector<2x32xf32>, vector<32x32xf32>, vector<2x32xf32> -> vector<2x32xf32>
    %119 = arith.addf %115, %118 : vector<2x32xf32>
    %120 = vector.extract_strided_slice %100 {offsets = [0, 0], sizes = [2, 32], strides = [1, 1]} : vector<8x32xf32> to vector<2x32xf32>
    %c3_101 = arith.constant 3 : index
    %c0_102 = arith.constant 0 : index
    %c0_103 = arith.constant 0 : index
    %121 = vector.load %arg10[%c3_101, %c0_102, %c0_103] : memref<4x32x32xf32, #tpu.memory_space<vmem>>, vector<1x32x32xf32>
    %122 = vector.shape_cast %121 : vector<1x32x32xf32> to vector<32x32xf32>
    %cst_104 = arith.constant dense<0.000000e+00> : vector<2x32xf32>
    %123 = tpu.matmul %101, %122, %cst_104 {dimension_numbers = #tpu.dot_dimension_numbers<[1], [0], [0], [1], [0, 0, 1, 1], [], []>} : vector<2x32xf32>, vector<32x32xf32>, vector<2x32xf32> -> vector<2x32xf32>
    %124 = arith.addf %120, %123 : vector<2x32xf32>
    %125 = arith.negf %109 : vector<2x32xf32>
    %126 = math.exp %125 : vector<2x32xf32>
    %cst_105 = arith.constant 1.000000e+00 : f32
    %127 = vector.broadcast %cst_105 : f32 to vector<2x32xf32>
    %128 = arith.addf %127, %126 : vector<2x32xf32>
    %129 = arith.divf %127, %128 : vector<2x32xf32>
    %130 = arith.negf %114 : vector<2x32xf32>
    %131 = math.exp %130 : vector<2x32xf32>
    %cst_106 = arith.constant 1.000000e+00 : f32
    %132 = vector.broadcast %cst_106 : f32 to vector<2x32xf32>
    %133 = arith.addf %132, %131 : vector<2x32xf32>
    %134 = arith.divf %132, %133 : vector<2x32xf32>
    %135 = math.tanh %119 : vector<2x32xf32>
    %136 = arith.negf %124 : vector<2x32xf32>
    %137 = math.exp %136 : vector<2x32xf32>
    %cst_107 = arith.constant 1.000000e+00 : f32
    %138 = vector.broadcast %cst_107 : f32 to vector<2x32xf32>
    %139 = arith.addf %138, %137 : vector<2x32xf32>
    %140 = arith.divf %138, %139 : vector<2x32xf32>
    %141 = arith.mulf %134, %103 : vector<2x32xf32>
    %142 = arith.mulf %129, %135 : vector<2x32xf32>
    %143 = arith.addf %141, %142 : vector<2x32xf32>
    %144 = math.tanh %143 : vector<2x32xf32>
    %145 = arith.mulf %140, %144 : vector<2x32xf32>
    %c0_108 = arith.constant 0 : index
    %c0_109 = arith.constant 0 : index
    %c0_110 = arith.constant 0 : index
    %146 = vector.load %arg12[%c0_108, %c0_109, %c0_110] : memref<4x32x32xf32, #tpu.memory_space<vmem>>, vector<1x32x32xf32>
    %147 = vector.shape_cast %146 : vector<1x32x32xf32> to vector<32x32xf32>
    %cst_111 = arith.constant dense<0.000000e+00> : vector<2x32xf32>
    %148 = tpu.matmul %145, %147, %cst_111 {dimension_numbers = #tpu.dot_dimension_numbers<[1], [0], [0], [1], [0, 0, 1, 1], [], []>} : vector<2x32xf32>, vector<32x32xf32>, vector<2x32xf32> -> vector<2x32xf32>
    %c0_112 = arith.constant 0 : index
    %c0_113 = arith.constant 0 : index
    %c0_114 = arith.constant 0 : index
    %149 = vector.load %arg14[%c0_112, %c0_113, %c0_114] : memref<4x1x32xf32, #tpu.memory_space<vmem>>, vector<1x1x32xf32>
    %150 = vector.shape_cast %149 : vector<1x1x32xf32> to vector<1x32xf32>
    %151 = vector.broadcast %150 : vector<1x32xf32> to vector<2x32xf32>
    %152 = arith.addf %148, %151 : vector<2x32xf32>
    %c0_115 = arith.constant 0 : index
    %c0_116 = arith.constant 0 : index
    %c0_117 = arith.constant 0 : index
    %153 = vector.load %arg13[%c0_115, %c0_116, %c0_117] : memref<4x32x32xf32, #tpu.memory_space<vmem>>, vector<1x32x32xf32>
    %154 = vector.shape_cast %153 : vector<1x32x32xf32> to vector<32x32xf32>
    %cst_118 = arith.constant dense<0.000000e+00> : vector<2x32xf32>
    %155 = tpu.matmul %102, %154, %cst_118 {dimension_numbers = #tpu.dot_dimension_numbers<[1], [0], [0], [1], [0, 0, 1, 1], [], []>} : vector<2x32xf32>, vector<32x32xf32>, vector<2x32xf32> -> vector<2x32xf32>
    %156 = arith.addf %152, %155 : vector<2x32xf32>
    %c1_119 = arith.constant 1 : index
    %c0_120 = arith.constant 0 : index
    %c0_121 = arith.constant 0 : index
    %157 = vector.load %arg12[%c1_119, %c0_120, %c0_121] : memref<4x32x32xf32, #tpu.memory_space<vmem>>, vector<1x32x32xf32>
    %158 = vector.shape_cast %157 : vector<1x32x32xf32> to vector<32x32xf32>
    %cst_122 = arith.constant dense<0.000000e+00> : vector<2x32xf32>
    %159 = tpu.matmul %145, %158, %cst_122 {dimension_numbers = #tpu.dot_dimension_numbers<[1], [0], [0], [1], [0, 0, 1, 1], [], []>} : vector<2x32xf32>, vector<32x32xf32>, vector<2x32xf32> -> vector<2x32xf32>
    %c1_123 = arith.constant 1 : index
    %c0_124 = arith.constant 0 : index
    %c0_125 = arith.constant 0 : index
    %160 = vector.load %arg14[%c1_123, %c0_124, %c0_125] : memref<4x1x32xf32, #tpu.memory_space<vmem>>, vector<1x1x32xf32>
    %161 = vector.shape_cast %160 : vector<1x1x32xf32> to vector<1x32xf32>
    %162 = vector.broadcast %161 : vector<1x32xf32> to vector<2x32xf32>
    %163 = arith.addf %159, %162 : vector<2x32xf32>
    %c1_126 = arith.constant 1 : index
    %c0_127 = arith.constant 0 : index
    %c0_128 = arith.constant 0 : index
    %164 = vector.load %arg13[%c1_126, %c0_127, %c0_128] : memref<4x32x32xf32, #tpu.memory_space<vmem>>, vector<1x32x32xf32>
    %165 = vector.shape_cast %164 : vector<1x32x32xf32> to vector<32x32xf32>
    %cst_129 = arith.constant dense<0.000000e+00> : vector<2x32xf32>
    %166 = tpu.matmul %102, %165, %cst_129 {dimension_numbers = #tpu.dot_dimension_numbers<[1], [0], [0], [1], [0, 0, 1, 1], [], []>} : vector<2x32xf32>, vector<32x32xf32>, vector<2x32xf32> -> vector<2x32xf32>
    %167 = arith.addf %163, %166 : vector<2x32xf32>
    %c2_130 = arith.constant 2 : index
    %c0_131 = arith.constant 0 : index
    %c0_132 = arith.constant 0 : index
    %168 = vector.load %arg12[%c2_130, %c0_131, %c0_132] : memref<4x32x32xf32, #tpu.memory_space<vmem>>, vector<1x32x32xf32>
    %169 = vector.shape_cast %168 : vector<1x32x32xf32> to vector<32x32xf32>
    %cst_133 = arith.constant dense<0.000000e+00> : vector<2x32xf32>
    %170 = tpu.matmul %145, %169, %cst_133 {dimension_numbers = #tpu.dot_dimension_numbers<[1], [0], [0], [1], [0, 0, 1, 1], [], []>} : vector<2x32xf32>, vector<32x32xf32>, vector<2x32xf32> -> vector<2x32xf32>
    %c2_134 = arith.constant 2 : index
    %c0_135 = arith.constant 0 : index
    %c0_136 = arith.constant 0 : index
    %171 = vector.load %arg14[%c2_134, %c0_135, %c0_136] : memref<4x1x32xf32, #tpu.memory_space<vmem>>, vector<1x1x32xf32>
    %172 = vector.shape_cast %171 : vector<1x1x32xf32> to vector<1x32xf32>
    %173 = vector.broadcast %172 : vector<1x32xf32> to vector<2x32xf32>
    %174 = arith.addf %170, %173 : vector<2x32xf32>
    %c2_137 = arith.constant 2 : index
    %c0_138 = arith.constant 0 : index
    %c0_139 = arith.constant 0 : index
    %175 = vector.load %arg13[%c2_137, %c0_138, %c0_139] : memref<4x32x32xf32, #tpu.memory_space<vmem>>, vector<1x32x32xf32>
    %176 = vector.shape_cast %175 : vector<1x32x32xf32> to vector<32x32xf32>
    %cst_140 = arith.constant dense<0.000000e+00> : vector<2x32xf32>
    %177 = tpu.matmul %102, %176, %cst_140 {dimension_numbers = #tpu.dot_dimension_numbers<[1], [0], [0], [1], [0, 0, 1, 1], [], []>} : vector<2x32xf32>, vector<32x32xf32>, vector<2x32xf32> -> vector<2x32xf32>
    %178 = arith.addf %174, %177 : vector<2x32xf32>
    %c3_141 = arith.constant 3 : index
    %c0_142 = arith.constant 0 : index
    %c0_143 = arith.constant 0 : index
    %179 = vector.load %arg12[%c3_141, %c0_142, %c0_143] : memref<4x32x32xf32, #tpu.memory_space<vmem>>, vector<1x32x32xf32>
    %180 = vector.shape_cast %179 : vector<1x32x32xf32> to vector<32x32xf32>
    %cst_144 = arith.constant dense<0.000000e+00> : vector<2x32xf32>
    %181 = tpu.matmul %145, %180, %cst_144 {dimension_numbers = #tpu.dot_dimension_numbers<[1], [0], [0], [1], [0, 0, 1, 1], [], []>} : vector<2x32xf32>, vector<32x32xf32>, vector<2x32xf32> -> vector<2x32xf32>
    %c3_145 = arith.constant 3 : index
    %c0_146 = arith.constant 0 : index
    %c0_147 = arith.constant 0 : index
    %182 = vector.load %arg14[%c3_145, %c0_146, %c0_147] : memref<4x1x32xf32, #tpu.memory_space<vmem>>, vector<1x1x32xf32>
    %183 = vector.shape_cast %182 : vector<1x1x32xf32> to vector<1x32xf32>
    %184 = vector.broadcast %183 : vector<1x32xf32> to vector<2x32xf32>
    %185 = arith.addf %181, %184 : vector<2x32xf32>
    %c3_148 = arith.constant 3 : index
    %c0_149 = arith.constant 0 : index
    %c0_150 = arith.constant 0 : index
    %186 = vector.load %arg13[%c3_148, %c0_149, %c0_150] : memref<4x32x32xf32, #tpu.memory_space<vmem>>, vector<1x32x32xf32>
    %187 = vector.shape_cast %186 : vector<1x32x32xf32> to vector<32x32xf32>
    %cst_151 = arith.constant dense<0.000000e+00> : vector<2x32xf32>
    %188 = tpu.matmul %102, %187, %cst_151 {dimension_numbers = #tpu.dot_dimension_numbers<[1], [0], [0], [1], [0, 0, 1, 1], [], []>} : vector<2x32xf32>, vector<32x32xf32>, vector<2x32xf32> -> vector<2x32xf32>
    %189 = arith.addf %185, %188 : vector<2x32xf32>
    %190 = arith.negf %156 : vector<2x32xf32>
    %191 = math.exp %190 : vector<2x32xf32>
    %cst_152 = arith.constant 1.000000e+00 : f32
    %192 = vector.broadcast %cst_152 : f32 to vector<2x32xf32>
    %193 = arith.addf %192, %191 : vector<2x32xf32>
    %194 = arith.divf %192, %193 : vector<2x32xf32>
    %195 = arith.negf %167 : vector<2x32xf32>
    %196 = math.exp %195 : vector<2x32xf32>
    %cst_153 = arith.constant 1.000000e+00 : f32
    %197 = vector.broadcast %cst_153 : f32 to vector<2x32xf32>
    %198 = arith.addf %197, %196 : vector<2x32xf32>
    %199 = arith.divf %197, %198 : vector<2x32xf32>
    %200 = math.tanh %178 : vector<2x32xf32>
    %201 = arith.negf %189 : vector<2x32xf32>
    %202 = math.exp %201 : vector<2x32xf32>
    %cst_154 = arith.constant 1.000000e+00 : f32
    %203 = vector.broadcast %cst_154 : f32 to vector<2x32xf32>
    %204 = arith.addf %203, %202 : vector<2x32xf32>
    %205 = arith.divf %203, %204 : vector<2x32xf32>
    %206 = arith.mulf %199, %104 : vector<2x32xf32>
    %207 = arith.mulf %194, %200 : vector<2x32xf32>
    %208 = arith.addf %206, %207 : vector<2x32xf32>
    %209 = math.tanh %208 : vector<2x32xf32>
    %210 = arith.mulf %205, %209 : vector<2x32xf32>
    %211 = vector.extract_strided_slice %79 {offsets = [2, 0], sizes = [2, 32], strides = [1, 1]} : vector<8x32xf32> to vector<2x32xf32>
    %c0_155 = arith.constant 0 : index
    %c0_156 = arith.constant 0 : index
    %c0_157 = arith.constant 0 : index
    %212 = vector.load %arg10[%c0_155, %c0_156, %c0_157] : memref<4x32x32xf32, #tpu.memory_space<vmem>>, vector<1x32x32xf32>
    %213 = vector.shape_cast %212 : vector<1x32x32xf32> to vector<32x32xf32>
    %cst_158 = arith.constant dense<0.000000e+00> : vector<2x32xf32>
    %214 = tpu.matmul %145, %213, %cst_158 {dimension_numbers = #tpu.dot_dimension_numbers<[1], [0], [0], [1], [0, 0, 1, 1], [], []>} : vector<2x32xf32>, vector<32x32xf32>, vector<2x32xf32> -> vector<2x32xf32>
    %215 = arith.addf %211, %214 : vector<2x32xf32>
    %216 = vector.extract_strided_slice %86 {offsets = [2, 0], sizes = [2, 32], strides = [1, 1]} : vector<8x32xf32> to vector<2x32xf32>
    %c1_159 = arith.constant 1 : index
    %c0_160 = arith.constant 0 : index
    %c0_161 = arith.constant 0 : index
    %217 = vector.load %arg10[%c1_159, %c0_160, %c0_161] : memref<4x32x32xf32, #tpu.memory_space<vmem>>, vector<1x32x32xf32>
    %218 = vector.shape_cast %217 : vector<1x32x32xf32> to vector<32x32xf32>
    %cst_162 = arith.constant dense<0.000000e+00> : vector<2x32xf32>
    %219 = tpu.matmul %145, %218, %cst_162 {dimension_numbers = #tpu.dot_dimension_numbers<[1], [0], [0], [1], [0, 0, 1, 1], [], []>} : vector<2x32xf32>, vector<32x32xf32>, vector<2x32xf32> -> vector<2x32xf32>
    %220 = arith.addf %216, %219 : vector<2x32xf32>
    %221 = vector.extract_strided_slice %93 {offsets = [2, 0], sizes = [2, 32], strides = [1, 1]} : vector<8x32xf32> to vector<2x32xf32>
    %c2_163 = arith.constant 2 : index
    %c0_164 = arith.constant 0 : index
    %c0_165 = arith.constant 0 : index
    %222 = vector.load %arg10[%c2_163, %c0_164, %c0_165] : memref<4x32x32xf32, #tpu.memory_space<vmem>>, vector<1x32x32xf32>
    %223 = vector.shape_cast %222 : vector<1x32x32xf32> to vector<32x32xf32>
    %cst_166 = arith.constant dense<0.000000e+00> : vector<2x32xf32>
    %224 = tpu.matmul %145, %223, %cst_166 {dimension_numbers = #tpu.dot_dimension_numbers<[1], [0], [0], [1], [0, 0, 1, 1], [], []>} : vector<2x32xf32>, vector<32x32xf32>, vector<2x32xf32> -> vector<2x32xf32>
    %225 = arith.addf %221, %224 : vector<2x32xf32>
    %226 = vector.extract_strided_slice %100 {offsets = [2, 0], sizes = [2, 32], strides = [1, 1]} : vector<8x32xf32> to vector<2x32xf32>
    %c3_167 = arith.constant 3 : index
    %c0_168 = arith.constant 0 : index
    %c0_169 = arith.constant 0 : index
    %227 = vector.load %arg10[%c3_167, %c0_168, %c0_169] : memref<4x32x32xf32, #tpu.memory_space<vmem>>, vector<1x32x32xf32>
    %228 = vector.shape_cast %227 : vector<1x32x32xf32> to vector<32x32xf32>
    %cst_170 = arith.constant dense<0.000000e+00> : vector<2x32xf32>
    %229 = tpu.matmul %145, %228, %cst_170 {dimension_numbers = #tpu.dot_dimension_numbers<[1], [0], [0], [1], [0, 0, 1, 1], [], []>} : vector<2x32xf32>, vector<32x32xf32>, vector<2x32xf32> -> vector<2x32xf32>
    %230 = arith.addf %226, %229 : vector<2x32xf32>
    %231 = arith.negf %215 : vector<2x32xf32>
    %232 = math.exp %231 : vector<2x32xf32>
    %cst_171 = arith.constant 1.000000e+00 : f32
    %233 = vector.broadcast %cst_171 : f32 to vector<2x32xf32>
    %234 = arith.addf %233, %232 : vector<2x32xf32>
    %235 = arith.divf %233, %234 : vector<2x32xf32>
    %236 = arith.negf %220 : vector<2x32xf32>
    %237 = math.exp %236 : vector<2x32xf32>
    %cst_172 = arith.constant 1.000000e+00 : f32
    %238 = vector.broadcast %cst_172 : f32 to vector<2x32xf32>
    %239 = arith.addf %238, %237 : vector<2x32xf32>
    %240 = arith.divf %238, %239 : vector<2x32xf32>
    %241 = math.tanh %225 : vector<2x32xf32>
    %242 = arith.negf %230 : vector<2x32xf32>
    %243 = math.exp %242 : vector<2x32xf32>
    %cst_173 = arith.constant 1.000000e+00 : f32
    %244 = vector.broadcast %cst_173 : f32 to vector<2x32xf32>
    %245 = arith.addf %244, %243 : vector<2x32xf32>
    %246 = arith.divf %244, %245 : vector<2x32xf32>
    %247 = arith.mulf %240, %143 : vector<2x32xf32>
    %248 = arith.mulf %235, %241 : vector<2x32xf32>
    %249 = arith.addf %247, %248 : vector<2x32xf32>
    %250 = math.tanh %249 : vector<2x32xf32>
    %251 = arith.mulf %246, %250 : vector<2x32xf32>
    %c0_174 = arith.constant 0 : index
    %c0_175 = arith.constant 0 : index
    %c0_176 = arith.constant 0 : index
    %252 = vector.load %arg12[%c0_174, %c0_175, %c0_176] : memref<4x32x32xf32, #tpu.memory_space<vmem>>, vector<1x32x32xf32>
    %253 = vector.shape_cast %252 : vector<1x32x32xf32> to vector<32x32xf32>
    %cst_177 = arith.constant dense<0.000000e+00> : vector<2x32xf32>
    %254 = tpu.matmul %251, %253, %cst_177 {dimension_numbers = #tpu.dot_dimension_numbers<[1], [0], [0], [1], [0, 0, 1, 1], [], []>} : vector<2x32xf32>, vector<32x32xf32>, vector<2x32xf32> -> vector<2x32xf32>
    %c0_178 = arith.constant 0 : index
    %c0_179 = arith.constant 0 : index
    %c0_180 = arith.constant 0 : index
    %255 = vector.load %arg14[%c0_178, %c0_179, %c0_180] : memref<4x1x32xf32, #tpu.memory_space<vmem>>, vector<1x1x32xf32>
    %256 = vector.shape_cast %255 : vector<1x1x32xf32> to vector<1x32xf32>
    %257 = vector.broadcast %256 : vector<1x32xf32> to vector<2x32xf32>
    %258 = arith.addf %254, %257 : vector<2x32xf32>
    %c0_181 = arith.constant 0 : index
    %c0_182 = arith.constant 0 : index
    %c0_183 = arith.constant 0 : index
    %259 = vector.load %arg13[%c0_181, %c0_182, %c0_183] : memref<4x32x32xf32, #tpu.memory_space<vmem>>, vector<1x32x32xf32>
    %260 = vector.shape_cast %259 : vector<1x32x32xf32> to vector<32x32xf32>
    %cst_184 = arith.constant dense<0.000000e+00> : vector<2x32xf32>
    %261 = tpu.matmul %210, %260, %cst_184 {dimension_numbers = #tpu.dot_dimension_numbers<[1], [0], [0], [1], [0, 0, 1, 1], [], []>} : vector<2x32xf32>, vector<32x32xf32>, vector<2x32xf32> -> vector<2x32xf32>
    %262 = arith.addf %258, %261 : vector<2x32xf32>
    %c1_185 = arith.constant 1 : index
    %c0_186 = arith.constant 0 : index
    %c0_187 = arith.constant 0 : index
    %263 = vector.load %arg12[%c1_185, %c0_186, %c0_187] : memref<4x32x32xf32, #tpu.memory_space<vmem>>, vector<1x32x32xf32>
    %264 = vector.shape_cast %263 : vector<1x32x32xf32> to vector<32x32xf32>
    %cst_188 = arith.constant dense<0.000000e+00> : vector<2x32xf32>
    %265 = tpu.matmul %251, %264, %cst_188 {dimension_numbers = #tpu.dot_dimension_numbers<[1], [0], [0], [1], [0, 0, 1, 1], [], []>} : vector<2x32xf32>, vector<32x32xf32>, vector<2x32xf32> -> vector<2x32xf32>
    %c1_189 = arith.constant 1 : index
    %c0_190 = arith.constant 0 : index
    %c0_191 = arith.constant 0 : index
    %266 = vector.load %arg14[%c1_189, %c0_190, %c0_191] : memref<4x1x32xf32, #tpu.memory_space<vmem>>, vector<1x1x32xf32>
    %267 = vector.shape_cast %266 : vector<1x1x32xf32> to vector<1x32xf32>
    %268 = vector.broadcast %267 : vector<1x32xf32> to vector<2x32xf32>
    %269 = arith.addf %265, %268 : vector<2x32xf32>
    %c1_192 = arith.constant 1 : index
    %c0_193 = arith.constant 0 : index
    %c0_194 = arith.constant 0 : index
    %270 = vector.load %arg13[%c1_192, %c0_193, %c0_194] : memref<4x32x32xf32, #tpu.memory_space<vmem>>, vector<1x32x32xf32>
    %271 = vector.shape_cast %270 : vector<1x32x32xf32> to vector<32x32xf32>
    %cst_195 = arith.constant dense<0.000000e+00> : vector<2x32xf32>
    %272 = tpu.matmul %210, %271, %cst_195 {dimension_numbers = #tpu.dot_dimension_numbers<[1], [0], [0], [1], [0, 0, 1, 1], [], []>} : vector<2x32xf32>, vector<32x32xf32>, vector<2x32xf32> -> vector<2x32xf32>
    %273 = arith.addf %269, %272 : vector<2x32xf32>
    %c2_196 = arith.constant 2 : index
    %c0_197 = arith.constant 0 : index
    %c0_198 = arith.constant 0 : index
    %274 = vector.load %arg12[%c2_196, %c0_197, %c0_198] : memref<4x32x32xf32, #tpu.memory_space<vmem>>, vector<1x32x32xf32>
    %275 = vector.shape_cast %274 : vector<1x32x32xf32> to vector<32x32xf32>
    %cst_199 = arith.constant dense<0.000000e+00> : vector<2x32xf32>
    %276 = tpu.matmul %251, %275, %cst_199 {dimension_numbers = #tpu.dot_dimension_numbers<[1], [0], [0], [1], [0, 0, 1, 1], [], []>} : vector<2x32xf32>, vector<32x32xf32>, vector<2x32xf32> -> vector<2x32xf32>
    %c2_200 = arith.constant 2 : index
    %c0_201 = arith.constant 0 : index
    %c0_202 = arith.constant 0 : index
    %277 = vector.load %arg14[%c2_200, %c0_201, %c0_202] : memref<4x1x32xf32, #tpu.memory_space<vmem>>, vector<1x1x32xf32>
    %278 = vector.shape_cast %277 : vector<1x1x32xf32> to vector<1x32xf32>
    %279 = vector.broadcast %278 : vector<1x32xf32> to vector<2x32xf32>
    %280 = arith.addf %276, %279 : vector<2x32xf32>
    %c2_203 = arith.constant 2 : index
    %c0_204 = arith.constant 0 : index
    %c0_205 = arith.constant 0 : index
    %281 = vector.load %arg13[%c2_203, %c0_204, %c0_205] : memref<4x32x32xf32, #tpu.memory_space<vmem>>, vector<1x32x32xf32>
    %282 = vector.shape_cast %281 : vector<1x32x32xf32> to vector<32x32xf32>
    %cst_206 = arith.constant dense<0.000000e+00> : vector<2x32xf32>
    %283 = tpu.matmul %210, %282, %cst_206 {dimension_numbers = #tpu.dot_dimension_numbers<[1], [0], [0], [1], [0, 0, 1, 1], [], []>} : vector<2x32xf32>, vector<32x32xf32>, vector<2x32xf32> -> vector<2x32xf32>
    %284 = arith.addf %280, %283 : vector<2x32xf32>
    %c3_207 = arith.constant 3 : index
    %c0_208 = arith.constant 0 : index
    %c0_209 = arith.constant 0 : index
    %285 = vector.load %arg12[%c3_207, %c0_208, %c0_209] : memref<4x32x32xf32, #tpu.memory_space<vmem>>, vector<1x32x32xf32>
    %286 = vector.shape_cast %285 : vector<1x32x32xf32> to vector<32x32xf32>
    %cst_210 = arith.constant dense<0.000000e+00> : vector<2x32xf32>
    %287 = tpu.matmul %251, %286, %cst_210 {dimension_numbers = #tpu.dot_dimension_numbers<[1], [0], [0], [1], [0, 0, 1, 1], [], []>} : vector<2x32xf32>, vector<32x32xf32>, vector<2x32xf32> -> vector<2x32xf32>
    %c3_211 = arith.constant 3 : index
    %c0_212 = arith.constant 0 : index
    %c0_213 = arith.constant 0 : index
    %288 = vector.load %arg14[%c3_211, %c0_212, %c0_213] : memref<4x1x32xf32, #tpu.memory_space<vmem>>, vector<1x1x32xf32>
    %289 = vector.shape_cast %288 : vector<1x1x32xf32> to vector<1x32xf32>
    %290 = vector.broadcast %289 : vector<1x32xf32> to vector<2x32xf32>
    %291 = arith.addf %287, %290 : vector<2x32xf32>
    %c3_214 = arith.constant 3 : index
    %c0_215 = arith.constant 0 : index
    %c0_216 = arith.constant 0 : index
    %292 = vector.load %arg13[%c3_214, %c0_215, %c0_216] : memref<4x32x32xf32, #tpu.memory_space<vmem>>, vector<1x32x32xf32>
    %293 = vector.shape_cast %292 : vector<1x32x32xf32> to vector<32x32xf32>
    %cst_217 = arith.constant dense<0.000000e+00> : vector<2x32xf32>
    %294 = tpu.matmul %210, %293, %cst_217 {dimension_numbers = #tpu.dot_dimension_numbers<[1], [0], [0], [1], [0, 0, 1, 1], [], []>} : vector<2x32xf32>, vector<32x32xf32>, vector<2x32xf32> -> vector<2x32xf32>
    %295 = arith.addf %291, %294 : vector<2x32xf32>
    %296 = arith.negf %262 : vector<2x32xf32>
    %297 = math.exp %296 : vector<2x32xf32>
    %cst_218 = arith.constant 1.000000e+00 : f32
    %298 = vector.broadcast %cst_218 : f32 to vector<2x32xf32>
    %299 = arith.addf %298, %297 : vector<2x32xf32>
    %300 = arith.divf %298, %299 : vector<2x32xf32>
    %301 = arith.negf %273 : vector<2x32xf32>
    %302 = math.exp %301 : vector<2x32xf32>
    %cst_219 = arith.constant 1.000000e+00 : f32
    %303 = vector.broadcast %cst_219 : f32 to vector<2x32xf32>
    %304 = arith.addf %303, %302 : vector<2x32xf32>
    %305 = arith.divf %303, %304 : vector<2x32xf32>
    %306 = math.tanh %284 : vector<2x32xf32>
    %307 = arith.negf %295 : vector<2x32xf32>
    %308 = math.exp %307 : vector<2x32xf32>
    %cst_220 = arith.constant 1.000000e+00 : f32
    %309 = vector.broadcast %cst_220 : f32 to vector<2x32xf32>
    %310 = arith.addf %309, %308 : vector<2x32xf32>
    %311 = arith.divf %309, %310 : vector<2x32xf32>
    %312 = arith.mulf %305, %208 : vector<2x32xf32>
    %313 = arith.mulf %300, %306 : vector<2x32xf32>
    %314 = arith.addf %312, %313 : vector<2x32xf32>
    %315 = math.tanh %314 : vector<2x32xf32>
    %316 = arith.mulf %311, %315 : vector<2x32xf32>
    %317 = vector.extract_strided_slice %79 {offsets = [4, 0], sizes = [2, 32], strides = [1, 1]} : vector<8x32xf32> to vector<2x32xf32>
    %c0_221 = arith.constant 0 : index
    %c0_222 = arith.constant 0 : index
    %c0_223 = arith.constant 0 : index
    %318 = vector.load %arg10[%c0_221, %c0_222, %c0_223] : memref<4x32x32xf32, #tpu.memory_space<vmem>>, vector<1x32x32xf32>
    %319 = vector.shape_cast %318 : vector<1x32x32xf32> to vector<32x32xf32>
    %cst_224 = arith.constant dense<0.000000e+00> : vector<2x32xf32>
    %320 = tpu.matmul %251, %319, %cst_224 {dimension_numbers = #tpu.dot_dimension_numbers<[1], [0], [0], [1], [0, 0, 1, 1], [], []>} : vector<2x32xf32>, vector<32x32xf32>, vector<2x32xf32> -> vector<2x32xf32>
    %321 = arith.addf %317, %320 : vector<2x32xf32>
    %322 = vector.extract_strided_slice %86 {offsets = [4, 0], sizes = [2, 32], strides = [1, 1]} : vector<8x32xf32> to vector<2x32xf32>
    %c1_225 = arith.constant 1 : index
    %c0_226 = arith.constant 0 : index
    %c0_227 = arith.constant 0 : index
    %323 = vector.load %arg10[%c1_225, %c0_226, %c0_227] : memref<4x32x32xf32, #tpu.memory_space<vmem>>, vector<1x32x32xf32>
    %324 = vector.shape_cast %323 : vector<1x32x32xf32> to vector<32x32xf32>
    %cst_228 = arith.constant dense<0.000000e+00> : vector<2x32xf32>
    %325 = tpu.matmul %251, %324, %cst_228 {dimension_numbers = #tpu.dot_dimension_numbers<[1], [0], [0], [1], [0, 0, 1, 1], [], []>} : vector<2x32xf32>, vector<32x32xf32>, vector<2x32xf32> -> vector<2x32xf32>
    %326 = arith.addf %322, %325 : vector<2x32xf32>
    %327 = vector.extract_strided_slice %93 {offsets = [4, 0], sizes = [2, 32], strides = [1, 1]} : vector<8x32xf32> to vector<2x32xf32>
    %c2_229 = arith.constant 2 : index
    %c0_230 = arith.constant 0 : index
    %c0_231 = arith.constant 0 : index
    %328 = vector.load %arg10[%c2_229, %c0_230, %c0_231] : memref<4x32x32xf32, #tpu.memory_space<vmem>>, vector<1x32x32xf32>
    %329 = vector.shape_cast %328 : vector<1x32x32xf32> to vector<32x32xf32>
    %cst_232 = arith.constant dense<0.000000e+00> : vector<2x32xf32>
    %330 = tpu.matmul %251, %329, %cst_232 {dimension_numbers = #tpu.dot_dimension_numbers<[1], [0], [0], [1], [0, 0, 1, 1], [], []>} : vector<2x32xf32>, vector<32x32xf32>, vector<2x32xf32> -> vector<2x32xf32>
    %331 = arith.addf %327, %330 : vector<2x32xf32>
    %332 = vector.extract_strided_slice %100 {offsets = [4, 0], sizes = [2, 32], strides = [1, 1]} : vector<8x32xf32> to vector<2x32xf32>
    %c3_233 = arith.constant 3 : index
    %c0_234 = arith.constant 0 : index
    %c0_235 = arith.constant 0 : index
    %333 = vector.load %arg10[%c3_233, %c0_234, %c0_235] : memref<4x32x32xf32, #tpu.memory_space<vmem>>, vector<1x32x32xf32>
    %334 = vector.shape_cast %333 : vector<1x32x32xf32> to vector<32x32xf32>
    %cst_236 = arith.constant dense<0.000000e+00> : vector<2x32xf32>
    %335 = tpu.matmul %251, %334, %cst_236 {dimension_numbers = #tpu.dot_dimension_numbers<[1], [0], [0], [1], [0, 0, 1, 1], [], []>} : vector<2x32xf32>, vector<32x32xf32>, vector<2x32xf32> -> vector<2x32xf32>
    %336 = arith.addf %332, %335 : vector<2x32xf32>
    %337 = arith.negf %321 : vector<2x32xf32>
    %338 = math.exp %337 : vector<2x32xf32>
    %cst_237 = arith.constant 1.000000e+00 : f32
    %339 = vector.broadcast %cst_237 : f32 to vector<2x32xf32>
    %340 = arith.addf %339, %338 : vector<2x32xf32>
    %341 = arith.divf %339, %340 : vector<2x32xf32>
    %342 = arith.negf %326 : vector<2x32xf32>
    %343 = math.exp %342 : vector<2x32xf32>
    %cst_238 = arith.constant 1.000000e+00 : f32
    %344 = vector.broadcast %cst_238 : f32 to vector<2x32xf32>
    %345 = arith.addf %344, %343 : vector<2x32xf32>
    %346 = arith.divf %344, %345 : vector<2x32xf32>
    %347 = math.tanh %331 : vector<2x32xf32>
    %348 = arith.negf %336 : vector<2x32xf32>
    %349 = math.exp %348 : vector<2x32xf32>
    %cst_239 = arith.constant 1.000000e+00 : f32
    %350 = vector.broadcast %cst_239 : f32 to vector<2x32xf32>
    %351 = arith.addf %350, %349 : vector<2x32xf32>
    %352 = arith.divf %350, %351 : vector<2x32xf32>
    %353 = arith.mulf %346, %249 : vector<2x32xf32>
    %354 = arith.mulf %341, %347 : vector<2x32xf32>
    %355 = arith.addf %353, %354 : vector<2x32xf32>
    %356 = math.tanh %355 : vector<2x32xf32>
    %357 = arith.mulf %352, %356 : vector<2x32xf32>
    %c0_240 = arith.constant 0 : index
    %c0_241 = arith.constant 0 : index
    %c0_242 = arith.constant 0 : index
    %358 = vector.load %arg12[%c0_240, %c0_241, %c0_242] : memref<4x32x32xf32, #tpu.memory_space<vmem>>, vector<1x32x32xf32>
    %359 = vector.shape_cast %358 : vector<1x32x32xf32> to vector<32x32xf32>
    %cst_243 = arith.constant dense<0.000000e+00> : vector<2x32xf32>
    %360 = tpu.matmul %357, %359, %cst_243 {dimension_numbers = #tpu.dot_dimension_numbers<[1], [0], [0], [1], [0, 0, 1, 1], [], []>} : vector<2x32xf32>, vector<32x32xf32>, vector<2x32xf32> -> vector<2x32xf32>
    %c0_244 = arith.constant 0 : index
    %c0_245 = arith.constant 0 : index
    %c0_246 = arith.constant 0 : index
    %361 = vector.load %arg14[%c0_244, %c0_245, %c0_246] : memref<4x1x32xf32, #tpu.memory_space<vmem>>, vector<1x1x32xf32>
    %362 = vector.shape_cast %361 : vector<1x1x32xf32> to vector<1x32xf32>
    %363 = vector.broadcast %362 : vector<1x32xf32> to vector<2x32xf32>
    %364 = arith.addf %360, %363 : vector<2x32xf32>
    %c0_247 = arith.constant 0 : index
    %c0_248 = arith.constant 0 : index
    %c0_249 = arith.constant 0 : index
    %365 = vector.load %arg13[%c0_247, %c0_248, %c0_249] : memref<4x32x32xf32, #tpu.memory_space<vmem>>, vector<1x32x32xf32>
    %366 = vector.shape_cast %365 : vector<1x32x32xf32> to vector<32x32xf32>
    %cst_250 = arith.constant dense<0.000000e+00> : vector<2x32xf32>
    %367 = tpu.matmul %316, %366, %cst_250 {dimension_numbers = #tpu.dot_dimension_numbers<[1], [0], [0], [1], [0, 0, 1, 1], [], []>} : vector<2x32xf32>, vector<32x32xf32>, vector<2x32xf32> -> vector<2x32xf32>
    %368 = arith.addf %364, %367 : vector<2x32xf32>
    %c1_251 = arith.constant 1 : index
    %c0_252 = arith.constant 0 : index
    %c0_253 = arith.constant 0 : index
    %369 = vector.load %arg12[%c1_251, %c0_252, %c0_253] : memref<4x32x32xf32, #tpu.memory_space<vmem>>, vector<1x32x32xf32>
    %370 = vector.shape_cast %369 : vector<1x32x32xf32> to vector<32x32xf32>
    %cst_254 = arith.constant dense<0.000000e+00> : vector<2x32xf32>
    %371 = tpu.matmul %357, %370, %cst_254 {dimension_numbers = #tpu.dot_dimension_numbers<[1], [0], [0], [1], [0, 0, 1, 1], [], []>} : vector<2x32xf32>, vector<32x32xf32>, vector<2x32xf32> -> vector<2x32xf32>
    %c1_255 = arith.constant 1 : index
    %c0_256 = arith.constant 0 : index
    %c0_257 = arith.constant 0 : index
    %372 = vector.load %arg14[%c1_255, %c0_256, %c0_257] : memref<4x1x32xf32, #tpu.memory_space<vmem>>, vector<1x1x32xf32>
    %373 = vector.shape_cast %372 : vector<1x1x32xf32> to vector<1x32xf32>
    %374 = vector.broadcast %373 : vector<1x32xf32> to vector<2x32xf32>
    %375 = arith.addf %371, %374 : vector<2x32xf32>
    %c1_258 = arith.constant 1 : index
    %c0_259 = arith.constant 0 : index
    %c0_260 = arith.constant 0 : index
    %376 = vector.load %arg13[%c1_258, %c0_259, %c0_260] : memref<4x32x32xf32, #tpu.memory_space<vmem>>, vector<1x32x32xf32>
    %377 = vector.shape_cast %376 : vector<1x32x32xf32> to vector<32x32xf32>
    %cst_261 = arith.constant dense<0.000000e+00> : vector<2x32xf32>
    %378 = tpu.matmul %316, %377, %cst_261 {dimension_numbers = #tpu.dot_dimension_numbers<[1], [0], [0], [1], [0, 0, 1, 1], [], []>} : vector<2x32xf32>, vector<32x32xf32>, vector<2x32xf32> -> vector<2x32xf32>
    %379 = arith.addf %375, %378 : vector<2x32xf32>
    %c2_262 = arith.constant 2 : index
    %c0_263 = arith.constant 0 : index
    %c0_264 = arith.constant 0 : index
    %380 = vector.load %arg12[%c2_262, %c0_263, %c0_264] : memref<4x32x32xf32, #tpu.memory_space<vmem>>, vector<1x32x32xf32>
    %381 = vector.shape_cast %380 : vector<1x32x32xf32> to vector<32x32xf32>
    %cst_265 = arith.constant dense<0.000000e+00> : vector<2x32xf32>
    %382 = tpu.matmul %357, %381, %cst_265 {dimension_numbers = #tpu.dot_dimension_numbers<[1], [0], [0], [1], [0, 0, 1, 1], [], []>} : vector<2x32xf32>, vector<32x32xf32>, vector<2x32xf32> -> vector<2x32xf32>
    %c2_266 = arith.constant 2 : index
    %c0_267 = arith.constant 0 : index
    %c0_268 = arith.constant 0 : index
    %383 = vector.load %arg14[%c2_266, %c0_267, %c0_268] : memref<4x1x32xf32, #tpu.memory_space<vmem>>, vector<1x1x32xf32>
    %384 = vector.shape_cast %383 : vector<1x1x32xf32> to vector<1x32xf32>
    %385 = vector.broadcast %384 : vector<1x32xf32> to vector<2x32xf32>
    %386 = arith.addf %382, %385 : vector<2x32xf32>
    %c2_269 = arith.constant 2 : index
    %c0_270 = arith.constant 0 : index
    %c0_271 = arith.constant 0 : index
    %387 = vector.load %arg13[%c2_269, %c0_270, %c0_271] : memref<4x32x32xf32, #tpu.memory_space<vmem>>, vector<1x32x32xf32>
    %388 = vector.shape_cast %387 : vector<1x32x32xf32> to vector<32x32xf32>
    %cst_272 = arith.constant dense<0.000000e+00> : vector<2x32xf32>
    %389 = tpu.matmul %316, %388, %cst_272 {dimension_numbers = #tpu.dot_dimension_numbers<[1], [0], [0], [1], [0, 0, 1, 1], [], []>} : vector<2x32xf32>, vector<32x32xf32>, vector<2x32xf32> -> vector<2x32xf32>
    %390 = arith.addf %386, %389 : vector<2x32xf32>
    %c3_273 = arith.constant 3 : index
    %c0_274 = arith.constant 0 : index
    %c0_275 = arith.constant 0 : index
    %391 = vector.load %arg12[%c3_273, %c0_274, %c0_275] : memref<4x32x32xf32, #tpu.memory_space<vmem>>, vector<1x32x32xf32>
    %392 = vector.shape_cast %391 : vector<1x32x32xf32> to vector<32x32xf32>
    %cst_276 = arith.constant dense<0.000000e+00> : vector<2x32xf32>
    %393 = tpu.matmul %357, %392, %cst_276 {dimension_numbers = #tpu.dot_dimension_numbers<[1], [0], [0], [1], [0, 0, 1, 1], [], []>} : vector<2x32xf32>, vector<32x32xf32>, vector<2x32xf32> -> vector<2x32xf32>
    %c3_277 = arith.constant 3 : index
    %c0_278 = arith.constant 0 : index
    %c0_279 = arith.constant 0 : index
    %394 = vector.load %arg14[%c3_277, %c0_278, %c0_279] : memref<4x1x32xf32, #tpu.memory_space<vmem>>, vector<1x1x32xf32>
    %395 = vector.shape_cast %394 : vector<1x1x32xf32> to vector<1x32xf32>
    %396 = vector.broadcast %395 : vector<1x32xf32> to vector<2x32xf32>
    %397 = arith.addf %393, %396 : vector<2x32xf32>
    %c3_280 = arith.constant 3 : index
    %c0_281 = arith.constant 0 : index
    %c0_282 = arith.constant 0 : index
    %398 = vector.load %arg13[%c3_280, %c0_281, %c0_282] : memref<4x32x32xf32, #tpu.memory_space<vmem>>, vector<1x32x32xf32>
    %399 = vector.shape_cast %398 : vector<1x32x32xf32> to vector<32x32xf32>
    %cst_283 = arith.constant dense<0.000000e+00> : vector<2x32xf32>
    %400 = tpu.matmul %316, %399, %cst_283 {dimension_numbers = #tpu.dot_dimension_numbers<[1], [0], [0], [1], [0, 0, 1, 1], [], []>} : vector<2x32xf32>, vector<32x32xf32>, vector<2x32xf32> -> vector<2x32xf32>
    %401 = arith.addf %397, %400 : vector<2x32xf32>
    %402 = arith.negf %368 : vector<2x32xf32>
    %403 = math.exp %402 : vector<2x32xf32>
    %cst_284 = arith.constant 1.000000e+00 : f32
    %404 = vector.broadcast %cst_284 : f32 to vector<2x32xf32>
    %405 = arith.addf %404, %403 : vector<2x32xf32>
    %406 = arith.divf %404, %405 : vector<2x32xf32>
    %407 = arith.negf %379 : vector<2x32xf32>
    %408 = math.exp %407 : vector<2x32xf32>
    %cst_285 = arith.constant 1.000000e+00 : f32
    %409 = vector.broadcast %cst_285 : f32 to vector<2x32xf32>
    %410 = arith.addf %409, %408 : vector<2x32xf32>
    %411 = arith.divf %409, %410 : vector<2x32xf32>
    %412 = math.tanh %390 : vector<2x32xf32>
    %413 = arith.negf %401 : vector<2x32xf32>
    %414 = math.exp %413 : vector<2x32xf32>
    %cst_286 = arith.constant 1.000000e+00 : f32
    %415 = vector.broadcast %cst_286 : f32 to vector<2x32xf32>
    %416 = arith.addf %415, %414 : vector<2x32xf32>
    %417 = arith.divf %415, %416 : vector<2x32xf32>
    %418 = arith.mulf %411, %314 : vector<2x32xf32>
    %419 = arith.mulf %406, %412 : vector<2x32xf32>
    %420 = arith.addf %418, %419 : vector<2x32xf32>
    %421 = math.tanh %420 : vector<2x32xf32>
    %422 = arith.mulf %417, %421 : vector<2x32xf32>
    %423 = vector.extract_strided_slice %79 {offsets = [6, 0], sizes = [2, 32], strides = [1, 1]} : vector<8x32xf32> to vector<2x32xf32>
    %c0_287 = arith.constant 0 : index
    %c0_288 = arith.constant 0 : index
    %c0_289 = arith.constant 0 : index
    %424 = vector.load %arg10[%c0_287, %c0_288, %c0_289] : memref<4x32x32xf32, #tpu.memory_space<vmem>>, vector<1x32x32xf32>
    %425 = vector.shape_cast %424 : vector<1x32x32xf32> to vector<32x32xf32>
    %cst_290 = arith.constant dense<0.000000e+00> : vector<2x32xf32>
    %426 = tpu.matmul %357, %425, %cst_290 {dimension_numbers = #tpu.dot_dimension_numbers<[1], [0], [0], [1], [0, 0, 1, 1], [], []>} : vector<2x32xf32>, vector<32x32xf32>, vector<2x32xf32> -> vector<2x32xf32>
    %427 = arith.addf %423, %426 : vector<2x32xf32>
    %428 = vector.extract_strided_slice %86 {offsets = [6, 0], sizes = [2, 32], strides = [1, 1]} : vector<8x32xf32> to vector<2x32xf32>
    %c1_291 = arith.constant 1 : index
    %c0_292 = arith.constant 0 : index
    %c0_293 = arith.constant 0 : index
    %429 = vector.load %arg10[%c1_291, %c0_292, %c0_293] : memref<4x32x32xf32, #tpu.memory_space<vmem>>, vector<1x32x32xf32>
    %430 = vector.shape_cast %429 : vector<1x32x32xf32> to vector<32x32xf32>
    %cst_294 = arith.constant dense<0.000000e+00> : vector<2x32xf32>
    %431 = tpu.matmul %357, %430, %cst_294 {dimension_numbers = #tpu.dot_dimension_numbers<[1], [0], [0], [1], [0, 0, 1, 1], [], []>} : vector<2x32xf32>, vector<32x32xf32>, vector<2x32xf32> -> vector<2x32xf32>
    %432 = arith.addf %428, %431 : vector<2x32xf32>
    %433 = vector.extract_strided_slice %93 {offsets = [6, 0], sizes = [2, 32], strides = [1, 1]} : vector<8x32xf32> to vector<2x32xf32>
    %c2_295 = arith.constant 2 : index
    %c0_296 = arith.constant 0 : index
    %c0_297 = arith.constant 0 : index
    %434 = vector.load %arg10[%c2_295, %c0_296, %c0_297] : memref<4x32x32xf32, #tpu.memory_space<vmem>>, vector<1x32x32xf32>
    %435 = vector.shape_cast %434 : vector<1x32x32xf32> to vector<32x32xf32>
    %cst_298 = arith.constant dense<0.000000e+00> : vector<2x32xf32>
    %436 = tpu.matmul %357, %435, %cst_298 {dimension_numbers = #tpu.dot_dimension_numbers<[1], [0], [0], [1], [0, 0, 1, 1], [], []>} : vector<2x32xf32>, vector<32x32xf32>, vector<2x32xf32> -> vector<2x32xf32>
    %437 = arith.addf %433, %436 : vector<2x32xf32>
    %438 = vector.extract_strided_slice %100 {offsets = [6, 0], sizes = [2, 32], strides = [1, 1]} : vector<8x32xf32> to vector<2x32xf32>
    %c3_299 = arith.constant 3 : index
    %c0_300 = arith.constant 0 : index
    %c0_301 = arith.constant 0 : index
    %439 = vector.load %arg10[%c3_299, %c0_300, %c0_301] : memref<4x32x32xf32, #tpu.memory_space<vmem>>, vector<1x32x32xf32>
    %440 = vector.shape_cast %439 : vector<1x32x32xf32> to vector<32x32xf32>
    %cst_302 = arith.constant dense<0.000000e+00> : vector<2x32xf32>
    %441 = tpu.matmul %357, %440, %cst_302 {dimension_numbers = #tpu.dot_dimension_numbers<[1], [0], [0], [1], [0, 0, 1, 1], [], []>} : vector<2x32xf32>, vector<32x32xf32>, vector<2x32xf32> -> vector<2x32xf32>
    %442 = arith.addf %438, %441 : vector<2x32xf32>
    %443 = arith.negf %427 : vector<2x32xf32>
    %444 = math.exp %443 : vector<2x32xf32>
    %cst_303 = arith.constant 1.000000e+00 : f32
    %445 = vector.broadcast %cst_303 : f32 to vector<2x32xf32>
    %446 = arith.addf %445, %444 : vector<2x32xf32>
    %447 = arith.divf %445, %446 : vector<2x32xf32>
    %448 = arith.negf %432 : vector<2x32xf32>
    %449 = math.exp %448 : vector<2x32xf32>
    %cst_304 = arith.constant 1.000000e+00 : f32
    %450 = vector.broadcast %cst_304 : f32 to vector<2x32xf32>
    %451 = arith.addf %450, %449 : vector<2x32xf32>
    %452 = arith.divf %450, %451 : vector<2x32xf32>
    %453 = math.tanh %437 : vector<2x32xf32>
    %454 = arith.negf %442 : vector<2x32xf32>
    %455 = math.exp %454 : vector<2x32xf32>
    %cst_305 = arith.constant 1.000000e+00 : f32
    %456 = vector.broadcast %cst_305 : f32 to vector<2x32xf32>
    %457 = arith.addf %456, %455 : vector<2x32xf32>
    %458 = arith.divf %456, %457 : vector<2x32xf32>
    %459 = arith.mulf %452, %355 : vector<2x32xf32>
    %460 = arith.mulf %447, %453 : vector<2x32xf32>
    %461 = arith.addf %459, %460 : vector<2x32xf32>
    %462 = math.tanh %461 : vector<2x32xf32>
    %463 = arith.mulf %458, %462 : vector<2x32xf32>
    %c0_306 = arith.constant 0 : index
    %c0_307 = arith.constant 0 : index
    %c0_308 = arith.constant 0 : index
    %464 = vector.load %arg12[%c0_306, %c0_307, %c0_308] : memref<4x32x32xf32, #tpu.memory_space<vmem>>, vector<1x32x32xf32>
    %465 = vector.shape_cast %464 : vector<1x32x32xf32> to vector<32x32xf32>
    %cst_309 = arith.constant dense<0.000000e+00> : vector<2x32xf32>
    %466 = tpu.matmul %463, %465, %cst_309 {dimension_numbers = #tpu.dot_dimension_numbers<[1], [0], [0], [1], [0, 0, 1, 1], [], []>} : vector<2x32xf32>, vector<32x32xf32>, vector<2x32xf32> -> vector<2x32xf32>
    %c0_310 = arith.constant 0 : index
    %c0_311 = arith.constant 0 : index
    %c0_312 = arith.constant 0 : index
    %467 = vector.load %arg14[%c0_310, %c0_311, %c0_312] : memref<4x1x32xf32, #tpu.memory_space<vmem>>, vector<1x1x32xf32>
    %468 = vector.shape_cast %467 : vector<1x1x32xf32> to vector<1x32xf32>
    %469 = vector.broadcast %468 : vector<1x32xf32> to vector<2x32xf32>
    %470 = arith.addf %466, %469 : vector<2x32xf32>
    %c0_313 = arith.constant 0 : index
    %c0_314 = arith.constant 0 : index
    %c0_315 = arith.constant 0 : index
    %471 = vector.load %arg13[%c0_313, %c0_314, %c0_315] : memref<4x32x32xf32, #tpu.memory_space<vmem>>, vector<1x32x32xf32>
    %472 = vector.shape_cast %471 : vector<1x32x32xf32> to vector<32x32xf32>
    %cst_316 = arith.constant dense<0.000000e+00> : vector<2x32xf32>
    %473 = tpu.matmul %422, %472, %cst_316 {dimension_numbers = #tpu.dot_dimension_numbers<[1], [0], [0], [1], [0, 0, 1, 1], [], []>} : vector<2x32xf32>, vector<32x32xf32>, vector<2x32xf32> -> vector<2x32xf32>
    %474 = arith.addf %470, %473 : vector<2x32xf32>
    %c1_317 = arith.constant 1 : index
    %c0_318 = arith.constant 0 : index
    %c0_319 = arith.constant 0 : index
    %475 = vector.load %arg12[%c1_317, %c0_318, %c0_319] : memref<4x32x32xf32, #tpu.memory_space<vmem>>, vector<1x32x32xf32>
    %476 = vector.shape_cast %475 : vector<1x32x32xf32> to vector<32x32xf32>
    %cst_320 = arith.constant dense<0.000000e+00> : vector<2x32xf32>
    %477 = tpu.matmul %463, %476, %cst_320 {dimension_numbers = #tpu.dot_dimension_numbers<[1], [0], [0], [1], [0, 0, 1, 1], [], []>} : vector<2x32xf32>, vector<32x32xf32>, vector<2x32xf32> -> vector<2x32xf32>
    %c1_321 = arith.constant 1 : index
    %c0_322 = arith.constant 0 : index
    %c0_323 = arith.constant 0 : index
    %478 = vector.load %arg14[%c1_321, %c0_322, %c0_323] : memref<4x1x32xf32, #tpu.memory_space<vmem>>, vector<1x1x32xf32>
    %479 = vector.shape_cast %478 : vector<1x1x32xf32> to vector<1x32xf32>
    %480 = vector.broadcast %479 : vector<1x32xf32> to vector<2x32xf32>
    %481 = arith.addf %477, %480 : vector<2x32xf32>
    %c1_324 = arith.constant 1 : index
    %c0_325 = arith.constant 0 : index
    %c0_326 = arith.constant 0 : index
    %482 = vector.load %arg13[%c1_324, %c0_325, %c0_326] : memref<4x32x32xf32, #tpu.memory_space<vmem>>, vector<1x32x32xf32>
    %483 = vector.shape_cast %482 : vector<1x32x32xf32> to vector<32x32xf32>
    %cst_327 = arith.constant dense<0.000000e+00> : vector<2x32xf32>
    %484 = tpu.matmul %422, %483, %cst_327 {dimension_numbers = #tpu.dot_dimension_numbers<[1], [0], [0], [1], [0, 0, 1, 1], [], []>} : vector<2x32xf32>, vector<32x32xf32>, vector<2x32xf32> -> vector<2x32xf32>
    %485 = arith.addf %481, %484 : vector<2x32xf32>
    %c2_328 = arith.constant 2 : index
    %c0_329 = arith.constant 0 : index
    %c0_330 = arith.constant 0 : index
    %486 = vector.load %arg12[%c2_328, %c0_329, %c0_330] : memref<4x32x32xf32, #tpu.memory_space<vmem>>, vector<1x32x32xf32>
    %487 = vector.shape_cast %486 : vector<1x32x32xf32> to vector<32x32xf32>
    %cst_331 = arith.constant dense<0.000000e+00> : vector<2x32xf32>
    %488 = tpu.matmul %463, %487, %cst_331 {dimension_numbers = #tpu.dot_dimension_numbers<[1], [0], [0], [1], [0, 0, 1, 1], [], []>} : vector<2x32xf32>, vector<32x32xf32>, vector<2x32xf32> -> vector<2x32xf32>
    %c2_332 = arith.constant 2 : index
    %c0_333 = arith.constant 0 : index
    %c0_334 = arith.constant 0 : index
    %489 = vector.load %arg14[%c2_332, %c0_333, %c0_334] : memref<4x1x32xf32, #tpu.memory_space<vmem>>, vector<1x1x32xf32>
    %490 = vector.shape_cast %489 : vector<1x1x32xf32> to vector<1x32xf32>
    %491 = vector.broadcast %490 : vector<1x32xf32> to vector<2x32xf32>
    %492 = arith.addf %488, %491 : vector<2x32xf32>
    %c2_335 = arith.constant 2 : index
    %c0_336 = arith.constant 0 : index
    %c0_337 = arith.constant 0 : index
    %493 = vector.load %arg13[%c2_335, %c0_336, %c0_337] : memref<4x32x32xf32, #tpu.memory_space<vmem>>, vector<1x32x32xf32>
    %494 = vector.shape_cast %493 : vector<1x32x32xf32> to vector<32x32xf32>
    %cst_338 = arith.constant dense<0.000000e+00> : vector<2x32xf32>
    %495 = tpu.matmul %422, %494, %cst_338 {dimension_numbers = #tpu.dot_dimension_numbers<[1], [0], [0], [1], [0, 0, 1, 1], [], []>} : vector<2x32xf32>, vector<32x32xf32>, vector<2x32xf32> -> vector<2x32xf32>
    %496 = arith.addf %492, %495 : vector<2x32xf32>
    %c3_339 = arith.constant 3 : index
    %c0_340 = arith.constant 0 : index
    %c0_341 = arith.constant 0 : index
    %497 = vector.load %arg12[%c3_339, %c0_340, %c0_341] : memref<4x32x32xf32, #tpu.memory_space<vmem>>, vector<1x32x32xf32>
    %498 = vector.shape_cast %497 : vector<1x32x32xf32> to vector<32x32xf32>
    %cst_342 = arith.constant dense<0.000000e+00> : vector<2x32xf32>
    %499 = tpu.matmul %463, %498, %cst_342 {dimension_numbers = #tpu.dot_dimension_numbers<[1], [0], [0], [1], [0, 0, 1, 1], [], []>} : vector<2x32xf32>, vector<32x32xf32>, vector<2x32xf32> -> vector<2x32xf32>
    %c3_343 = arith.constant 3 : index
    %c0_344 = arith.constant 0 : index
    %c0_345 = arith.constant 0 : index
    %500 = vector.load %arg14[%c3_343, %c0_344, %c0_345] : memref<4x1x32xf32, #tpu.memory_space<vmem>>, vector<1x1x32xf32>
    %501 = vector.shape_cast %500 : vector<1x1x32xf32> to vector<1x32xf32>
    %502 = vector.broadcast %501 : vector<1x32xf32> to vector<2x32xf32>
    %503 = arith.addf %499, %502 : vector<2x32xf32>
    %c3_346 = arith.constant 3 : index
    %c0_347 = arith.constant 0 : index
    %c0_348 = arith.constant 0 : index
    %504 = vector.load %arg13[%c3_346, %c0_347, %c0_348] : memref<4x32x32xf32, #tpu.memory_space<vmem>>, vector<1x32x32xf32>
    %505 = vector.shape_cast %504 : vector<1x32x32xf32> to vector<32x32xf32>
    %cst_349 = arith.constant dense<0.000000e+00> : vector<2x32xf32>
    %506 = tpu.matmul %422, %505, %cst_349 {dimension_numbers = #tpu.dot_dimension_numbers<[1], [0], [0], [1], [0, 0, 1, 1], [], []>} : vector<2x32xf32>, vector<32x32xf32>, vector<2x32xf32> -> vector<2x32xf32>
    %507 = arith.addf %503, %506 : vector<2x32xf32>
    %508 = arith.negf %474 : vector<2x32xf32>
    %509 = math.exp %508 : vector<2x32xf32>
    %cst_350 = arith.constant 1.000000e+00 : f32
    %510 = vector.broadcast %cst_350 : f32 to vector<2x32xf32>
    %511 = arith.addf %510, %509 : vector<2x32xf32>
    %512 = arith.divf %510, %511 : vector<2x32xf32>
    %513 = arith.negf %485 : vector<2x32xf32>
    %514 = math.exp %513 : vector<2x32xf32>
    %cst_351 = arith.constant 1.000000e+00 : f32
    %515 = vector.broadcast %cst_351 : f32 to vector<2x32xf32>
    %516 = arith.addf %515, %514 : vector<2x32xf32>
    %517 = arith.divf %515, %516 : vector<2x32xf32>
    %518 = math.tanh %496 : vector<2x32xf32>
    %519 = arith.negf %507 : vector<2x32xf32>
    %520 = math.exp %519 : vector<2x32xf32>
    %cst_352 = arith.constant 1.000000e+00 : f32
    %521 = vector.broadcast %cst_352 : f32 to vector<2x32xf32>
    %522 = arith.addf %521, %520 : vector<2x32xf32>
    %523 = arith.divf %521, %522 : vector<2x32xf32>
    %524 = arith.mulf %517, %420 : vector<2x32xf32>
    %525 = arith.mulf %512, %518 : vector<2x32xf32>
    %526 = arith.addf %524, %525 : vector<2x32xf32>
    %527 = math.tanh %526 : vector<2x32xf32>
    %528 = arith.mulf %523, %527 : vector<2x32xf32>
    %c0_353 = arith.constant 0 : index
    %c0_354 = arith.constant 0 : index
    %529 = vector.load %arg15[%c0_353, %c0_354] : memref<32x64xf32, #tpu.memory_space<vmem>>, vector<32x64xf32>
    %cst_355 = arith.constant dense<0.000000e+00> : vector<2x64xf32>
    %530 = tpu.matmul %528, %529, %cst_355 {dimension_numbers = #tpu.dot_dimension_numbers<[1], [0], [0], [1], [0, 0, 1, 1], [], []>} : vector<2x32xf32>, vector<32x64xf32>, vector<2x64xf32> -> vector<2x64xf32>
    %c0_356 = arith.constant 0 : index
    %c0_357 = arith.constant 0 : index
    %531 = vector.load %arg16[%c0_356, %c0_357] : memref<1x64xf32, #tpu.memory_space<vmem>>, vector<1x64xf32>
    %532 = vector.broadcast %531 : vector<1x64xf32> to vector<2x64xf32>
    %533 = arith.addf %530, %532 : vector<2x64xf32>
    %cst_358 = arith.constant 0.000000e+00 : f32
    %534 = vector.broadcast %cst_358 : f32 to vector<2x64xf32>
    %535 = arith.maximumf %533, %534 : vector<2x64xf32>
    %c0_359 = arith.constant 0 : index
    %c0_360 = arith.constant 0 : index
    %536 = vector.load %arg17[%c0_359, %c0_360] : memref<64x4xf32, #tpu.memory_space<vmem>>, vector<64x4xf32>
    %cst_361 = arith.constant dense<0.000000e+00> : vector<2x4xf32>
    %537 = tpu.matmul %535, %536, %cst_361 {dimension_numbers = #tpu.dot_dimension_numbers<[1], [0], [0], [1], [0, 0, 1, 1], [], []>} : vector<2x64xf32>, vector<64x4xf32>, vector<2x4xf32> -> vector<2x4xf32>
    %c0_362 = arith.constant 0 : index
    %c0_363 = arith.constant 0 : index
    %538 = vector.load %arg18[%c0_362, %c0_363] : memref<1x4xf32, #tpu.memory_space<vmem>>, vector<1x4xf32>
    %539 = vector.broadcast %538 : vector<1x4xf32> to vector<2x4xf32>
    %540 = arith.addf %537, %539 : vector<2x4xf32>
    %c0_364 = arith.constant 0 : index
    %c0_365 = arith.constant 0 : index
    %541 = vector.load %arg19[%c0_364, %c0_365] : memref<2x4xf32, #tpu.memory_space<vmem>>, vector<2x4xf32>
    tpu.vector_store %arg19[%c0_364, %c0_365], %540 {strides = array<i32>} : memref<2x4xf32, #tpu.memory_space<vmem>>, vector<2x4xf32>,
    return
  }
}

</mosaic_0001>

<bundles_post_ra>
// kernel: forward.1
= control target key start
LH: loop header
LB: loop body
LE: loop exit
PB: predicated region body
PF: predicated region fallthrough
CT: control target
= control target key end

     0   :  { %s8330_s0 = inlined_call_operand.vmem [shape: f32[32,8], index: 0, kind: input, shape index: {}]   ;;  %s8331_s1 = inlined_call_operand.vmem [shape: f32[3,8,64], index: 1, kind: input, shape index: {}]   ;;  %s8332_s2 = inlined_call_operand.vmem [shape: f32[1,64], index: 2, kind: input, shape index: {}]   ;;  %s8333_s3 = inlined_call_operand.vmem [shape: f32[3,64,128], index: 3, kind: input, shape index: {}]   ;;  %s8334_s4 = inlined_call_operand.vmem [shape: f32[1,128], index: 4, kind: input, shape index: {}]   ;;  %s8335_s5 = inlined_call_operand.vmem [shape: f32[32,1], index: 5, kind: input, shape index: {}]   ;;  %s8336_s6 = inlined_call_operand.vmem [shape: f32[32,1], index: 6, kind: input, shape index: {}]   ;;  %s8337_s7 = inlined_call_operand.vmem [shape: f32[16,1], index: 7, kind: input, shape index: {}]   ;;  %s8338_s8 = inlined_call_operand.vmem [shape: f32[16,1], index: 8, kind: input, shape index: {}]   ;;  %s8339_s9 = inlined_call_operand.vmem [shape: f32[4,128,32], index: 9, kind: input, shape index: {}]   ;;  %s8340_s10 = inlined_call_operand.vmem [shape: f32[4,32,32], index: 10, kind: input, shape index: {}]   ;;  %s8341_s11 = inlined_call_operand.vmem [shape: f32[4,1,32], index: 11, kind: input, shape index: {}]   ;;  %s8342_s12 = inlined_call_operand.vmem [shape: f32[4,32,32], index: 12, kind: input, shape index: {}]   ;;  %s8343_s13 = inlined_call_operand.vmem [shape: f32[4,32,32], index: 13, kind: input, shape index: {}]   ;;  %s8344_s14 = inlined_call_operand.vmem [shape: f32[4,1,32], index: 14, kind: input, shape index: {}]   ;;  %s8345_s15 = inlined_call_operand.vmem [shape: f32[32,64], index: 15, kind: input, shape index: {}]   ;;  %s8346_s16 = inlined_call_operand.vmem [shape: f32[1,64], index: 16, kind: input, shape index: {}]   ;;  %s8347_s17 = inlined_call_operand.vmem [shape: f32[64,4], index: 17, kind: input, shape index: {}]   ;;  %s8348_s18 = inlined_call_operand.vmem [shape: f32[1,4], index: 18, kind: input, shape index: {}]   ;;  %s8349_s19 = inlined_call_operand.hbm [shape: f32[2,4], index: 19, kind: output, shape index: {}]  }
   0x1   :  { %8371 = sst [smem:[#allocation20_spill]] %s8330_s0 }
   0x2   :  { %8372 = sst [smem:[#allocation21_spill]] %s8331_s1 }
   0x3   :  { %8373 = sst [smem:[#allocation22_spill]] %s8332_s2 }
   0x4   :  { %8374 = sst [smem:[#allocation23_spill]] %s8333_s3 }
   0x5   :  { %v71_v0 = vld [vmem:[%s8336_s6] sm:$0xff]  ;;  %v6707_v2 = vmov 0   ;;  %vm156_vm0 = vcmask 64512   ;;  %v72_v3 = vld [vmem:[%s8336_s6 + $0x8] sm:$0xff]  ;;  %s8375_s3 = sld [smem:[#allocation21_spill]]  ;;  %vm116_vm1 = vcmask 1046528  }
   0x6   :  { %v67_v1 = vld [vmem:[%s8335_s5] sm:$0xff]  ;;  %6504 = vset.pattern.permute.xlu1 %v6707_v2  ;;  %6503 = vset.pattern.permute.xlu0 %v6707_v2  ;;  %v68_v4 = vld [vmem:[%s8335_s5 + $0x8] sm:$0xff]  ;;  %s8376_s28 = sld [smem:[#allocation20_spill]]  ;;  %vm79_vm2 = vcmask 1040384  }
   0x7   :  { %131 = vperm.xlu1 %6504, %v71_v0   ;;  %94 = vperm.xlu0 %6503, %v67_v1  }
   0xb   :  { %v5149_v5 = vld [vmem:[%s8375_s3 + $0x8] sm:$0xff]  ;;  %v153_v13 = vld [vmem:[%s8375_s3] sm:$0xff]  ;;  %136 = vperm.xlu1 %6504, %v72_v3   ;;  %99 = vperm.xlu0 %6503, %v68_v4   ;;  %v5158_v17 = vld [vmem:[%s8375_s3 + $0x10] sm:$0xff] }
   0xc   :  { %v63_v6 = vld [vmem:[%s8376_s28] sm:$0xff]  ;;  %v64_v7 = vld [vmem:[%s8376_s28 + $0x8] sm:$0xff]  ;;  %5720 = vmatprep.subr.mxu1 %v5149_v5  ;;  %v65_v12 = vld [vmem:[%s8376_s28 + $0x10] sm:$0xff] }
   0xd   :  { %v117_v8 = vrot.slane %v63_v6, 1  ;;  %5722 = vmatprep.mubr.msk.f32.mxu1 %vm156_vm0, %v63_v6  ;;  %v81_v9 = vrot.slane %v64_v7, 7  ;;  %v118_v10 = vrot.slane %v64_v7, 1  ;;  %v80_v11 = vrot.slane %v63_v6, 7  ;;  %v66_v16 = vld [vmem:[%s8376_s28 + $0x18] sm:$0xff] }
   0xe   :  { %v83_v14 = vrot.slane %v65_v12, 7  ;;  %v120_v15 = vrot.slane %v65_v12, 1 }
   0xf   :  { %24 = vsyncpa [#allocation5], 0  ;;  %v70_v18 = vld [vmem:[%s8335_s5 + $0x18] sm:$0xff]  ;;  %v69_v19 = vld [vmem:[%s8335_s5 + $0x10] sm:$0xff]  ;;  %5721 = vmatpush3.msra.mxu1 %v5149_v5  ;;  %v119_v20 = vsel %vm116_vm1, %v117_v8, %v118_v10  ;;  %v85_v21 = vrot.slane %v66_v16, 7  ;;  %v82_v22 = vsel %vm79_vm2, %v80_v11, %v81_v9  ;;  %5736 = vmatprep.subr.mxu0 %v5158_v17  ;;  %v122_v25 = vrot.slane %v66_v16, 1 }
  0x10   :  { %5723 = vmatmul.mubr.msk.f32.vlgmr.msra.gmra.mxu1 %vm156_vm0, %v64_v7  ;;  %5728 = vmatprep.subr.mxu1 %v153_v13  ;;  %v121_v23 = vsel %vm116_vm1, %v118_v10, %v120_v15  ;;  %v84_v24 = vsel %vm79_vm2, %v81_v9, %v83_v14  ;;  %v74_v28 = vld [vmem:[%s8336_s6 + $0x18] sm:$0xff]  ;;  %v73_v29 = vld [vmem:[%s8336_s6 + $0x10] sm:$0xff]  ;;  %v480_v30 = vld [vmem:[%s8337_s7 + $0x8] sm:$0xff]  ;;  %v91_v34 = vsel %vm79_vm2, 0.0, %v80_v11  ;;  %s8377_s24 = sld [smem:[#allocation23_spill]]  ;;  %vm465_vm3 = vcmask 523264  }
  0x11   :  { %5725 = vmatprep.mubr.msk.f32.mxu1 %vm156_vm0, %v65_v12  ;;  %5729 = vmatpush3.msra.mxu1 %v153_v13  ;;  %v86_v26 = vsel %vm79_vm2, %v83_v14, %v85_v21  ;;  %v123_v27 = vsel %vm116_vm1, %v120_v15, %v122_v25  ;;  %v479_v31 = vld [vmem:[%s8337_s7] sm:$0xff]  ;;  %v482_v32 = vld [vmem:[%s8338_s8 + $0x8] sm:$0xff]  ;;  %v128_v47 = vsel %vm116_vm1, %v122_v25, 0.0  ;;  %s8378_s7 = sld [smem:[#allocation22_spill]]  ;;  %vm6709_vm4 = vmmov 0  }
  0x12   :  { %109 = vperm.xlu1 %6504, %v70_v18   ;;  %104 = vperm.xlu0 %6503, %v69_v19   ;;  %v481_v33 = vld [vmem:[%s8338_s8] sm:$0xff]  ;;  %vm831_vm5 = vcmask 1041408   ;;  %vm833_vm6 = vcmask 1043456   ;;  %vm835_vm7 = vcmask 1045504   ;;  %vm1219_vm8 = vcmask 261120  }
  0x13   :  { %5737 = vmatpush3.msra.mxu0 %v5158_v17  ;;  %vm5133_vm9 = vcmask 25600  }
  0x14   :  { %5726 = vmatmul.mubr.msk.f32.gmra.mxu1 %vm156_vm0, %v66_v16 }
  0x16   :  { %146 = vperm.xlu1 %6504, %v74_v28   ;;  %141 = vperm.xlu0 %6503, %v73_v29   ;;  %v5171_v52 = vld [vmem:[%s8377_s24 + $0x78] sm:$0xff]  ;;  %v5170_v53 = vld [vmem:[%s8377_s24 + $0x70] sm:$0xff]  ;;  %v5169_v54 = vld [vmem:[%s8377_s24 + $0x68] sm:$0xff] }
  0x17   :  { %5744 = vmatprep.subr.mxu1 %v5171_v52  ;;  %v5168_v55 = vld [vmem:[%s8377_s24 + $0x60] sm:$0xff]  ;;  %v528_v56 = vld [vmem:[%s8377_s24 + $0x38] sm:$0xff]  ;;  %v527_v58 = vld [vmem:[%s8377_s24 + $0x30] sm:$0xff] }
  0x18   :  { %5763 = vmatprep.subr.mxu0 %v528_v56  ;;  %v5167_v57 = vld [vmem:[%s8377_s24 + $0x58] sm:$0xff]  ;;  %v5166_v59 = vld [vmem:[%s8377_s24 + $0x50] sm:$0xff]  ;;  %v526_v60 = vld [vmem:[%s8377_s24 + $0x28] sm:$0xff] }
  0x19   :  { %v5165_v61 = vld [vmem:[%s8377_s24 + $0x48] sm:$0xff]  ;;  %v525_v62 = vld [vmem:[%s8377_s24 + $0x20] sm:$0xff]  ;;  %v524_v0 = vld [vmem:[%s8377_s24 + $0x18] sm:$0xff] }
  0x1a   :  { %498 = vperm.xlu1 %6504, %v480_v30   ;;  %493 = vperm.xlu0 %6503, %v479_v31   ;;  %v5164_v63 = vld [vmem:[%s8377_s24 + $0x40] sm:$0xff]  ;;  %v523_v1 = vld [vmem:[%s8377_s24 + $0x10] sm:$0xff]  ;;  %v5183_v2 = vld [vmem:[%s8377_s24 + $0xb8] sm:$0xff] }
  0x1b   :  { %v522_v3 = vld [vmem:[%s8377_s24 + $0x8] sm:$0xff]  ;;  %v521_v4 = vld [vmem:[%s8377_s24] sm:$0xff] }
  0x1c   :  { %v5163_v12 = vld [vmem:[%s8378_s7] ss:$0 sm:$0xff] }
  0x1e   :  { %516 = vperm.xlu1 %6504, %v482_v32   ;;  %511 = vperm.xlu0 %6503, %v481_v33  }
  0x82   :  { %v132_v35 = vpop.permute.xlu1 %131  ;;  %v95_v36 = vpop.permute.xlu0 %94 }
  0x83   :  { %v149_v37 = vmul.f32 %v132_v35, %v119_v20  ;;  %v112_v38 = vmul.f32 %v95_v36, %v91_v34 }
  0x85   :  { %5730 = vmatprep.mubr.msk.f32.mxu1 %vm156_vm0, %v112_v38  ;;  %5738 = vmatprep.mubr.msk.f32.mxu0 %vm156_vm0, %v149_v37 }
  0x86   :  { %v137_v39 = vpop.permute.xlu1 %136  ;;  %v100_v40 = vpop.permute.xlu0 %99 }
  0x87   :  { %v150_v41 = vmul.f32 %v137_v39, %v121_v23  ;;  %v113_v42 = vmul.f32 %v100_v40, %v82_v22 }
  0x89   :  { %5731 = vmatmul.mubr.msk.f32.vlgmr.msra.gmra.mxu1 %vm156_vm0, %v113_v42  ;;  %5739 = vmatmul.mubr.msk.f32.vlgmr.msra.gmra.mxu0 %vm156_vm0, %v150_v41 }
  0x8a   :  { %5745 = vmatpush3.msra.mxu1 %v5171_v52  ;;  %5764 = vmatpush3.msra.mxu0 %v528_v56  ;;  %v5179_v56 = vld [vmem:[%s8377_s24 + $0x98] sm:$0xff] }
  0x8b   :  { %5746 = vmatprep.subr.mxu1 %v5170_v53  ;;  %5765 = vmatprep.subr.mxu0 %v527_v58 }
  0x8c   :  { %5747 = vmatpush3.msra.mxu1 %v5170_v53  ;;  %5766 = vmatpush3.msra.mxu0 %v527_v58  ;;  %v5177_v58 = vld [vmem:[%s8377_s24 + $0x88] sm:$0xff] }
  0x8d   :  { %v110_v43 = vpop.permute.xlu1 %109  ;;  %v105_v44 = vpop.permute.xlu0 %104  ;;  %5748 = vmatprep.subr.mxu1 %v5169_v54  ;;  %5767 = vmatprep.subr.mxu0 %v526_v60 }
  0x8e   :  { %v115_v45 = vmul.f32 %v110_v43, %v86_v26  ;;  %v114_v46 = vmul.f32 %v105_v44, %v84_v24  ;;  %5749 = vmatpush3.msra.mxu1 %v5169_v54  ;;  %5768 = vmatpush3.msra.mxu0 %v526_v60  ;;  %v5182_v44 = vld [vmem:[%s8377_s24 + $0xb0] sm:$0xff]  ;;  %v5180_v54 = vld [vmem:[%s8377_s24 + $0xa0] sm:$0xff] }
  0x8f   :  { %5750 = vmatprep.subr.mxu1 %v5168_v55  ;;  %5769 = vmatprep.subr.mxu0 %v525_v62 }
  0x90   :  { %5733 = vmatprep.mubr.msk.f32.mxu1 %vm156_vm0, %v114_v46  ;;  %5751 = vmatpush3.msra.mxu1 %v5168_v55 }
  0x91   :  { %v147_v48 = vpop.permute.xlu1 %146  ;;  %v142_v49 = vpop.permute.xlu0 %141  ;;  %5734 = vmatmul.mubr.msk.f32.gmra.mxu1 %vm156_vm0, %v115_v45  ;;  %5752 = vmatprep.subr.mxu1 %v5167_v57 }
  0x92   :  { %v152_v50 = vmul.f32 %v147_v48, %v128_v47  ;;  %v151_v51 = vmul.f32 %v142_v49, %v123_v27  ;;  %5753 = vmatpush3.msra.mxu1 %v5167_v57  ;;  %5770 = vmatpush3.msra.mxu0 %v525_v62  ;;  %v5181_v48 = vld [vmem:[%s8377_s24 + $0xa8] sm:$0xff]  ;;  %v5178_v57 = vld [vmem:[%s8377_s24 + $0x90] sm:$0xff] }
  0x93   :  { %5754 = vmatprep.subr.mxu1 %v5166_v59  ;;  %5771 = vmatprep.subr.mxu0 %v524_v0 }
  0x94   :  { %5741 = vmatprep.mubr.msk.f32.mxu0 %vm156_vm0, %v151_v51  ;;  %5755 = vmatpush3.msra.mxu1 %v5166_v59  ;;  %v5176_v59 = vld [vmem:[%s8377_s24 + $0x80] sm:$0xff] }
  0x95   :  { %5742 = vmatmul.mubr.msk.f32.gmra.mxu0 %vm156_vm0, %v152_v50  ;;  %5756 = vmatprep.subr.mxu1 %v5165_v61  ;;  %v494_v38 = vpop.permute.xlu0 %493  ;;  %v499_v49 = vpop.permute.xlu1 %498 }
  0x96   :  { %5757 = vmatpush3.msra.mxu1 %v5165_v61  ;;  %5772 = vmatpush3.msra.mxu0 %v524_v0  ;;  %v852_v0 = vld [vmem:[%s8339_s9 + $0x78] sm:$0xff] }
  0x97   :  { %5758 = vmatprep.subr.mxu1 %v5164_v63  ;;  %5773 = vmatprep.subr.mxu0 %v523_v1 }
  0x98   :  { %5759 = vmatpush3.msra.mxu1 %v5164_v63  ;;  %5774 = vmatpush3.msra.mxu0 %v523_v1  ;;  %v8357_v63 = vmov 0.0   ;;  %v5203_v1 = vld [vmem:[%s8339_s9 + $0xf8] sm:$0xff] }
  0x99   :  { %5782 = vmatprep.subr.mxu1 %v5183_v2  ;;  %5775 = vmatprep.subr.mxu0 %v522_v3  ;;  %v512_v50 = vpop.permute.xlu0 %511  ;;  %v517_v61 = vpop.permute.xlu1 %516 }
  0x9a   :  { %5776 = vmatpush3.msra.mxu0 %v522_v3  ;;  %v5202_v3 = vld [vmem:[%s8339_s9 + $0xf0] sm:$0xff] }
  0x9b   :  { %5777 = vmatprep.subr.mxu0 %v521_v4 }
  0x9c   :  { %5778 = vmatpush3.msra.mxu0 %v521_v4  ;;  %v850_v4 = vld [vmem:[%s8339_s9 + $0x68] sm:$0xff] }
  0x9d   :  { %5801 = vmatprep.subr.mxu0 %v8357_v63 }
  0xd0   :  { %v5724_v5 = vpop.f32.mrf.mxu1 }
  0xd2   :  { %v231_v6 = vpop.f32.mrf.mxu1 }
  0xd4   :  { %v5727_v7 = vpop.f32.mrf.mxu1 }
  0xd6   :  { %v241_v8 = vpop.f32.mrf.mxu1 }
 0x149   :  { %v5732_v9 = vpop.f32.mrf.mxu1  ;;  %v5740_v10 = vpop.f32.mrf.mxu0 }
 0x14a   :  { %v334_v11 = vadd.f32 %v5732_v9, %v5724_v5  ;;  %v5201_v5 = vld [vmem:[%s8339_s9 + $0xe8] sm:$0xff]  ;;  %v5199_v9 = vld [vmem:[%s8339_s9 + $0xd8] sm:$0xff] }
 0x14b   :  { %v328_v13 = vpop.f32.mrf.mxu1  ;;  %v427_v16 = vpop.f32.mrf.mxu0 }
 0x14c   :  { %v447_v14 = vadd.f32 %v5740_v10, %v334_v11  ;;  %v329_v15 = vadd.f32 %v328_v13, %v231_v6  ;;  %v849_v6 = vld [vmem:[%s8339_s9 + $0x60] sm:$0xff]  ;;  %v847_v10 = vld [vmem:[%s8339_s9 + $0x50] sm:$0xff]  ;;  %v5197_v13 = vld [vmem:[%s8339_s9 + $0xc8] sm:$0xff] }
 0x14d   :  { %v5198_v11 = vld [vmem:[%s8339_s9 + $0xd0] sm:$0xff] }
 0x14e   :  { %v458_v17 = vadd.f32 %v5163_v12, %v447_v14  ;;  %v446_v18 = vadd.f32 %v427_v16, %v329_v15  ;;  %v845_v14 = vld [vmem:[%s8339_s9 + $0x40] sm:$0xff]  ;;  %v844_v16 = vld [vmem:[%s8339_s9 + $0x38] sm:$0xff] }
 0x14f   :  { %v5196_v15 = vld [vmem:[%s8339_s9 + $0xc0] sm:$0xff] }
 0x150   :  { %v462_v20 = vmax.f32 %v458_v17, 0.0  ;;  %v457_v21 = vadd.f32 %v5163_v12, %v446_v18  ;;  %v5195_v17 = vld [vmem:[%s8339_s9 + $0xb8] sm:$0xff]  ;;  %v843_v18 = vld [vmem:[%s8339_s9 + $0x30] sm:$0xff] }
 0x151   :  { %v5735_v19 = vpop.f32.mrf.mxu1 }
 0x152   :  { %v344_v23 = vadd.f32 %v5735_v19, %v5727_v7  ;;  %467 = vst.msk [vmem:[#allocation2 + $0x8] sm:$0xff] %vm465_vm3, %v462_v20  ;;  %v461_v24 = vmax.f32 %v457_v21, 0.0  ;;  %v5200_v7 = vld [vmem:[%s8339_s9 + $0xe0] sm:$0xff]  ;;  %v5194_v19 = vld [vmem:[%s8339_s9 + $0xb0] sm:$0xff]  ;;  %v842_v20 = vld [vmem:[%s8339_s9 + $0x28] sm:$0xff] }
 0x153   :  { %v338_v22 = vpop.f32.mrf.mxu1  ;;  %v5193_v21 = vld [vmem:[%s8339_s9 + $0xa8] sm:$0xff] }
 0x154   :  { %v339_v26 = vadd.f32 %v338_v22, %v241_v8  ;;  %466 = vst.msk [vmem:[#allocation2] sm:$0xff] %vm465_vm3, %v461_v24  ;;  %v848_v8 = vld [vmem:[%s8339_s9 + $0x58] sm:$0xff]  ;;  %v841_v22 = vld [vmem:[%s8339_s9 + $0x20] sm:$0xff] }
 0x155   :  { %v5743_v25 = vpop.f32.mrf.mxu0  ;;  %v840_v24 = vld [vmem:[%s8339_s9 + $0x18] sm:$0xff] }
 0x156   :  { %v449_v27 = vadd.f32 %v5743_v25, %v344_v23  ;;  %v5192_v23 = vld [vmem:[%s8339_s9 + $0xa0] sm:$0xff]  ;;  %v5191_v25 = vld [vmem:[%s8339_s9 + $0x98] sm:$0xff] }
 0x157   :  { %v437_v28 = vpop.f32.mrf.mxu0 }
 0x158   :  { %v460_v29 = vadd.f32 %v5163_v12, %v449_v27  ;;  %v448_v30 = vadd.f32 %v437_v28, %v339_v26  ;;  %v839_v26 = vld [vmem:[%s8339_s9 + $0x10] sm:$0xff]  ;;  %v838_v28 = vld [vmem:[%s8339_s9 + $0x8] sm:$0xff] }
 0x159   :  { %v5190_v27 = vld [vmem:[%s8339_s9 + $0x90] sm:$0xff] }
 0x15a   :  { %v464_v31 = vmax.f32 %v460_v29, 0.0  ;;  %v459_v32 = vadd.f32 %v5163_v12, %v448_v30  ;;  %v846_v12 = vld [vmem:[%s8339_s9 + $0x48] sm:$0xff]  ;;  %v837_v30 = vld [vmem:[%s8339_s9] sm:$0xff] }
 0x15b   :  { %v470_v34 = vld [vmem:[#allocation2] ss:$2 sm:$0xff]  ;;  %v474_v35 = vld [vmem:[#allocation2 + $0x1] ss:$2 sm:$0xff] }
 0x15c   :  { %469 = vst.msk [vmem:[#allocation2 + $0x18] sm:$0xff] %vm465_vm3, %v464_v31  ;;  %v463_v33 = vmax.f32 %v459_v32, 0.0  ;;  %v477_v36 = vmax.f32 %v470_v34, %v474_v35  ;;  %v5189_v29 = vld [vmem:[%s8339_s9 + $0x88] sm:$0xff]  ;;  %v5188_v31 = vld [vmem:[%s8339_s9 + $0x80] sm:$0xff] }
 0x15e   :  { %468 = vst.msk [vmem:[#allocation2 + $0x10] sm:$0xff] %vm465_vm3, %v463_v33  ;;  %5760 = vmatprep.mubr.msk.f32.mxu1 %vm465_vm3, %v477_v36  ;;  %v485_v37 = vrot.slane %v477_v36, 7  ;;  %v503_v45 = vrot.slane %v477_v36, 1 }
 0x160   :  { %v490_v39 = vsel %vm79_vm2, 0.0, %v485_v37 }
 0x161   :  { %v501_v40 = vmul.f32 %v494_v38, %v490_v39  ;;  %v5186_v38 = vld [vmem:[%s8334_s4] ss:$0 sm:$0xff] }
 0x163   :  { %5779 = vmatprep.mubr.msk.f32.mxu0 %vm465_vm3, %v501_v40 }
 0x165   :  { %v472_v41 = vld [vmem:[#allocation2 + $0x10] ss:$2 sm:$0xff]  ;;  %v476_v42 = vld [vmem:[#allocation2 + $0x11] ss:$2 sm:$0xff] }
 0x166   :  { %v478_v43 = vmax.f32 %v472_v41, %v476_v42 }
 0x168   :  { %v486_v46 = vrot.slane %v478_v43, 7  ;;  %5761 = vmatmul.mubr.msk.f32.vlgmr.msra.gmra.mxu1 %vm465_vm3, %v478_v43  ;;  %v504_v47 = vrot.slane %v478_v43, 1 }
 0x169   :  { %5783 = vmatpush3.msra.mxu1 %v5183_v2  ;;  %v851_v2 = vld [vmem:[%s8339_s9 + $0x70] sm:$0xff] }
 0x16a   :  { %v487_v51 = vsel %vm79_vm2, %v485_v37, %v486_v46  ;;  %5784 = vmatprep.subr.mxu1 %v5182_v44  ;;  %v505_v52 = vsel %vm116_vm1, %v503_v45, %v504_v47  ;;  %v508_v60 = vsel %vm116_vm1, %v504_v47, 0.0 }
 0x16b   :  { %v502_v53 = vmul.f32 %v499_v49, %v487_v51  ;;  %5785 = vmatpush3.msra.mxu1 %v5182_v44  ;;  %v519_v55 = vmul.f32 %v512_v50, %v505_v52  ;;  %v520_v62 = vmul.f32 %v517_v61, %v508_v60 }
 0x16c   :  { %5786 = vmatprep.subr.mxu1 %v5181_v48 }
 0x16d   :  { %5787 = vmatpush3.msra.mxu1 %v5181_v48  ;;  %5780 = vmatmul.mubr.msk.f32.vlgmr.msra.gmra.mxu0 %vm465_vm3, %v502_v53 }
 0x16e   :  { %5788 = vmatprep.subr.mxu1 %v5180_v54  ;;  %5798 = vmatprep.mubr.msk.f32.mxu1 %vm465_vm3, %v519_v55 }
 0x16f   :  { %5789 = vmatpush3.msra.mxu1 %v5180_v54  ;;  %5802 = vmatpush3.msra.mxu0 %v852_v0 }
 0x170   :  { %5790 = vmatprep.subr.mxu1 %v5179_v56  ;;  %5803 = vmatprep.subr.mxu0 %v8357_v63 }
 0x171   :  { %5791 = vmatpush3.msra.mxu1 %v5179_v56  ;;  %5804 = vmatpush3.msra.mxu0 %v851_v2  ;;  %v5239_v2 = vld [vmem:[%s8339_s9 + $0x1f8] sm:$0xff] }
 0x172   :  { %5792 = vmatprep.subr.mxu1 %v5178_v57  ;;  %5805 = vmatprep.subr.mxu0 %v8357_v63 }
 0x173   :  { %5793 = vmatpush3.msra.mxu1 %v5178_v57  ;;  %5806 = vmatpush3.msra.mxu0 %v850_v4  ;;  %v5220_v4 = vld [vmem:[%s8339_s9 + $0x170] sm:$0xff] }
 0x174   :  { %5794 = vmatprep.subr.mxu1 %v5177_v58  ;;  %5807 = vmatprep.subr.mxu0 %v8357_v63 }
 0x175   :  { %5795 = vmatpush3.msra.mxu1 %v5177_v58  ;;  %5808 = vmatpush3.msra.mxu0 %v849_v6  ;;  %v5219_v6 = vld [vmem:[%s8339_s9 + $0x168] sm:$0xff] }
 0x176   :  { %5796 = vmatprep.subr.mxu1 %v5176_v59  ;;  %5809 = vmatprep.subr.mxu0 %v8357_v63 }
 0x177   :  { %5797 = vmatpush3.msra.mxu1 %v5176_v59  ;;  %5810 = vmatpush3.msra.mxu0 %v848_v8  ;;  %v5218_v8 = vld [vmem:[%s8339_s9 + $0x160] sm:$0xff] }
 0x178   :  { %5799 = vmatmul.mubr.msk.f32.vlgmr.msra.gmra.mxu1 %vm465_vm3, %v520_v62  ;;  %5836 = vmatprep.subr.mxu1 %v8357_v63 }
 0x179   :  { %5837 = vmatpush3.msra.mxu1 %v5203_v1  ;;  %5811 = vmatprep.subr.mxu0 %v8357_v63  ;;  %v5221_v1 = vld [vmem:[%s8339_s9 + $0x178] sm:$0xff] }
 0x17a   :  { %5838 = vmatprep.subr.mxu1 %v8357_v63  ;;  %5812 = vmatpush3.msra.mxu0 %v847_v10  ;;  %v5217_v10 = vld [vmem:[%s8339_s9 + $0x158] sm:$0xff] }
 0x17b   :  { %5839 = vmatpush3.msra.mxu1 %v5202_v3  ;;  %5813 = vmatprep.subr.mxu0 %v8357_v63 }
 0x17c   :  { %5840 = vmatprep.subr.mxu1 %v8357_v63  ;;  %5814 = vmatpush3.msra.mxu0 %v846_v12  ;;  %v5216_v12 = vld [vmem:[%s8339_s9 + $0x150] sm:$0xff] }
 0x17d   :  { %5841 = vmatpush3.msra.mxu1 %v5201_v5  ;;  %5815 = vmatprep.subr.mxu0 %v8357_v63  ;;  %v5238_v5 = vld [vmem:[%s8339_s9 + $0x1f0] sm:$0xff] }
 0x17e   :  { %5842 = vmatprep.subr.mxu1 %v8357_v63  ;;  %5816 = vmatpush3.msra.mxu0 %v845_v14  ;;  %v5215_v14 = vld [vmem:[%s8339_s9 + $0x148] sm:$0xff] }
 0x17f   :  { %5843 = vmatpush3.msra.mxu1 %v5200_v7  ;;  %5817 = vmatprep.subr.mxu0 %v8357_v63  ;;  %v5237_v7 = vld [vmem:[%s8339_s9 + $0x1e8] sm:$0xff] }
 0x180   :  { %5844 = vmatprep.subr.mxu1 %v8357_v63  ;;  %5818 = vmatpush3.msra.mxu0 %v844_v16  ;;  %v5214_v16 = vld [vmem:[%s8339_s9 + $0x140] sm:$0xff] }
 0x181   :  { %5845 = vmatpush3.msra.mxu1 %v5199_v9  ;;  %5819 = vmatprep.subr.mxu0 %v8357_v63  ;;  %v5236_v9 = vld [vmem:[%s8339_s9 + $0x1e0] sm:$0xff] }
 0x182   :  { %5846 = vmatprep.subr.mxu1 %v8357_v63  ;;  %5820 = vmatpush3.msra.mxu0 %v843_v18  ;;  %v5213_v18 = vld [vmem:[%s8339_s9 + $0x138] sm:$0xff] }
 0x183   :  { %5847 = vmatpush3.msra.mxu1 %v5198_v11  ;;  %5821 = vmatprep.subr.mxu0 %v8357_v63  ;;  %v5235_v11 = vld [vmem:[%s8339_s9 + $0x1d8] sm:$0xff] }
 0x184   :  { %5848 = vmatprep.subr.mxu1 %v8357_v63  ;;  %5822 = vmatpush3.msra.mxu0 %v842_v20  ;;  %v5212_v20 = vld [vmem:[%s8339_s9 + $0x130] sm:$0xff] }
 0x185   :  { %5849 = vmatpush3.msra.mxu1 %v5197_v13  ;;  %5823 = vmatprep.subr.mxu0 %v8357_v63  ;;  %v5234_v13 = vld [vmem:[%s8339_s9 + $0x1d0] sm:$0xff] }
 0x186   :  { %5850 = vmatprep.subr.mxu1 %v8357_v63  ;;  %5824 = vmatpush3.msra.mxu0 %v841_v22  ;;  %v5211_v22 = vld [vmem:[%s8339_s9 + $0x128] sm:$0xff] }
 0x187   :  { %5851 = vmatpush3.msra.mxu1 %v5196_v15  ;;  %5825 = vmatprep.subr.mxu0 %v8357_v63  ;;  %v5233_v15 = vld [vmem:[%s8339_s9 + $0x1c8] sm:$0xff] }
 0x188   :  { %5852 = vmatprep.subr.mxu1 %v8357_v63  ;;  %5826 = vmatpush3.msra.mxu0 %v840_v24  ;;  %v5210_v24 = vld [vmem:[%s8339_s9 + $0x120] sm:$0xff] }
 0x189   :  { %5853 = vmatpush3.msra.mxu1 %v5195_v17  ;;  %5827 = vmatprep.subr.mxu0 %v8357_v63  ;;  %v5232_v17 = vld [vmem:[%s8339_s9 + $0x1c0] sm:$0xff] }
 0x18a   :  { %5854 = vmatprep.subr.mxu1 %v8357_v63  ;;  %5828 = vmatpush3.msra.mxu0 %v839_v26  ;;  %v5209_v26 = vld [vmem:[%s8339_s9 + $0x118] sm:$0xff] }
 0x18b   :  { %5855 = vmatpush3.msra.mxu1 %v5194_v19  ;;  %5829 = vmatprep.subr.mxu0 %v8357_v63  ;;  %v5231_v19 = vld [vmem:[%s8339_s9 + $0x1b8] sm:$0xff] }
 0x18c   :  { %5856 = vmatprep.subr.mxu1 %v8357_v63  ;;  %5830 = vmatpush3.msra.mxu0 %v838_v28  ;;  %v5208_v28 = vld [vmem:[%s8339_s9 + $0x110] sm:$0xff] }
 0x18d   :  { %5857 = vmatpush3.msra.mxu1 %v5193_v21  ;;  %5831 = vmatprep.subr.mxu0 %v8357_v63  ;;  %v5230_v21 = vld [vmem:[%s8339_s9 + $0x1b0] sm:$0xff] }
 0x18e   :  { %5858 = vmatprep.subr.mxu1 %v8357_v63  ;;  %5832 = vmatpush3.msra.mxu0 %v837_v30  ;;  %v5207_v30 = vld [vmem:[%s8339_s9 + $0x108] sm:$0xff] }
 0x18f   :  { %5859 = vmatpush3.msra.mxu1 %v5192_v23  ;;  %5833 = vmatprep.mubr.msk.f32.mxu0 %vm6709_vm4, %v8357_v63  ;;  %v5229_v23 = vld [vmem:[%s8339_s9 + $0x1a8] sm:$0xff] }
 0x190   :  { %5860 = vmatprep.subr.mxu1 %v8357_v63  ;;  %5868 = vmatprep.mubr.msk.f32.mxu1 %vm6709_vm4, %v8357_v63 }
 0x191   :  { %5861 = vmatpush3.msra.mxu1 %v5191_v25  ;;  %5871 = vmatprep.subr.mxu0 %v8357_v63  ;;  %v5228_v25 = vld [vmem:[%s8339_s9 + $0x1a0] sm:$0xff] }
 0x192   :  { %5862 = vmatprep.subr.mxu1 %v8357_v63 }
 0x193   :  { %5863 = vmatpush3.msra.mxu1 %v5190_v27  ;;  %v5227_v27 = vld [vmem:[%s8339_s9 + $0x198] sm:$0xff] }
 0x194   :  { %5864 = vmatprep.subr.mxu1 %v8357_v63 }
 0x195   :  { %5865 = vmatpush3.msra.mxu1 %v5189_v29  ;;  %v5226_v29 = vld [vmem:[%s8339_s9 + $0x190] sm:$0xff] }
 0x196   :  { %5866 = vmatprep.subr.mxu1 %v8357_v63 }
 0x197   :  { %5867 = vmatpush3.msra.mxu1 %v5188_v31  ;;  %v5225_v31 = vld [vmem:[%s8339_s9 + $0x188] sm:$0xff] }
 0x198   :  { %5906 = vmatprep.subr.mxu1 %v8357_v63 }
 0x228   :  { %v5762_v32 = vpop.f32.mrf.mxu1 }
 0x22a   :  { %v608_v34 = vpop.f32.mrf.mxu1 }
 0x22d   :  { %v5781_v33 = vpop.f32.mrf.mxu0 }
 0x22e   :  { %v695_v36 = vadd.f32 %v5781_v33, %v5762_v32  ;;  %v5206_v32 = vld [vmem:[%s8339_s9 + $0x100] sm:$0xff] }
 0x22f   :  { %v689_v35 = vpop.f32.mrf.mxu0  ;;  %v5224_v33 = vld [vmem:[%s8339_s9 + $0x180] sm:$0xff] }
 0x230   :  { %v690_v39 = vadd.f32 %v689_v35, %v608_v34  ;;  %v7252_v34 = vld [vmem:[%s8340_s10 + $0x18] sm:$0xff] }
 0x231   :  { %v7257_v35 = vld [vmem:[%s8340_s10 + $0x58] sm:$0xff] }
 0x232   :  { %8379 = vst [vmem:[#allocation7_spill] sm:$0xff] %v7257_v35 }
 0x238   :  { %v5800_v37 = vpop.f32.mrf.mxu1 }
 0x239   :  { %v789_v40 = vadd.f32 %v5800_v37, %v695_v36  ;;  %v7266_v36 = vld [vmem:[%s8340_s10 + $0x10] sm:$0xff] }
 0x23a   :  { %v779_v41 = vpop.f32.mrf.mxu1  ;;  %v7271_v37 = vld [vmem:[%s8340_s10 + $0x50] sm:$0xff] }
 0x23b   :  { %v798_v42 = vadd.f32 %v5186_v38, %v789_v40  ;;  %v788_v43 = vadd.f32 %v779_v41, %v690_v39  ;;  %8380 = vst [vmem:[#allocation8_spill] sm:$0xff] %v7271_v37  ;;  %v7285_v39 = vld [vmem:[%s8340_s10 + $0x48] sm:$0xff]  ;;  %v7294_v40 = vld [vmem:[%s8340_s10] sm:$0xff] }
 0x23c   :  { %8382 = vst [vmem:[#allocation10_spill] sm:$0xff] %v7285_v39  ;;  %8383 = vst [vmem:[#allocation11_spill] sm:$0xff] %v7294_v40  ;;  %v7301_v41 = vld [vmem:[%s8340_s10 + $0x40] sm:$0xff] }
 0x23d   :  { %v800_v44 = vmax.f32 %v798_v42, 0.0  ;;  %v797_v45 = vadd.f32 %v5186_v38, %v788_v43  ;;  %v7280_v38 = vld [vmem:[%s8340_s10 + $0x8] sm:$0xff]  ;;  %8384 = vst [vmem:[#allocation12_spill] sm:$0xff] %v7301_v41  ;;  %v7311_v42 = vld [vmem:[%s8340_s10 + $0x38] sm:$0xff]  ;;  %v7321_v43 = vld [vmem:[%s8340_s10 + $0x30] sm:$0xff] }
 0x23e   :  { %8381 = vst [vmem:[#allocation9_spill] sm:$0xff] %v7280_v38 }
 0x23f   :  { %802 = vst [vmem:[#allocation3 + $0x8] sm:$0xff] %v800_v44  ;;  %v799_v46 = vmax.f32 %v797_v45, 0.0  ;;  %v7329_v44 = vld [vmem:[%s8340_s10 + $0x28] sm:$0xff]  ;;  %v7339_v45 = vld [vmem:[%s8340_s10 + $0x20] sm:$0xff] }
 0x241   :  { %801 = vst [vmem:[#allocation3] sm:$0xff] %v799_v46  ;;  %v7348_v46 = vld [vmem:[%s8340_s10 + $0x78] sm:$0xff] }
 0x248   :  { %v803_v47 = vld [vmem:[#allocation3] ss:$8 sm:$0x3]  ;;  %v805_v48 = vld [vmem:[#allocation3 + $0x1] ss:$8 sm:$0x3] }
 0x249   :  { %v808_v49 = vld [vmem:[#allocation3 + $0x2] ss:$8 sm:$0x3]  ;;  %v810_v50 = vld [vmem:[#allocation3 + $0x3] ss:$8 sm:$0x3]  ;;  %v806_v57 = vmax.f32 %v803_v47, %v805_v48 }
 0x24a   :  { %v811_v51 = vmax.f32 %v808_v49, %v810_v50  ;;  %v813_v52 = vld [vmem:[#allocation3 + $0x4] ss:$8 sm:$0x3]  ;;  %v815_v53 = vld [vmem:[#allocation3 + $0x5] ss:$8 sm:$0x3] }
 0x24b   :  { %v816_v54 = vmax.f32 %v813_v52, %v815_v53  ;;  %v818_v55 = vld [vmem:[#allocation3 + $0x6] ss:$8 sm:$0x3]  ;;  %v820_v56 = vld [vmem:[#allocation3 + $0x7] ss:$8 sm:$0x3] }
 0x24c   :  { %v821_v58 = vmax.f32 %v818_v55, %v820_v56  ;;  %v823_v59 = vrot.slane %v811_v51, 6  ;;  %v7356_v47 = vld [vmem:[%s8340_s10 + $0x70] sm:$0xff]  ;;  %v7365_v48 = vld [vmem:[%s8340_s10 + $0x68] sm:$0xff]  ;;  %v7372_v49 = vld [vmem:[%s8340_s10 + $0x60] sm:$0xff] }
 0x24d   :  { %v826_v60 = vrot.slane %v816_v54, 4  ;;  %v7384_v50 = vld [vmem:[%s8343_s13 + $0x18] sm:$0xff]  ;;  %v7391_v51 = vld [vmem:[%s8343_s13 + $0x10] sm:$0xff]  ;;  %v7398_v52 = vld [vmem:[%s8343_s13 + $0x8] sm:$0xff] }
 0x24e   :  { %v829_v61 = vrot.slane %v821_v58, 2  ;;  %v832_v62 = vsel %vm831_vm5, %v806_v57, %v823_v59  ;;  %v7405_v53 = vld [vmem:[%s8343_s13] sm:$0xff]  ;;  %v7413_v54 = vld [vmem:[%s8343_s13 + $0x38] sm:$0xff]  ;;  %v7422_v55 = vld [vmem:[%s8343_s13 + $0x30] sm:$0xff] }
 0x24f   :  { %v834_v0 = vsel %vm833_vm6, %v832_v62, %v826_v60  ;;  %v7429_v56 = vld [vmem:[%s8343_s13 + $0x28] sm:$0xff]  ;;  %v7436_v57 = vld [vmem:[%s8343_s13 + $0x20] sm:$0xff]  ;;  %v7444_v58 = vld [vmem:[%s8343_s13 + $0x58] sm:$0xff] }
 0x250   :  { %v7121_v3 = vsel %vm835_vm7, %v834_v0, %v829_v61  ;;  %v7453_v59 = vld [vmem:[%s8343_s13 + $0x50] sm:$0xff]  ;;  %v7460_v60 = vld [vmem:[%s8343_s13 + $0x48] sm:$0xff]  ;;  %v7467_v61 = vld [vmem:[%s8343_s13 + $0x40] sm:$0xff] }
 0x251   :  { %5834 = vmatmul.mubr.f32.vlgmr.msra.gmra.mxu0 %v7121_v3  ;;  %5869 = vmatmul.mubr.f32.vlgmr.msra.gmra.mxu1 %v7121_v3  ;;  %v7475_v62 = vld [vmem:[%s8343_s13 + $0x78] sm:$0xff]  ;;  %v7484_v0 = vld [vmem:[%s8343_s13 + $0x70] sm:$0xff] }
 0x252   :  { %5872 = vmatpush3.msra.mxu0 %v5221_v1  ;;  %5907 = vmatpush3.msra.mxu1 %v5239_v2  ;;  %v7491_v1 = vld [vmem:[%s8343_s13 + $0x68] sm:$0xff]  ;;  %v7498_v2 = vld [vmem:[%s8343_s13 + $0x60] sm:$0xff] }
 0x253   :  { %5873 = vmatprep.subr.mxu0 %v8357_v63  ;;  %5908 = vmatprep.subr.mxu1 %v8357_v63 }
 0x254   :  { %5874 = vmatpush3.msra.mxu0 %v5220_v4  ;;  %5909 = vmatpush3.msra.mxu1 %v5238_v5  ;;  %v7515_v4 = vld [vmem:[%s8342_s12 + $0x10] sm:$0xff]  ;;  %v7524_v5 = vld [vmem:[%s8342_s12 + $0x8] sm:$0xff] }
 0x255   :  { %5875 = vmatprep.subr.mxu0 %v8357_v63  ;;  %5910 = vmatprep.subr.mxu1 %v8357_v63  ;;  %8386 = vst [vmem:[#allocation14_spill] sm:$0xff] %v7515_v4  ;;  %8387 = vst [vmem:[#allocation15_spill] sm:$0xff] %v7524_v5 }
 0x256   :  { %5876 = vmatpush3.msra.mxu0 %v5219_v6  ;;  %5911 = vmatpush3.msra.mxu1 %v5237_v7  ;;  %v7533_v6 = vld [vmem:[%s8342_s12] sm:$0xff] }
 0x257   :  { %5877 = vmatprep.subr.mxu0 %v8357_v63  ;;  %5912 = vmatprep.subr.mxu1 %v8357_v63  ;;  %8388 = vst [vmem:[#allocation16_spill] sm:$0xff] %v7533_v6 }
 0x258   :  { %5878 = vmatpush3.msra.mxu0 %v5218_v8  ;;  %5913 = vmatpush3.msra.mxu1 %v5236_v9 }
 0x259   :  { %5879 = vmatprep.subr.mxu0 %v8357_v63  ;;  %5914 = vmatprep.subr.mxu1 %v8357_v63 }
 0x25a   :  { %5880 = vmatpush3.msra.mxu0 %v5217_v10  ;;  %5915 = vmatpush3.msra.mxu1 %v5235_v11 }
 0x25b   :  { %5881 = vmatprep.subr.mxu0 %v8357_v63  ;;  %5916 = vmatprep.subr.mxu1 %v8357_v63 }
 0x25c   :  { %5882 = vmatpush3.msra.mxu0 %v5216_v12  ;;  %5917 = vmatpush3.msra.mxu1 %v5234_v13 }
 0x25d   :  { %5883 = vmatprep.subr.mxu0 %v8357_v63  ;;  %5918 = vmatprep.subr.mxu1 %v8357_v63 }
 0x25e   :  { %5884 = vmatpush3.msra.mxu0 %v5215_v14  ;;  %5919 = vmatpush3.msra.mxu1 %v5233_v15  ;;  %v5187_v15 = vld [vmem:[%s8341_s11] ss:$0 sm:$0xff] }
 0x25f   :  { %5885 = vmatprep.subr.mxu0 %v8357_v63  ;;  %5920 = vmatprep.subr.mxu1 %v8357_v63 }
 0x260   :  { %5886 = vmatpush3.msra.mxu0 %v5214_v16  ;;  %5921 = vmatpush3.msra.mxu1 %v5232_v17 }
 0x261   :  { %5887 = vmatprep.subr.mxu0 %v8357_v63  ;;  %5922 = vmatprep.subr.mxu1 %v8357_v63 }
 0x262   :  { %5888 = vmatpush3.msra.mxu0 %v5213_v18  ;;  %5923 = vmatpush3.msra.mxu1 %v5231_v19 }
 0x263   :  { %5889 = vmatprep.subr.mxu0 %v8357_v63  ;;  %5924 = vmatprep.subr.mxu1 %v8357_v63 }
 0x264   :  { %5890 = vmatpush3.msra.mxu0 %v5212_v20  ;;  %5925 = vmatpush3.msra.mxu1 %v5230_v21 }
 0x265   :  { %5891 = vmatprep.subr.mxu0 %v8357_v63  ;;  %5926 = vmatprep.subr.mxu1 %v8357_v63 }
 0x266   :  { %5892 = vmatpush3.msra.mxu0 %v5211_v22  ;;  %5927 = vmatpush3.msra.mxu1 %v5229_v23  ;;  %v5205_v23 = vld [vmem:[%s8341_s11 + $0x1] ss:$0 sm:$0xff] }
 0x267   :  { %5893 = vmatprep.subr.mxu0 %v8357_v63  ;;  %5928 = vmatprep.subr.mxu1 %v8357_v63 }
 0x268   :  { %5894 = vmatpush3.msra.mxu0 %v5210_v24  ;;  %5929 = vmatpush3.msra.mxu1 %v5228_v25 }
 0x269   :  { %5895 = vmatprep.subr.mxu0 %v8357_v63  ;;  %5930 = vmatprep.subr.mxu1 %v8357_v63 }
 0x26a   :  { %5896 = vmatpush3.msra.mxu0 %v5209_v26  ;;  %5931 = vmatpush3.msra.mxu1 %v5227_v27 }
 0x26b   :  { %5897 = vmatprep.subr.mxu0 %v8357_v63  ;;  %5932 = vmatprep.subr.mxu1 %v8357_v63 }
 0x26c   :  { %5898 = vmatpush3.msra.mxu0 %v5208_v28  ;;  %5933 = vmatpush3.msra.mxu1 %v5226_v29  ;;  %v5241_v29 = vld [vmem:[%s8341_s11 + $0x3] ss:$0 sm:$0xff] }
 0x26d   :  { %5899 = vmatprep.subr.mxu0 %v8357_v63  ;;  %5934 = vmatprep.subr.mxu1 %v8357_v63 }
 0x26e   :  { %5900 = vmatpush3.msra.mxu0 %v5207_v30  ;;  %5935 = vmatpush3.msra.mxu1 %v5225_v31 }
 0x26f   :  { %5901 = vmatprep.subr.mxu0 %v8357_v63  ;;  %5936 = vmatprep.subr.mxu1 %v8357_v63 }
 0x270   :  { %5902 = vmatpush3.msra.mxu0 %v5206_v32  ;;  %5903 = vmatprep.mubr.msk.f32.mxu0 %vm6709_vm4, %v8357_v63 }
 0x271   :  { %5937 = vmatpush3.msra.mxu1 %v5224_v33  ;;  %5938 = vmatprep.mubr.msk.f32.mxu1 %vm6709_vm4, %v8357_v63 }
 0x272   :  { %5904 = vmatmul.mubr.f32.vlgmr.msra.gmra.mxu0 %v7121_v3  ;;  %5939 = vmatmul.mubr.f32.vlgmr.msra.gmra.mxu1 %v7121_v3  ;;  %v7505_v3 = vld [vmem:[%s8342_s12 + $0x18] sm:$0xff] }
 0x273   :  { %5941 = vmatprep.subr.mxu0 %v8357_v63  ;;  %5963 = vmatprep.subr.mxu1 %v8357_v63  ;;  %8385 = vst [vmem:[#allocation13_spill] sm:$0xff] %v7505_v3 }
 0x274   :  { %5942 = vmatpush3.msra.mxu0 %v7252_v34  ;;  %5964 = vmatpush3.msra.mxu1 %v7257_v35 }
 0x275   :  { %5943 = vmatprep.subr.mxu0 %v8357_v63  ;;  %5965 = vmatprep.subr.mxu1 %v8357_v63 }
 0x276   :  { %5944 = vmatpush3.msra.mxu0 %v7266_v36  ;;  %5966 = vmatpush3.msra.mxu1 %v7271_v37 }
 0x277   :  { %5945 = vmatprep.subr.mxu0 %v8357_v63  ;;  %5967 = vmatprep.subr.mxu1 %v8357_v63 }
 0x278   :  { %5946 = vmatpush3.msra.mxu0 %v7280_v38  ;;  %5968 = vmatpush3.msra.mxu1 %v7285_v39 }
 0x279   :  { %5947 = vmatprep.subr.mxu0 %v8357_v63  ;;  %5969 = vmatprep.subr.mxu1 %v8357_v63 }
 0x27a   :  { %5948 = vmatpush3.msra.mxu0 %v7294_v40  ;;  %5949 = vmatprep.mubr.msk.f32.mxu0 %vm6709_vm4, %v8357_v63 }
 0x27b   :  { %5970 = vmatpush3.msra.mxu1 %v7301_v41  ;;  %5971 = vmatprep.mubr.msk.f32.mxu1 %vm6709_vm4, %v8357_v63 }
 0x27c   :  { %5950 = vmatmul.mubr.f32.vlgmr.msra.gmra.mxu0 %v8357_v63  ;;  %5952 = vmatprep.subr.mxu0 %v8357_v63 }
 0x27d   :  { %5972 = vmatmul.mubr.f32.vlgmr.msra.gmra.mxu1 %v8357_v63  ;;  %5953 = vmatpush3.msra.mxu0 %v7311_v42 }
 0x27e   :  { %5954 = vmatprep.subr.mxu0 %v8357_v63  ;;  %5960 = vmatprep.mubr.msk.f32.mxu0 %vm6709_vm4, %v8357_v63 }
 0x27f   :  { %5955 = vmatpush3.msra.mxu0 %v7321_v43  ;;  %5985 = vmatprep.subr.mxu1 %v8357_v63 }
 0x280   :  { %5956 = vmatprep.subr.mxu0 %v8357_v63  ;;  %5993 = vmatprep.mubr.msk.f32.mxu1 %vm6709_vm4, %v8357_v63 }
 0x281   :  { %5957 = vmatpush3.msra.mxu0 %v7329_v44  ;;  %5986 = vmatpush3.msra.mxu1 %v7505_v3 }
 0x282   :  { %5958 = vmatprep.subr.mxu0 %v8357_v63  ;;  %5987 = vmatprep.subr.mxu1 %v8357_v63 }
 0x283   :  { %5959 = vmatpush3.msra.mxu0 %v7339_v45  ;;  %5988 = vmatpush3.msra.mxu1 %v7515_v4 }
 0x284   :  { %5961 = vmatmul.mubr.f32.vlgmr.msra.gmra.mxu0 %v8357_v63  ;;  %5974 = vmatprep.subr.mxu0 %v8357_v63 }
 0x285   :  { %5975 = vmatpush3.msra.mxu0 %v7348_v46  ;;  %5982 = vmatprep.mubr.msk.f32.mxu0 %vm6709_vm4, %v8357_v63 }
 0x286   :  { %5976 = vmatprep.subr.mxu0 %v8357_v63  ;;  %5989 = vmatprep.subr.mxu1 %v8357_v63 }
 0x287   :  { %5977 = vmatpush3.msra.mxu0 %v7356_v47  ;;  %5990 = vmatpush3.msra.mxu1 %v7524_v5 }
 0x288   :  { %5978 = vmatprep.subr.mxu0 %v8357_v63  ;;  %5991 = vmatprep.subr.mxu1 %v8357_v63 }
 0x289   :  { %5979 = vmatpush3.msra.mxu0 %v7365_v48  ;;  %5992 = vmatpush3.msra.mxu1 %v7533_v6 }
 0x28a   :  { %5980 = vmatprep.subr.mxu0 %v8357_v63  ;;  %6007 = vmatprep.subr.mxu1 %v8357_v63 }
 0x28b   :  { %5981 = vmatpush3.msra.mxu0 %v7372_v49 }
 0x28c   :  { %5983 = vmatmul.mubr.f32.vlgmr.msra.gmra.mxu0 %v8357_v63  ;;  %5996 = vmatprep.subr.mxu0 %v8357_v63 }
 0x28d   :  { %6004 = vmatprep.mubr.msk.f32.mxu0 %vm6709_vm4, %v8357_v63  ;;  %5997 = vmatpush3.msra.mxu0 %v7384_v50 }
 0x28e   :  { %5998 = vmatprep.subr.mxu0 %v8357_v63 }
 0x28f   :  { %5999 = vmatpush3.msra.mxu0 %v7391_v51 }
 0x290   :  { %6000 = vmatprep.subr.mxu0 %v8357_v63 }
 0x291   :  { %6001 = vmatpush3.msra.mxu0 %v7398_v52 }
 0x292   :  { %6002 = vmatprep.subr.mxu0 %v8357_v63 }
 0x293   :  { %6003 = vmatpush3.msra.mxu0 %v7405_v53 }
 0x294   :  { %6018 = vmatprep.subr.mxu0 %v8357_v63  ;;  %6005 = vmatmul.mubr.f32.vlgmr.msra.gmra.mxu0 %v8357_v63 }
 0x295   :  { %6019 = vmatpush3.msra.mxu0 %v7413_v54  ;;  %6026 = vmatprep.mubr.msk.f32.mxu0 %vm6709_vm4, %v8357_v63 }
 0x296   :  { %6020 = vmatprep.subr.mxu0 %v8357_v63 }
 0x297   :  { %6021 = vmatpush3.msra.mxu0 %v7422_v55 }
 0x298   :  { %6022 = vmatprep.subr.mxu0 %v8357_v63 }
 0x299   :  { %6023 = vmatpush3.msra.mxu0 %v7429_v56 }
 0x29a   :  { %6024 = vmatprep.subr.mxu0 %v8357_v63 }
 0x29b   :  { %6025 = vmatpush3.msra.mxu0 %v7436_v57 }
 0x29c   :  { %6040 = vmatprep.subr.mxu0 %v8357_v63  ;;  %6027 = vmatmul.mubr.f32.vlgmr.msra.gmra.mxu0 %v8357_v63 }
 0x29d   :  { %6041 = vmatpush3.msra.mxu0 %v7444_v58  ;;  %6048 = vmatprep.mubr.msk.f32.mxu0 %vm6709_vm4, %v8357_v63 }
 0x29e   :  { %6042 = vmatprep.subr.mxu0 %v8357_v63 }
 0x29f   :  { %6043 = vmatpush3.msra.mxu0 %v7453_v59 }
 0x2a0   :  { %6044 = vmatprep.subr.mxu0 %v8357_v63 }
 0x2a1   :  { %6045 = vmatpush3.msra.mxu0 %v7460_v60 }
 0x2a2   :  { %6046 = vmatprep.subr.mxu0 %v8357_v63 }
 0x2a3   :  { %6047 = vmatpush3.msra.mxu0 %v7467_v61 }
 0x2a4   :  { %6062 = vmatprep.subr.mxu0 %v8357_v63  ;;  %6049 = vmatmul.mubr.f32.vlgmr.msra.gmra.mxu0 %v8357_v63 }
 0x2a5   :  { %6063 = vmatpush3.msra.mxu0 %v7475_v62  ;;  %6070 = vmatprep.mubr.msk.f32.mxu0 %vm6709_vm4, %v8357_v63 }
 0x2a6   :  { %6064 = vmatprep.subr.mxu0 %v8357_v63 }
 0x2a7   :  { %6065 = vmatpush3.msra.mxu0 %v7484_v0 }
 0x2a8   :  { %6066 = vmatprep.subr.mxu0 %v8357_v63 }
 0x2a9   :  { %6067 = vmatpush3.msra.mxu0 %v7491_v1 }
 0x2aa   :  { %6068 = vmatprep.subr.mxu0 %v8357_v63 }
 0x2ab   :  { %6069 = vmatpush3.msra.mxu0 %v7498_v2 }
 0x2ac   :  { %6084 = vmatprep.subr.mxu0 %v8357_v63  ;;  %6071 = vmatmul.mubr.f32.vlgmr.msra.gmra.mxu0 %v8357_v63 }
 0x2ad   :  { %6085 = vmatpush3.msra.mxu0 %v7311_v42  ;;  %6092 = vmatprep.mubr.msk.f32.mxu0 %vm6709_vm4, %v8357_v63 }
 0x2ae   :  { %6086 = vmatprep.subr.mxu0 %v8357_v63 }
 0x2af   :  { %6087 = vmatpush3.msra.mxu0 %v7321_v43 }
 0x2b0   :  { %6088 = vmatprep.subr.mxu0 %v8357_v63 }
 0x2b1   :  { %6089 = vmatpush3.msra.mxu0 %v7329_v44 }
 0x2b2   :  { %6090 = vmatprep.subr.mxu0 %v8357_v63 }
 0x2b3   :  { %6091 = vmatpush3.msra.mxu0 %v7339_v45 }
 0x2b4   :  { %6106 = vmatprep.subr.mxu0 %v8357_v63 }
 0x311   :  { %v926_v7 = vpop.f32.mrf.mxu0  ;;  %v1021_v8 = vpop.f32.mrf.mxu1 }
 0x312   :  { %v7544_v16 = vadd.f32 %v5187_v15, %v926_v7  ;;  %v7550_v24 = vadd.f32 %v5205_v23, %v1021_v8  ;;  %v5223_v7 = vld [vmem:[%s8341_s11 + $0x2] ss:$0 sm:$0xff] }
 0x313   :  { %v5835_v9 = vpop.f32.mrf.mxu0  ;;  %v5870_v10 = vpop.f32.mrf.mxu1 }
 0x332   :  { %v1116_v11 = vpop.f32.mrf.mxu0  ;;  %v1211_v12 = vpop.f32.mrf.mxu1 }
 0x333   :  { %v7556_v30 = vadd.f32 %v5241_v29, %v1211_v12  ;;  %v7562_v9 = vadd.f32 %v5223_v7, %v1116_v11  ;;  %v7582_v29 = vld [vmem:[%s8342_s12 + $0x30] sm:$0xff] }
 0x334   :  { %v5905_v13 = vpop.f32.mrf.mxu0  ;;  %v5940_v14 = vpop.f32.mrf.mxu1  ;;  %v7623_v7 = vld [vmem:[%s8342_s12 + $0x50] sm:$0xff] }
 0x33c   :  { %v1289_v17 = vpop.f32.mrf.mxu0 }
 0x33d   :  { %v1293_v18 = vadd.f32 %v1289_v17, %v7544_v16  ;;  %v1441_v19 = vpop.f32.mrf.mxu1 }
 0x33e   :  { %v5951_v20 = vpop.f32.mrf.mxu0  ;;  %v1445_v14 = vadd.f32 %v1441_v19, %v7562_v9 }
 0x33f   :  { %v5254_v21 = vmul.f32 -1.442695, %v1293_v18  ;;  %v5973_v22 = vpop.f32.mrf.mxu1 }
 0x341   :  { %6505 = vpow2.f32 %v5254_v21 }
 0x344   :  { %v1365_v25 = vpop.f32.mrf.mxu0 }
 0x345   :  { %v1369_v26 = vadd.f32 %v1365_v25, %v7550_v24 }
 0x346   :  { %v5962_v27 = vpop.f32.mrf.mxu0 }
 0x347   :  { %v5255_v28 = vmul.f32 -1.442695, %v1369_v26 }
 0x349   :  { %6507 = vpow2.f32 %v5255_v28  ;;  %v7573_v28 = vld [vmem:[%s8342_s12 + $0x38] sm:$0xff] }
 0x34c   :  { %v1517_v31 = vpop.f32.mrf.mxu0 }
 0x34d   :  { %v1521_v32 = vadd.f32 %v1517_v31, %v7556_v30  ;;  %v7591_v31 = vld [vmem:[%s8342_s12 + $0x28] sm:$0xff] }
 0x34e   :  { %v5984_v33 = vpop.f32.mrf.mxu0  ;;  %v6506_v8 = vpop.eup %6505 }
 0x34f   :  { %v5256_v10 = vmul.f32 -1.442695, %v1521_v32  ;;  %v1525_v13 = vadd.f32 1.0, %v6506_v8  ;;  %v7600_v32 = vld [vmem:[%s8342_s12 + $0x20] sm:$0xff]  ;;  %v7612_v33 = vld [vmem:[%s8342_s12 + $0x58] sm:$0xff]  ;;  %v7632_v8 = vld [vmem:[%s8342_s12 + $0x48] sm:$0xff] }
 0x351   :  { %6509 = vpow2.f32 %v5256_v10  ;;  %v7642_v10 = vld [vmem:[%s8342_s12 + $0x40] sm:$0xff] }
 0x352   :  { %6511 = vrcp.f32 %v1525_v13  ;;  %v7651_v13 = vld [vmem:[%s8342_s12 + $0x78] sm:$0xff] }
 0x353   :  { %6513 = vtanh.f32 %v1445_v14  ;;  %v7662_v14 = vld [vmem:[%s8342_s12 + $0x70] sm:$0xff] }
 0x356   :  { %v6508_v15 = vpop.eup %6507 }
 0x357   :  { %v1531_v12 = vadd.f32 1.0, %v6508_v15  ;;  %v7671_v15 = vld [vmem:[%s8342_s12 + $0x68] sm:$0xff] }
 0x359   :  { %6515 = vrcp.f32 %v1531_v12  ;;  %v7680_v12 = vld [vmem:[%s8342_s12 + $0x60] sm:$0xff] }
 0x35e   :  { %v6510_v17 = vpop.eup %6509 }
 0x35f   :  { %v6512_v18 = vpop.eup %6511  ;;  %v1538_v22 = vadd.f32 1.0, %v6510_v17  ;;  %v1700_v17 = vpop.f32.mrf.mxu0 }
 0x360   :  { %v6514_v20 = vpop.eup %6513 }
 0x361   :  { %v1542_v25 = vmul.f32 %v6514_v20, %v6512_v18  ;;  %6517 = vrcp.f32 %v1538_v22  ;;  %v6006_v18 = vpop.f32.mrf.mxu0 }
 0x363   :  { %v1859_v20 = vpop.f32.mrf.mxu0 }
 0x366   :  { %v6516_v21 = vpop.eup %6515 }
 0x367   :  { %v1541_v23 = vmul.f32 0.0, %v6516_v21  ;;  %v6028_v21 = vpop.f32.mrf.mxu0 }
 0x369   :  { %v7565_v26 = vadd.f32 %v1542_v25, %v1541_v23  ;;  %v2018_v22 = vpop.f32.mrf.mxu0 }
 0x36b   :  { %6519 = vtanh.f32 %v7565_v26  ;;  %v6050_v23 = vpop.f32.mrf.mxu0 }
 0x36d   :  { %v2177_v25 = vpop.f32.mrf.mxu0 }
 0x36e   :  { %v6518_v11 = vpop.eup %6517 }
 0x378   :  { %v6520_v19 = vpop.eup %6519 }
 0x379   :  { %v7568_v27 = vmul.f32 %v6520_v19, %v6518_v11  ;;  %v6072_v11 = vpop.f32.mrf.mxu0  ;;  %v7729_v19 = vld [vmem:[%s8344_s14] ss:$0 sm:$0xff] }
 0x37a   :  { %8389 = vst [vmem:[#allocation17_spill] sm:$0xff] %v7729_v19 }
 0x37b   :  { %5994 = vmatmul.mubr.msk.f32.vlgmr.msra.gmra.mxu1 %vm1219_vm8, %v7568_v27  ;;  %6093 = vmatmul.mubr.msk.f32.vlgmr.msra.gmra.mxu0 %vm1219_vm8, %v7568_v27 }
 0x37c   :  { %6008 = vmatpush3.msra.mxu1 %v7573_v28  ;;  %6107 = vmatpush3.msra.mxu0 %v7348_v46 }
 0x37d   :  { %6009 = vmatprep.subr.mxu1 %v8357_v63  ;;  %6108 = vmatprep.subr.mxu0 %v8357_v63 }
 0x37e   :  { %6010 = vmatpush3.msra.mxu1 %v7582_v29  ;;  %6109 = vmatpush3.msra.mxu0 %v7356_v47 }
 0x37f   :  { %6011 = vmatprep.subr.mxu1 %v8357_v63  ;;  %6110 = vmatprep.subr.mxu0 %v8357_v63 }
 0x380   :  { %6012 = vmatpush3.msra.mxu1 %v7591_v31  ;;  %6111 = vmatpush3.msra.mxu0 %v7365_v48 }
 0x381   :  { %6013 = vmatprep.subr.mxu1 %v8357_v63  ;;  %6112 = vmatprep.subr.mxu0 %v8357_v63 }
 0x382   :  { %6014 = vmatpush3.msra.mxu1 %v7600_v32  ;;  %6015 = vmatprep.mubr.msk.f32.mxu1 %vm6709_vm4, %v8357_v63 }
 0x383   :  { %6113 = vmatpush3.msra.mxu0 %v7372_v49  ;;  %6114 = vmatprep.mubr.msk.f32.mxu0 %vm6709_vm4, %v8357_v63 }
 0x384   :  { %6016 = vmatmul.mubr.msk.f32.vlgmr.msra.gmra.mxu1 %vm1219_vm8, %v7568_v27  ;;  %6029 = vmatprep.subr.mxu1 %v8357_v63 }
 0x385   :  { %6115 = vmatmul.mubr.msk.f32.vlgmr.msra.gmra.mxu0 %vm1219_vm8, %v7568_v27  ;;  %6030 = vmatpush3.msra.mxu1 %v7612_v33 }
 0x386   :  { %6031 = vmatprep.subr.mxu1 %v8357_v63  ;;  %6037 = vmatprep.mubr.msk.f32.mxu1 %vm6709_vm4, %v8357_v63 }
 0x387   :  { %6032 = vmatpush3.msra.mxu1 %v7623_v7  ;;  %6128 = vmatprep.subr.mxu0 %v8357_v63 }
 0x388   :  { %6033 = vmatprep.subr.mxu1 %v8357_v63  ;;  %6129 = vmatpush3.msra.mxu0 %v7384_v50 }
 0x389   :  { %6034 = vmatpush3.msra.mxu1 %v7632_v8  ;;  %6130 = vmatprep.subr.mxu0 %v8357_v63 }
 0x38a   :  { %6035 = vmatprep.subr.mxu1 %v8357_v63  ;;  %6131 = vmatpush3.msra.mxu0 %v7391_v51 }
 0x38b   :  { %6036 = vmatpush3.msra.mxu1 %v7642_v10  ;;  %6132 = vmatprep.subr.mxu0 %v8357_v63 }
 0x38c   :  { %6038 = vmatmul.mubr.msk.f32.vlgmr.msra.gmra.mxu1 %vm1219_vm8, %v7568_v27  ;;  %6051 = vmatprep.subr.mxu1 %v8357_v63 }
 0x38d   :  { %6052 = vmatpush3.msra.mxu1 %v7651_v13  ;;  %6059 = vmatprep.mubr.msk.f32.mxu1 %vm6709_vm4, %v8357_v63 }
 0x38e   :  { %6053 = vmatprep.subr.mxu1 %v8357_v63  ;;  %6133 = vmatpush3.msra.mxu0 %v7398_v52 }
 0x38f   :  { %6054 = vmatpush3.msra.mxu1 %v7662_v14  ;;  %6134 = vmatprep.subr.mxu0 %v8357_v63 }
 0x390   :  { %6055 = vmatprep.subr.mxu1 %v8357_v63  ;;  %6135 = vmatpush3.msra.mxu0 %v7405_v53 }
 0x391   :  { %6056 = vmatpush3.msra.mxu1 %v7671_v15  ;;  %6136 = vmatprep.mubr.msk.f32.mxu0 %vm6709_vm4, %v8357_v63 }
 0x392   :  { %6057 = vmatprep.subr.mxu1 %v8357_v63  ;;  %6150 = vmatprep.subr.mxu0 %v8357_v63 }
 0x393   :  { %6058 = vmatpush3.msra.mxu1 %v7680_v12 }
 0x394   :  { %6060 = vmatmul.mubr.msk.f32.vlgmr.msra.gmra.mxu1 %vm1219_vm8, %v7568_v27  ;;  %6073 = vmatprep.subr.mxu1 %v8357_v63 }
 0x395   :  { %6074 = vmatpush3.msra.mxu1 %v7252_v34  ;;  %6081 = vmatprep.mubr.msk.f32.mxu1 %vm6709_vm4, %v8357_v63 }
 0x396   :  { %6075 = vmatprep.subr.mxu1 %v8357_v63 }
 0x397   :  { %6076 = vmatpush3.msra.mxu1 %v7266_v36 }
 0x398   :  { %6077 = vmatprep.subr.mxu1 %v8357_v63 }
 0x399   :  { %6078 = vmatpush3.msra.mxu1 %v7280_v38 }
 0x39a   :  { %6079 = vmatprep.subr.mxu1 %v8357_v63 }
 0x39b   :  { %6080 = vmatpush3.msra.mxu1 %v7294_v40 }
 0x39c   :  { %6082 = vmatmul.mubr.msk.f32.vlgmr.msra.gmra.mxu1 %vm1219_vm8, %v7568_v27  ;;  %6095 = vmatprep.subr.mxu1 %v8357_v63 }
 0x39d   :  { %6096 = vmatpush3.msra.mxu1 %v7257_v35  ;;  %6103 = vmatprep.mubr.msk.f32.mxu1 %vm6709_vm4, %v8357_v63 }
 0x39e   :  { %6097 = vmatprep.subr.mxu1 %v8357_v63 }
 0x39f   :  { %6098 = vmatpush3.msra.mxu1 %v7271_v37 }
 0x3a0   :  { %6099 = vmatprep.subr.mxu1 %v8357_v63 }
 0x3a1   :  { %6100 = vmatpush3.msra.mxu1 %v7285_v39 }
 0x3a2   :  { %6101 = vmatprep.subr.mxu1 %v8357_v63 }
 0x3a3   :  { %6102 = vmatpush3.msra.mxu1 %v7301_v41 }
 0x3a4   :  { %6104 = vmatmul.mubr.msk.f32.vlgmr.msra.gmra.mxu1 %vm1219_vm8, %v7568_v27  ;;  %6117 = vmatprep.subr.mxu1 %v8357_v63 }
 0x3a5   :  { %6118 = vmatpush3.msra.mxu1 %v7505_v3  ;;  %6125 = vmatprep.mubr.msk.f32.mxu1 %vm6709_vm4, %v8357_v63 }
 0x3a6   :  { %6119 = vmatprep.subr.mxu1 %v8357_v63 }
 0x3a7   :  { %6120 = vmatpush3.msra.mxu1 %v7515_v4 }
 0x3a8   :  { %6121 = vmatprep.subr.mxu1 %v8357_v63 }
 0x3a9   :  { %6122 = vmatpush3.msra.mxu1 %v7524_v5 }
 0x3aa   :  { %6123 = vmatprep.subr.mxu1 %v8357_v63 }
 0x3ab   :  { %6124 = vmatpush3.msra.mxu1 %v7533_v6 }
 0x3ac   :  { %6139 = vmatprep.subr.mxu1 %v8357_v63  ;;  %v7735_v63 = vld [vmem:[%s8344_s14 + $0x1] ss:$0 sm:$0xff] }
 0x3ad   :  { %8390 = vst [vmem:[#allocation18_spill] sm:$0xff] %v7735_v63 }
 0x43b   :  { %v1626_v27 = vpop.f32.mrf.mxu1  ;;  %v2346_v18 = vpop.f32.mrf.mxu0 }
 0x43c   :  { %v1627_v21 = vadd.f32 %v7729_v19, %v1626_v27 }
 0x43d   :  { %v5995_v5 = vpop.f32.mrf.mxu1  ;;  %v6094_v4 = vpop.f32.mrf.mxu0 }
 0x43e   :  { %v1704_v3 = vadd.f32 %v1700_v17, %v1627_v21  ;;  %v2351_v4 = vrot.slane %v2346_v18, 6 }
 0x440   :  { %v5292_v41 = vmul.f32 -1.442695, %v1704_v3  ;;  %v7741_v3 = vld [vmem:[%s8344_s14 + $0x2] ss:$0 sm:$0xff] }
 0x441   :  { %8391 = vst [vmem:[#allocation19_spill] sm:$0xff] %v7741_v3 }
 0x442   :  { %6521 = vpow2.f32 %v5292_v41  ;;  %v7747_v41 = vld [vmem:[%s8344_s14 + $0x3] ss:$0 sm:$0xff] }
 0x444   :  { %v1784_v23 = vpop.f32.mrf.mxu1 }
 0x445   :  { %v1785_v11 = vadd.f32 %v7735_v63, %v1784_v23  ;;  %v2494_v6 = vpop.f32.mrf.mxu0 }
 0x446   :  { %v6017_v39 = vpop.f32.mrf.mxu1 }
 0x447   :  { %v1863_v37 = vadd.f32 %v1859_v20, %v1785_v11  ;;  %v6116_v35 = vpop.f32.mrf.mxu0 }
 0x448   :  { %v2353_v35 = vadd.f32 %v2351_v4, %v7550_v24 }
 0x449   :  { %v5293_v40 = vmul.f32 -1.442695, %v1863_v37 }
 0x44a   :  { %v5300_v63 = vmul.f32 -1.442695, %v2353_v35 }
 0x44b   :  { %6523 = vpow2.f32 %v5293_v40 }
 0x44c   :  { %v1943_v27 = vpop.f32.mrf.mxu1 }
 0x44d   :  { %v1944_v21 = vadd.f32 %v7741_v3, %v1943_v27 }
 0x44e   :  { %v6039_v5 = vpop.f32.mrf.mxu1 }
 0x44f   :  { %v6522_v17 = vpop.eup %6521  ;;  %v2022_v20 = vadd.f32 %v2018_v22, %v1944_v21 }
 0x450   :  { %v2185_v39 = vadd.f32 1.0, %v6522_v17 }
 0x452   :  { %6525 = vrcp.f32 %v2185_v39 }
 0x453   :  { %6527 = vtanh.f32 %v2022_v20 }
 0x454   :  { %v2102_v37 = vpop.f32.mrf.mxu1 }
 0x455   :  { %v2103_v40 = vadd.f32 %v7747_v41, %v2102_v37  ;;  %v2499_v37 = vrot.slane %v2494_v6, 6 }
 0x456   :  { %v6061_v23 = vpop.f32.mrf.mxu1 }
 0x457   :  { %v2181_v11 = vadd.f32 %v2177_v25, %v2103_v40  ;;  %v2501_v39 = vadd.f32 %v2499_v37, %v7556_v30 }
 0x458   :  { %v6524_v5 = vpop.eup %6523 }
 0x459   :  { %v2191_v18 = vadd.f32 1.0, %v6524_v5  ;;  %v5294_v19 = vmul.f32 -1.442695, %v2181_v11 }
 0x45b   :  { %6529 = vrcp.f32 %v2191_v18  ;;  %v5301_v18 = vmul.f32 -1.442695, %v2501_v39  ;;  %v8392_v39 = vmov 0.0  }
 0x45c   :  { %6531 = vpow2.f32 %v5300_v63  ;;  %v2272_v27 = vpop.f32.mrf.mxu1 }
 0x45d   :  { %6533 = vpow2.f32 %v5294_v19  ;;  %v2277_v3 = vrot.slane %v2272_v27, 6 }
 0x45e   :  { %v6083_v38 = vpop.f32.mrf.mxu1 }
 0x45f   :  { %v2279_v4 = vadd.f32 %v2277_v3, %v7544_v16  ;;  %v6526_v21 = vpop.eup %6525 }
 0x460   :  { %v6528_v40 = vpop.eup %6527 }
 0x461   :  { %v5299_v17 = vmul.f32 -1.442695, %v2279_v4  ;;  %v2202_v11 = vmul.f32 %v6528_v40, %v6526_v21 }
 0x463   :  { %6535 = vpow2.f32 %v5299_v17 }
 0x464   :  { %v2420_v22 = vpop.f32.mrf.mxu1 }
 0x465   :  { %v2425_v5 = vrot.slane %v2420_v22, 6 }
 0x466   :  { %v6105_v25 = vpop.f32.mrf.mxu1 }
 0x467   :  { %v2427_v6 = vadd.f32 %v2425_v5, %v7562_v9 }
 0x468   :  { %v6530_v35 = vpop.eup %6529 }
 0x469   :  { %v6532_v23 = vpop.eup %6531  ;;  %v2201_v20 = vmul.f32 0.0, %v6530_v35  ;;  %v2522_v35 = vrot.slane %v7565_v26, 6 }
 0x46a   :  { %v6534_v63 = vpop.eup %6533  ;;  %v2511_v3 = vadd.f32 1.0, %v6532_v23 }
 0x46b   :  { %v7753_v19 = vadd.f32 %v2202_v11, %v2201_v20  ;;  %v2198_v38 = vadd.f32 1.0, %v6534_v63 }
 0x46d   :  { %6537 = vtanh.f32 %v7753_v19 }
 0x46e   :  { %6539 = vrcp.f32 %v2198_v38 }
 0x46f   :  { %6541 = vpow2.f32 %v5301_v18 }
 0x470   :  { %v6536_v27 = vpop.eup %6535  ;;  %6543 = vrcp.f32 %v2511_v3  ;;  %v8403_v3 = vld [vmem:[#allocation17_spill] sm:$0xff] }
 0x471   :  { %v2505_v4 = vadd.f32 1.0, %v6536_v27  ;;  %6545 = vtanh.f32 %v2427_v6 }
 0x473   :  { %6547 = vrcp.f32 %v2505_v4 }
 0x47a   :  { %v6538_v17 = vpop.eup %6537 }
 0x47b   :  { %v6540_v37 = vpop.eup %6539 }
 0x47c   :  { %v2205_v21 = vmul.f32 %v6540_v37, %v6538_v17  ;;  %v6542_v22 = vpop.eup %6541 }
 0x47d   :  { %v6544_v25 = vpop.eup %6543  ;;  %v2518_v20 = vadd.f32 1.0, %v6542_v22 }
 0x47e   :  { %6137 = vmatmul.mubr.msk.f32.vlgmr.msra.gmra.mxu0 %vm1219_vm8, %v2205_v21  ;;  %v6546_v40 = vpop.eup %6545  ;;  %v2524_v11 = vmul.f32 %v6544_v25, %v2522_v35  ;;  %v8404_v25 = vld [vmem:[#allocation18_spill] sm:$0xff] }
 0x47f   :  { %6151 = vmatpush3.msra.mxu0 %v7413_v54  ;;  %6158 = vmatprep.mubr.msk.f32.mxu0 %vm6709_vm4, %v8392_v39  ;;  %6549 = vrcp.f32 %v2518_v20 }
 0x480   :  { %v6548_v23 = vpop.eup %6547  ;;  %6152 = vmatprep.subr.mxu0 %v8392_v39 }
 0x481   :  { %v2525_v63 = vmul.f32 %v6548_v23, %v6546_v40  ;;  %6153 = vmatpush3.msra.mxu0 %v7422_v55 }
 0x482   :  { %6154 = vmatprep.subr.mxu0 %v8392_v39 }
 0x483   :  { %v7765_v5 = vadd.f32 %v2525_v63, %v2524_v11  ;;  %6155 = vmatpush3.msra.mxu0 %v7429_v56 }
 0x484   :  { %6156 = vmatprep.subr.mxu0 %v8392_v39 }
 0x485   :  { %6551 = vtanh.f32 %v7765_v5  ;;  %6157 = vmatpush3.msra.mxu0 %v7436_v57 }
 0x486   :  { %6159 = vmatmul.mubr.msk.f32.vlgmr.msra.gmra.mxu0 %vm1219_vm8, %v2205_v21  ;;  %6172 = vmatprep.subr.mxu0 %v8392_v39 }
 0x487   :  { %6173 = vmatpush3.msra.mxu0 %v7444_v58  ;;  %6180 = vmatprep.mubr.msk.f32.mxu0 %vm6709_vm4, %v8392_v39 }
 0x488   :  { %6174 = vmatprep.subr.mxu0 %v8392_v39 }
 0x489   :  { %6175 = vmatpush3.msra.mxu0 %v7453_v59 }
 0x48a   :  { %6176 = vmatprep.subr.mxu0 %v8392_v39 }
 0x48b   :  { %6177 = vmatpush3.msra.mxu0 %v7460_v60 }
 0x48c   :  { %6178 = vmatprep.subr.mxu0 %v8392_v39  ;;  %v6550_v56 = vpop.eup %6549 }
 0x48d   :  { %6179 = vmatpush3.msra.mxu0 %v7467_v61 }
 0x48e   :  { %6181 = vmatmul.mubr.msk.f32.vlgmr.msra.gmra.mxu0 %vm1219_vm8, %v2205_v21  ;;  %6194 = vmatprep.subr.mxu0 %v8392_v39 }
 0x48f   :  { %6195 = vmatpush3.msra.mxu0 %v7475_v62  ;;  %6202 = vmatprep.mubr.msk.f32.mxu0 %vm6709_vm4, %v8392_v39 }
 0x490   :  { %6196 = vmatprep.subr.mxu0 %v8392_v39 }
 0x491   :  { %6197 = vmatpush3.msra.mxu0 %v7484_v0 }
 0x492   :  { %v6552_v57 = vpop.eup %6551  ;;  %6198 = vmatprep.subr.mxu0 %v8392_v39 }
 0x493   :  { %6199 = vmatpush3.msra.mxu0 %v7491_v1  ;;  %v2528_v58 = vmul.f32 %v6552_v57, %v6550_v56 }
 0x494   :  { %6200 = vmatprep.subr.mxu0 %v8392_v39 }
 0x495   :  { %6201 = vmatpush3.msra.mxu0 %v7498_v2  ;;  %v7793_v59 = vrot.slane %v2528_v58, 2 }
 0x496   :  { %6203 = vmatmul.mubr.msk.f32.vlgmr.msra.gmra.mxu0 %vm1219_vm8, %v2205_v21  ;;  %6216 = vmatprep.subr.mxu0 %v8392_v39 }
 0x497   :  { %6217 = vmatpush3.msra.mxu0 %v7311_v42  ;;  %6126 = vmatmul.mubr.msk.f32.vlgmr.msra.gmra.mxu1 %vm1219_vm8, %v7793_v59  ;;  %v8393_v42 = vld [vmem:[#allocation9_spill] sm:$0xff] }
 0x498   :  { %6218 = vmatprep.subr.mxu0 %v8392_v39  ;;  %6140 = vmatpush3.msra.mxu1 %v7573_v28 }
 0x499   :  { %6219 = vmatpush3.msra.mxu0 %v7321_v43  ;;  %6141 = vmatprep.subr.mxu1 %v8392_v39  ;;  %v8396_v43 = vld [vmem:[#allocation8_spill] sm:$0xff] }
 0x49a   :  { %6220 = vmatprep.subr.mxu0 %v8392_v39  ;;  %6142 = vmatpush3.msra.mxu1 %v7582_v29 }
 0x49b   :  { %6221 = vmatpush3.msra.mxu0 %v7329_v44  ;;  %6143 = vmatprep.subr.mxu1 %v8392_v39  ;;  %v8397_v44 = vld [vmem:[#allocation10_spill] sm:$0xff] }
 0x49c   :  { %6222 = vmatprep.subr.mxu0 %v8392_v39  ;;  %6144 = vmatpush3.msra.mxu1 %v7591_v31 }
 0x49d   :  { %6223 = vmatpush3.msra.mxu0 %v7339_v45  ;;  %6224 = vmatprep.mubr.msk.f32.mxu0 %vm6709_vm4, %v8392_v39  ;;  %v8398_v45 = vld [vmem:[#allocation12_spill] sm:$0xff] }
 0x49e   :  { %6145 = vmatprep.subr.mxu1 %v8392_v39  ;;  %6225 = vmatmul.mubr.msk.f32.vlgmr.msra.gmra.mxu0 %vm1219_vm8, %v7793_v59 }
 0x49f   :  { %6238 = vmatprep.subr.mxu0 %v8392_v39  ;;  %6146 = vmatpush3.msra.mxu1 %v7600_v32 }
 0x4a0   :  { %6147 = vmatprep.mubr.msk.f32.mxu1 %vm6709_vm4, %v8392_v39  ;;  %6239 = vmatpush3.msra.mxu0 %v7348_v46  ;;  %v8399_v46 = vld [vmem:[#allocation13_spill] sm:$0xff] }
 0x4a1   :  { %6148 = vmatmul.mubr.msk.f32.vlgmr.msra.gmra.mxu1 %vm1219_vm8, %v7793_v59  ;;  %6161 = vmatprep.subr.mxu1 %v8392_v39 }
 0x4a2   :  { %6240 = vmatprep.subr.mxu0 %v8392_v39  ;;  %6162 = vmatpush3.msra.mxu1 %v7612_v33 }
 0x4a3   :  { %6241 = vmatpush3.msra.mxu0 %v7356_v47  ;;  %6163 = vmatprep.subr.mxu1 %v8392_v39  ;;  %v8400_v47 = vld [vmem:[#allocation14_spill] sm:$0xff] }
 0x4a4   :  { %6242 = vmatprep.subr.mxu0 %v8392_v39  ;;  %6164 = vmatpush3.msra.mxu1 %v7623_v7 }
 0x4a5   :  { %6243 = vmatpush3.msra.mxu0 %v7365_v48  ;;  %6165 = vmatprep.subr.mxu1 %v8392_v39  ;;  %v8401_v48 = vld [vmem:[#allocation15_spill] sm:$0xff] }
 0x4a6   :  { %6244 = vmatprep.subr.mxu0 %v8392_v39  ;;  %6166 = vmatpush3.msra.mxu1 %v7632_v8 }
 0x4a7   :  { %6245 = vmatpush3.msra.mxu0 %v7372_v49  ;;  %6246 = vmatprep.mubr.msk.f32.mxu0 %vm6709_vm4, %v8392_v39  ;;  %v8402_v49 = vld [vmem:[#allocation16_spill] sm:$0xff] }
 0x4a8   :  { %6167 = vmatprep.subr.mxu1 %v8392_v39  ;;  %6247 = vmatmul.mubr.msk.f32.vlgmr.msra.gmra.mxu0 %vm1219_vm8, %v7793_v59 }
 0x4a9   :  { %6168 = vmatpush3.msra.mxu1 %v7642_v10  ;;  %6169 = vmatprep.mubr.msk.f32.mxu1 %vm6709_vm4, %v8392_v39 }
 0x4aa   :  { %6170 = vmatmul.mubr.msk.f32.vlgmr.msra.gmra.mxu1 %vm1219_vm8, %v7793_v59  ;;  %6183 = vmatprep.subr.mxu1 %v8392_v39 }
 0x4ab   :  { %6184 = vmatpush3.msra.mxu1 %v7651_v13  ;;  %6191 = vmatprep.mubr.msk.f32.mxu1 %vm6709_vm4, %v8392_v39 }
 0x4ac   :  { %6185 = vmatprep.subr.mxu1 %v8392_v39  ;;  %6260 = vmatprep.subr.mxu0 %v8392_v39 }
 0x4ad   :  { %6186 = vmatpush3.msra.mxu1 %v7662_v14  ;;  %6261 = vmatpush3.msra.mxu0 %v7384_v50 }
 0x4ae   :  { %6187 = vmatprep.subr.mxu1 %v8392_v39  ;;  %6262 = vmatprep.subr.mxu0 %v8392_v39 }
 0x4af   :  { %6188 = vmatpush3.msra.mxu1 %v7671_v15  ;;  %6263 = vmatpush3.msra.mxu0 %v7391_v51 }
 0x4b0   :  { %6189 = vmatprep.subr.mxu1 %v8392_v39  ;;  %6264 = vmatprep.subr.mxu0 %v8392_v39 }
 0x4b1   :  { %6190 = vmatpush3.msra.mxu1 %v7680_v12  ;;  %6265 = vmatpush3.msra.mxu0 %v7398_v52 }
 0x4b2   :  { %6192 = vmatmul.mubr.msk.f32.vlgmr.msra.gmra.mxu1 %vm1219_vm8, %v7793_v59  ;;  %6205 = vmatprep.subr.mxu1 %v8392_v39 }
 0x4b3   :  { %6206 = vmatpush3.msra.mxu1 %v7252_v34  ;;  %6213 = vmatprep.mubr.msk.f32.mxu1 %vm6709_vm4, %v8392_v39  ;;  %v8394_v34 = vld [vmem:[#allocation11_spill] sm:$0xff] }
 0x4b4   :  { %6207 = vmatprep.subr.mxu1 %v8392_v39  ;;  %6266 = vmatprep.subr.mxu0 %v8392_v39 }
 0x4b5   :  { %6208 = vmatpush3.msra.mxu1 %v7266_v36  ;;  %6267 = vmatpush3.msra.mxu0 %v7405_v53  ;;  %v8395_v36 = vld [vmem:[#allocation7_spill] sm:$0xff] }
 0x4b6   :  { %6209 = vmatprep.subr.mxu1 %v8392_v39  ;;  %6268 = vmatprep.mubr.msk.f32.mxu0 %vm6709_vm4, %v8392_v39 }
 0x4b7   :  { %6210 = vmatpush3.msra.mxu1 %v8393_v42  ;;  %6282 = vmatprep.subr.mxu0 %v8392_v39  ;;  %v8405_v42 = vld [vmem:[#allocation19_spill] sm:$0xff] }
 0x4b8   :  { %6211 = vmatprep.subr.mxu1 %v8392_v39 }
 0x4b9   :  { %6212 = vmatpush3.msra.mxu1 %v8394_v34 }
 0x4ba   :  { %6214 = vmatmul.mubr.msk.f32.vlgmr.msra.gmra.mxu1 %vm1219_vm8, %v7793_v59  ;;  %6227 = vmatprep.subr.mxu1 %v8392_v39 }
 0x4bb   :  { %6228 = vmatpush3.msra.mxu1 %v8395_v36  ;;  %6235 = vmatprep.mubr.msk.f32.mxu1 %vm6709_vm4, %v8392_v39 }
 0x4bc   :  { %6229 = vmatprep.subr.mxu1 %v8392_v39 }
 0x4bd   :  { %6230 = vmatpush3.msra.mxu1 %v8396_v43 }
 0x4be   :  { %6231 = vmatprep.subr.mxu1 %v8392_v39 }
 0x4bf   :  { %6232 = vmatpush3.msra.mxu1 %v8397_v44 }
 0x4c0   :  { %6233 = vmatprep.subr.mxu1 %v8392_v39 }
 0x4c1   :  { %6234 = vmatpush3.msra.mxu1 %v8398_v45 }
 0x4c2   :  { %6236 = vmatmul.mubr.msk.f32.vlgmr.msra.gmra.mxu1 %vm1219_vm8, %v7793_v59  ;;  %6249 = vmatprep.subr.mxu1 %v8392_v39 }
 0x4c3   :  { %6250 = vmatpush3.msra.mxu1 %v8399_v46  ;;  %6257 = vmatprep.mubr.msk.f32.mxu1 %vm6709_vm4, %v8392_v39 }
 0x4c4   :  { %6251 = vmatprep.subr.mxu1 %v8392_v39 }
 0x4c5   :  { %6252 = vmatpush3.msra.mxu1 %v8400_v47 }
 0x4c6   :  { %6253 = vmatprep.subr.mxu1 %v8392_v39 }
 0x4c7   :  { %6254 = vmatpush3.msra.mxu1 %v8401_v48 }
 0x4c8   :  { %6255 = vmatprep.subr.mxu1 %v8392_v39 }
 0x4c9   :  { %6256 = vmatpush3.msra.mxu1 %v8402_v49 }
 0x4ca   :  { %6271 = vmatprep.subr.mxu1 %v8392_v39 }
 0x53e   :  { %v2672_v50 = vpop.f32.mrf.mxu0 }
 0x540   :  { %v6138_v51 = vpop.f32.mrf.mxu0 }
 0x546   :  { %v2813_v52 = vpop.f32.mrf.mxu0 }
 0x548   :  { %v6160_v53 = vpop.f32.mrf.mxu0 }
 0x54e   :  { %v2954_v60 = vpop.f32.mrf.mxu0 }
 0x550   :  { %v6182_v61 = vpop.f32.mrf.mxu0 }
 0x556   :  { %v3095_v26 = vpop.f32.mrf.mxu0 }
 0x557   :  { %v2599_v38 = vpop.f32.mrf.mxu1 }
 0x558   :  { %v6204_v18 = vpop.f32.mrf.mxu0  ;;  %v2600_v6 = vadd.f32 %v8403_v3, %v2599_v38 }
 0x559   :  { %v6127_v27 = vpop.f32.mrf.mxu1 }
 0x55a   :  { %v2676_v4 = vadd.f32 %v2672_v50, %v2600_v6 }
 0x55c   :  { %v5310_v17 = vmul.f32 -1.442695, %v2676_v4 }
 0x55e   :  { %v3264_v37 = vpop.f32.mrf.mxu0  ;;  %6553 = vpow2.f32 %v5310_v17 }
 0x55f   :  { %v3269_v59 = vrot.slane %v3264_v37, 4 }
 0x560   :  { %v6226_v21 = vpop.f32.mrf.mxu0 }
 0x561   :  { %v2743_v22 = vpop.f32.mrf.mxu1  ;;  %v3271_v44 = vadd.f32 %v3269_v59, %v7550_v24 }
 0x562   :  { %v2744_v40 = vadd.f32 %v8404_v25, %v2743_v22 }
 0x563   :  { %v6149_v35 = vpop.f32.mrf.mxu1  ;;  %v5318_v51 = vmul.f32 -1.442695, %v3271_v44 }
 0x564   :  { %v2817_v23 = vadd.f32 %v2813_v52, %v2744_v40 }
 0x566   :  { %v5311_v20 = vmul.f32 -1.442695, %v2817_v23 }
 0x568   :  { %6555 = vpow2.f32 %v5311_v20  ;;  %v3412_v11 = vpop.f32.mrf.mxu0 }
 0x56a   :  { %v2884_v63 = vpop.f32.mrf.mxu1  ;;  %v6248_v56 = vpop.f32.mrf.mxu0 }
 0x56b   :  { %v6554_v58 = vpop.eup %6553  ;;  %v2885_v34 = vadd.f32 %v8405_v42, %v2884_v63 }
 0x56c   :  { %v6171_v57 = vpop.f32.mrf.mxu1  ;;  %v3103_v36 = vadd.f32 1.0, %v6554_v58 }
 0x56d   :  { %v2958_v45 = vadd.f32 %v2954_v60, %v2885_v34  ;;  %v3417_v60 = vrot.slane %v3412_v11, 4 }
 0x56e   :  { %6557 = vrcp.f32 %v3103_v36 }
 0x56f   :  { %6559 = vtanh.f32 %v2958_v45  ;;  %v3419_v22 = vadd.f32 %v3417_v60, %v7556_v30 }
 0x571   :  { %v5319_v57 = vmul.f32 -1.442695, %v3419_v22  ;;  %v6660_v22 = vld [vmem:[%s8342_s12 + $0x10] sm:$0xff] }
 0x572   :  { %v3025_v43 = vpop.f32.mrf.mxu1 }
 0x573   :  { %v3026_v46 = vadd.f32 %v7747_v41, %v3025_v43 }
 0x574   :  { %v6193_v47 = vpop.f32.mrf.mxu1 }
 0x575   :  { %v6556_v48 = vpop.eup %6555  ;;  %v3099_v49 = vadd.f32 %v3095_v26, %v3026_v46  ;;  %v3440_v47 = vrot.slane %v7765_v5, 6  ;;  %v7944_v5 = vld [vmem:[%s8343_s13 + $0x58] sm:$0xff] }
 0x576   :  { %v3109_v50 = vadd.f32 1.0, %v6556_v48 }
 0x577   :  { %v5312_v52 = vmul.f32 -1.442695, %v3099_v49 }
 0x578   :  { %6561 = vrcp.f32 %v3109_v50 }
 0x579   :  { %6563 = vpow2.f32 %v5312_v52 }
 0x57a   :  { %v3190_v53 = vpop.f32.mrf.mxu1  ;;  %6565 = vpow2.f32 %v5318_v51 }
 0x57b   :  { %v3195_v61 = vrot.slane %v3190_v53, 4  ;;  %v6558_v4 = vpop.eup %6557  ;;  %v7953_v53 = vld [vmem:[%s8343_s13 + $0x50] sm:$0xff] }
 0x57c   :  { %v6215_v38 = vpop.f32.mrf.mxu1  ;;  %v6560_v17 = vpop.eup %6559 }
 0x57d   :  { %v3197_v18 = vadd.f32 %v3195_v61, %v7544_v16  ;;  %v3120_v35 = vmul.f32 %v6560_v17, %v6558_v4  ;;  %v7960_v61 = vld [vmem:[%s8343_s13 + $0x48] sm:$0xff]  ;;  %v7967_v38 = vld [vmem:[%s8343_s13 + $0x40] sm:$0xff]  ;;  %v6655_v4 = vld [vmem:[%s8340_s10 + $0x58] sm:$0xff] }
 0x57e   :  { %v6656_v17 = vld [vmem:[%s8340_s10 + $0x50] sm:$0xff] }
 0x57f   :  { %v5317_v6 = vmul.f32 -1.442695, %v3197_v18 }
 0x581   :  { %6567 = vpow2.f32 %v5317_v6 }
 0x582   :  { %v3338_v27 = vpop.f32.mrf.mxu1 }
 0x583   :  { %v3343_v56 = vrot.slane %v3338_v27, 4  ;;  %v6642_v27 = vld [vmem:[%s8340_s10 + $0x20] sm:$0xff] }
 0x584   :  { %v6237_v26 = vpop.f32.mrf.mxu1 }
 0x585   :  { %v6562_v37 = vpop.eup %6561  ;;  %v3345_v58 = vadd.f32 %v3343_v56, %v7562_v9  ;;  %v6657_v26 = vld [vmem:[%s8340_s10 + $0x48] sm:$0xff] }
 0x586   :  { %v6564_v21 = vpop.eup %6563  ;;  %v3119_v40 = vmul.f32 %v6562_v37, %v7753_v19  ;;  %v6658_v37 = vld [vmem:[%s8340_s10 + $0x40] sm:$0xff] }
 0x587   :  { %v3116_v23 = vadd.f32 1.0, %v6564_v21  ;;  %v6566_v20 = vpop.eup %6565  ;;  %v6659_v21 = vld [vmem:[%s8342_s12 + $0x18] sm:$0xff] }
 0x588   :  { %v7911_v63 = vadd.f32 %v3120_v35, %v3119_v40  ;;  %v3429_v11 = vadd.f32 1.0, %v6566_v20  ;;  %v6661_v40 = vld [vmem:[%s8342_s12 + $0x8] sm:$0xff]  ;;  %v6662_v35 = vld [vmem:[%s8342_s12] sm:$0xff] }
 0x589   :  { %6569 = vrcp.f32 %v3116_v23 }
 0x58a   :  { %6571 = vtanh.f32 %v7911_v63 }
 0x58b   :  { %6573 = vpow2.f32 %v5319_v57 }
 0x58c   :  { %6575 = vrcp.f32 %v3429_v11 }
 0x58d   :  { %6577 = vtanh.f32 %v3345_v58 }
 0x58e   :  { %v6568_v59 = vpop.eup %6567 }
 0x58f   :  { %v3423_v34 = vadd.f32 1.0, %v6568_v59 }
 0x591   :  { %6579 = vrcp.f32 %v3423_v34 }
 0x596   :  { %v6570_v19 = vpop.eup %6569 }
 0x597   :  { %v6572_v36 = vpop.eup %6571 }
 0x598   :  { %v3123_v43 = vmul.f32 %v6572_v36, %v6570_v19  ;;  %v6574_v44 = vpop.eup %6573 }
 0x599   :  { %v6576_v45 = vpop.eup %6575  ;;  %v3436_v49 = vadd.f32 1.0, %v6574_v44 }
 0x59a   :  { %6269 = vmatmul.mubr.msk.f32.vlgmr.msra.gmra.mxu0 %vm1219_vm8, %v3123_v43  ;;  %v6578_v46 = vpop.eup %6577  ;;  %v3442_v50 = vmul.f32 %v6576_v45, %v3440_v47 }
 0x59b   :  { %6283 = vmatpush3.msra.mxu0 %v7413_v54  ;;  %6290 = vmatprep.mubr.msk.f32.mxu0 %vm6709_vm4, %v8392_v39  ;;  %v7926_v54 = vld [vmem:[%s8343_s13 + $0x28] sm:$0xff]  ;;  %6581 = vrcp.f32 %v3436_v49 }
 0x59c   :  { %6284 = vmatprep.subr.mxu0 %v8392_v39 }
 0x59d   :  { %6285 = vmatpush3.msra.mxu0 %v7422_v55  ;;  %v7935_v55 = vld [vmem:[%s8343_s13 + $0x20] sm:$0xff] }
 0x59e   :  { %v6580_v48 = vpop.eup %6579  ;;  %6286 = vmatprep.subr.mxu0 %v8392_v39 }
 0x59f   :  { %v3443_v51 = vmul.f32 %v6580_v48, %v6578_v46  ;;  %6287 = vmatpush3.msra.mxu0 %v7926_v54 }
 0x5a0   :  { %6288 = vmatprep.subr.mxu0 %v8392_v39 }
 0x5a1   :  { %v7930_v52 = vadd.f32 %v3443_v51, %v3442_v50  ;;  %6289 = vmatpush3.msra.mxu0 %v7935_v55 }
 0x5a2   :  { %6291 = vmatmul.mubr.msk.f32.vlgmr.msra.gmra.mxu0 %vm1219_vm8, %v3123_v43  ;;  %6304 = vmatprep.subr.mxu0 %v8392_v39 }
 0x5a3   :  { %6583 = vtanh.f32 %v7930_v52  ;;  %6305 = vmatpush3.msra.mxu0 %v7944_v5  ;;  %6312 = vmatprep.mubr.msk.f32.mxu0 %vm6709_vm4, %v8392_v39 }
 0x5a4   :  { %6306 = vmatprep.subr.mxu0 %v8392_v39 }
 0x5a5   :  { %6307 = vmatpush3.msra.mxu0 %v7953_v53 }
 0x5a6   :  { %6308 = vmatprep.subr.mxu0 %v8392_v39 }
 0x5a7   :  { %6309 = vmatpush3.msra.mxu0 %v7960_v61 }
 0x5a8   :  { %6310 = vmatprep.subr.mxu0 %v8392_v39  ;;  %v6582_v18 = vpop.eup %6581 }
 0x5a9   :  { %6311 = vmatpush3.msra.mxu0 %v7967_v38 }
 0x5aa   :  { %6313 = vmatmul.mubr.msk.f32.vlgmr.msra.gmra.mxu0 %vm1219_vm8, %v3123_v43  ;;  %6326 = vmatprep.subr.mxu0 %v8392_v39 }
 0x5ab   :  { %6327 = vmatpush3.msra.mxu0 %v7475_v62  ;;  %6334 = vmatprep.mubr.msk.f32.mxu0 %vm6709_vm4, %v8392_v39  ;;  %v6639_v62 = vld [vmem:[%s8340_s10 + $0x38] sm:$0xff] }
 0x5ac   :  { %6328 = vmatprep.subr.mxu0 %v8392_v39 }
 0x5ad   :  { %6329 = vmatpush3.msra.mxu0 %v7484_v0 }
 0x5ae   :  { %6330 = vmatprep.subr.mxu0 %v8392_v39 }
 0x5af   :  { %6331 = vmatpush3.msra.mxu0 %v7491_v1  ;;  %v6640_v1 = vld [vmem:[%s8340_s10 + $0x30] sm:$0xff] }
 0x5b0   :  { %v6584_v6 = vpop.eup %6583  ;;  %6332 = vmatprep.subr.mxu0 %v8392_v39 }
 0x5b1   :  { %6333 = vmatpush3.msra.mxu0 %v7498_v2  ;;  %v3446_v60 = vmul.f32 %v6584_v6, %v6582_v18  ;;  %v6641_v2 = vld [vmem:[%s8340_s10 + $0x28] sm:$0xff] }
 0x5b2   :  { %6335 = vmatmul.mubr.msk.f32.vlgmr.msra.gmra.mxu0 %vm1219_vm8, %v3123_v43  ;;  %6348 = vmatprep.subr.mxu0 %v8392_v39 }
 0x5b3   :  { %6349 = vmatpush3.msra.mxu0 %v6639_v62  ;;  %v7986_v0 = vrot.slane %v3446_v60, 4  ;;  %6356 = vmatprep.mubr.msk.f32.mxu0 %vm6709_vm4, %v8392_v39 }
 0x5b4   :  { %6350 = vmatprep.subr.mxu0 %v8392_v39 }
 0x5b5   :  { %6258 = vmatmul.mubr.msk.f32.vlgmr.msra.gmra.mxu1 %vm1219_vm8, %v7986_v0  ;;  %6351 = vmatpush3.msra.mxu0 %v6640_v1 }
 0x5b6   :  { %6272 = vmatpush3.msra.mxu1 %v7573_v28  ;;  %6352 = vmatprep.subr.mxu0 %v8392_v39  ;;  %v6643_v28 = vld [vmem:[%s8340_s10 + $0x78] sm:$0xff] }
 0x5b7   :  { %6273 = vmatprep.subr.mxu1 %v8392_v39  ;;  %6353 = vmatpush3.msra.mxu0 %v6641_v2 }
 0x5b8   :  { %6274 = vmatpush3.msra.mxu1 %v7582_v29  ;;  %6354 = vmatprep.subr.mxu0 %v8392_v39  ;;  %v6644_v29 = vld [vmem:[%s8340_s10 + $0x70] sm:$0xff] }
 0x5b9   :  { %6275 = vmatprep.subr.mxu1 %v8392_v39  ;;  %6355 = vmatpush3.msra.mxu0 %v6642_v27 }
 0x5ba   :  { %6276 = vmatpush3.msra.mxu1 %v7591_v31  ;;  %6357 = vmatmul.mubr.msk.f32.vlgmr.msra.gmra.mxu0 %vm1219_vm8, %v7986_v0  ;;  %v6645_v31 = vld [vmem:[%s8340_s10 + $0x68] sm:$0xff] }
 0x5bb   :  { %6277 = vmatprep.subr.mxu1 %v8392_v39  ;;  %6370 = vmatprep.subr.mxu0 %v8392_v39 }
 0x5bc   :  { %6278 = vmatpush3.msra.mxu1 %v7600_v32  ;;  %6279 = vmatprep.mubr.msk.f32.mxu1 %vm6709_vm4, %v8392_v39  ;;  %v6646_v32 = vld [vmem:[%s8340_s10 + $0x60] sm:$0xff] }
 0x5bd   :  { %6371 = vmatpush3.msra.mxu0 %v6643_v28  ;;  %6280 = vmatmul.mubr.msk.f32.vlgmr.msra.gmra.mxu1 %vm1219_vm8, %v7986_v0 }
 0x5be   :  { %6293 = vmatprep.subr.mxu1 %v8392_v39  ;;  %6372 = vmatprep.subr.mxu0 %v8392_v39 }
 0x5bf   :  { %6294 = vmatpush3.msra.mxu1 %v7612_v33  ;;  %6373 = vmatpush3.msra.mxu0 %v6644_v29  ;;  %v6647_v33 = vld [vmem:[%s8343_s13 + $0x18] sm:$0xff] }
 0x5c0   :  { %6295 = vmatprep.subr.mxu1 %v8392_v39  ;;  %6374 = vmatprep.subr.mxu0 %v8392_v39 }
 0x5c1   :  { %6296 = vmatpush3.msra.mxu1 %v7623_v7  ;;  %6375 = vmatpush3.msra.mxu0 %v6645_v31  ;;  %v6648_v7 = vld [vmem:[%s8343_s13 + $0x10] sm:$0xff] }
 0x5c2   :  { %6297 = vmatprep.subr.mxu1 %v8392_v39  ;;  %6376 = vmatprep.subr.mxu0 %v8392_v39 }
 0x5c3   :  { %6298 = vmatpush3.msra.mxu1 %v7632_v8  ;;  %6377 = vmatpush3.msra.mxu0 %v6646_v32  ;;  %v6649_v8 = vld [vmem:[%s8343_s13 + $0x8] sm:$0xff] }
 0x5c4   :  { %6378 = vmatprep.mubr.msk.f32.mxu0 %vm6709_vm4, %v8392_v39  ;;  %6299 = vmatprep.subr.mxu1 %v8392_v39 }
 0x5c5   :  { %6379 = vmatmul.mubr.msk.f32.vlgmr.msra.gmra.mxu0 %vm1219_vm8, %v7986_v0  ;;  %6300 = vmatpush3.msra.mxu1 %v7642_v10  ;;  %v6650_v10 = vld [vmem:[%s8340_s10 + $0x18] sm:$0xff] }
 0x5c6   :  { %6301 = vmatprep.mubr.msk.f32.mxu1 %vm6709_vm4, %v8392_v39  ;;  %6315 = vmatprep.subr.mxu1 %v8392_v39 }
 0x5c7   :  { %6302 = vmatmul.mubr.msk.f32.vlgmr.msra.gmra.mxu1 %vm1219_vm8, %v7986_v0  ;;  %6392 = vmatprep.subr.mxu0 %v8392_v39 }
 0x5c8   :  { %6316 = vmatpush3.msra.mxu1 %v7651_v13  ;;  %6323 = vmatprep.mubr.msk.f32.mxu1 %vm6709_vm4, %v8392_v39  ;;  %v6651_v13 = vld [vmem:[%s8343_s13] sm:$0xff] }
 0x5c9   :  { %6317 = vmatprep.subr.mxu1 %v8392_v39  ;;  %6393 = vmatpush3.msra.mxu0 %v6647_v33 }
 0x5ca   :  { %6318 = vmatpush3.msra.mxu1 %v7662_v14  ;;  %6394 = vmatprep.subr.mxu0 %v8392_v39  ;;  %v6652_v14 = vld [vmem:[%s8340_s10 + $0x10] sm:$0xff] }
 0x5cb   :  { %6319 = vmatprep.subr.mxu1 %v8392_v39  ;;  %6395 = vmatpush3.msra.mxu0 %v6648_v7 }
 0x5cc   :  { %6320 = vmatpush3.msra.mxu1 %v7671_v15  ;;  %6396 = vmatprep.subr.mxu0 %v8392_v39  ;;  %v6653_v15 = vld [vmem:[%s8340_s10 + $0x8] sm:$0xff] }
 0x5cd   :  { %6321 = vmatprep.subr.mxu1 %v8392_v39  ;;  %6397 = vmatpush3.msra.mxu0 %v6649_v8 }
 0x5ce   :  { %6322 = vmatpush3.msra.mxu1 %v7680_v12  ;;  %6398 = vmatprep.subr.mxu0 %v8392_v39  ;;  %v6654_v12 = vld [vmem:[%s8340_s10] sm:$0xff]  ;;  %s6710_s10 = smov [#allocation4]  }
 0x5cf   :  { %6324 = vmatmul.mubr.msk.f32.vlgmr.msra.gmra.mxu1 %vm1219_vm8, %v7986_v0  ;;  %6337 = vmatprep.subr.mxu1 %v8392_v39  ;;  %s5141_s11 = sshll.u32 %s6710_s10, 4  ;;  %s5142_s11 = int_to_ptr.vmem [resolvable:$true] %s5141_s11 }
 0x5d0   :  { %6338 = vmatpush3.msra.mxu1 %v6650_v10  ;;  %6345 = vmatprep.mubr.msk.f32.mxu1 %vm6709_vm4, %v8392_v39  ;;  %p6690_p1 = scmp.lt.s32.totalorder %s5142_s11, %s5142_s11 }
 0x5d1   :  { %6339 = vmatprep.subr.mxu1 %v8392_v39  ;;  %6399 = vmatpush3.msra.mxu0 %v6651_v13 }
 0x5d2   :  { %6340 = vmatpush3.msra.mxu1 %v6652_v14  ;;  %6400 = vmatprep.mubr.msk.f32.mxu0 %vm6709_vm4, %v8392_v39 }
 0x5d3   :  { %6341 = vmatprep.subr.mxu1 %v8392_v39  ;;  %6414 = vmatprep.subr.mxu0 %v8392_v39 }
 0x5d4   :  { %6342 = vmatpush3.msra.mxu1 %v6653_v15 }
 0x5d5   :  { %6343 = vmatprep.subr.mxu1 %v8392_v39 }
 0x5d6   :  { %6344 = vmatpush3.msra.mxu1 %v6654_v12 }
 0x5d7   :  { %6346 = vmatmul.mubr.msk.f32.vlgmr.msra.gmra.mxu1 %vm1219_vm8, %v7986_v0  ;;  %6359 = vmatprep.subr.mxu1 %v8392_v39 }
 0x5d8   :  { %6360 = vmatpush3.msra.mxu1 %v6655_v4  ;;  %6367 = vmatprep.mubr.msk.f32.mxu1 %vm6709_vm4, %v8392_v39 }
 0x5d9   :  { %6361 = vmatprep.subr.mxu1 %v8392_v39 }
 0x5da   :  { %6362 = vmatpush3.msra.mxu1 %v6656_v17 }
 0x5db   :  { %6363 = vmatprep.subr.mxu1 %v8392_v39 }
 0x5dc   :  { %6364 = vmatpush3.msra.mxu1 %v6657_v26 }
 0x5dd   :  { %6365 = vmatprep.subr.mxu1 %v8392_v39 }
 0x5de   :  { %6366 = vmatpush3.msra.mxu1 %v6658_v37 }
 0x5df   :  { %6368 = vmatmul.mubr.msk.f32.vlgmr.msra.gmra.mxu1 %vm1219_vm8, %v7986_v0  ;;  %6381 = vmatprep.subr.mxu1 %v8392_v39 }
 0x5e0   :  { %6382 = vmatpush3.msra.mxu1 %v6659_v21  ;;  %6389 = vmatprep.mubr.msk.f32.mxu1 %vm6709_vm4, %v8392_v39 }
 0x5e1   :  { %6383 = vmatprep.subr.mxu1 %v8392_v39 }
 0x5e2   :  { %6384 = vmatpush3.msra.mxu1 %v6660_v22 }
 0x5e3   :  { %6385 = vmatprep.subr.mxu1 %v8392_v39 }
 0x5e4   :  { %6386 = vmatpush3.msra.mxu1 %v6661_v40 }
 0x5e5   :  { %6387 = vmatprep.subr.mxu1 %v8392_v39 }
 0x5e6   :  { %6388 = vmatpush3.msra.mxu1 %v6662_v35 }
 0x5e7   :  { %6403 = vmatprep.subr.mxu1 %v8392_v39 }
 0x65a   :  { %v3590_v23 = vpop.f32.mrf.mxu0 }
 0x65c   :  { %v6270_v20 = vpop.f32.mrf.mxu0 }
 0x662   :  { %v3731_v56 = vpop.f32.mrf.mxu0 }
 0x664   :  { %v6292_v57 = vpop.f32.mrf.mxu0 }
 0x66a   :  { %v3872_v11 = vpop.f32.mrf.mxu0 }
 0x66c   :  { %v6314_v58 = vpop.f32.mrf.mxu0 }
 0x672   :  { %v4013_v59 = vpop.f32.mrf.mxu0 }
 0x674   :  { %v6336_v34 = vpop.f32.mrf.mxu0 }
 0x675   :  { %v3517_v19 = vpop.f32.mrf.mxu1 }
 0x676   :  { %v3518_v36 = vadd.f32 %v8403_v3, %v3517_v19 }
 0x677   :  { %v6259_v43 = vpop.f32.mrf.mxu1 }
 0x678   :  { %v3594_v44 = vadd.f32 %v3590_v23, %v3518_v36 }
 0x67a   :  { %v5328_v45 = vmul.f32 -1.442695, %v3594_v44  ;;  %v4182_v46 = vpop.f32.mrf.mxu0  ;;  %v6663_v44 = vld [vmem:[%s8343_s13 + $0x38] sm:$0xff] }
 0x67b   :  { %v4187_v2 = vrot.slane %v4182_v46, 2  ;;  %v4358_v46 = vrot.slane %v7930_v52, 6  ;;  %v6666_v52 = vld [vmem:[%s8343_s13 + $0x70] sm:$0xff] }
 0x67c   :  { %v6358_v47 = vpop.f32.mrf.mxu0  ;;  %6585 = vpow2.f32 %v5328_v45 }
 0x67d   :  { %v3661_v48 = vpop.f32.mrf.mxu1  ;;  %v4189_v31 = vadd.f32 %v4187_v2, %v7550_v24  ;;  %v6664_v47 = vld [vmem:[%s8343_s13 + $0x30] sm:$0xff] }
 0x67e   :  { %v3662_v49 = vadd.f32 %v8404_v25, %v3661_v48  ;;  %v6674_v2 = vld [vmem:[%s8342_s12 + $0x50] sm:$0xff] }
 0x67f   :  { %v6281_v50 = vpop.f32.mrf.mxu1  ;;  %v5336_v10 = vmul.f32 -1.442695, %v4189_v31  ;;  %v6678_v31 = vld [vmem:[%s8342_s12 + $0x70] sm:$0xff] }
 0x680   :  { %v3735_v51 = vadd.f32 %v3731_v56, %v3662_v49 }
 0x682   :  { %v5329_v18 = vmul.f32 -1.442695, %v3735_v51 }
 0x684   :  { %6587 = vpow2.f32 %v5329_v18 }
 0x685   :  { %v4330_v6 = vpop.f32.mrf.mxu0 }
 0x687   :  { %v3802_v60 = vpop.f32.mrf.mxu1  ;;  %v6380_v62 = vpop.f32.mrf.mxu0 }
 0x688   :  { %v3803_v3 = vadd.f32 %v8405_v42, %v3802_v60  ;;  %v6669_v60 = vld [vmem:[%s8342_s12 + $0x38] sm:$0xff]  ;;  %v6670_v62 = vld [vmem:[%s8342_s12 + $0x30] sm:$0xff] }
 0x689   :  { %v6303_v0 = vpop.f32.mrf.mxu1  ;;  %v6586_v1 = vpop.eup %6585 }
 0x68a   :  { %v4021_v27 = vadd.f32 1.0, %v6586_v1  ;;  %v3876_v28 = vadd.f32 %v3872_v11, %v3803_v3  ;;  %v6671_v0 = vld [vmem:[%s8342_s12 + $0x28] sm:$0xff]  ;;  %v6672_v1 = vld [vmem:[%s8342_s12 + $0x20] sm:$0xff]  ;;  %v6673_v3 = vld [vmem:[%s8342_s12 + $0x58] sm:$0xff] }
 0x68c   :  { %6589 = vrcp.f32 %v4021_v27  ;;  %v6675_v27 = vld [vmem:[%s8342_s12 + $0x48] sm:$0xff] }
 0x68d   :  { %6591 = vtanh.f32 %v3876_v28  ;;  %v6676_v28 = vld [vmem:[%s8342_s12 + $0x40] sm:$0xff] }
 0x68f   :  { %v3943_v29 = vpop.f32.mrf.mxu1 }
 0x690   :  { %v3944_v32 = vadd.f32 %v7747_v41, %v3943_v29  ;;  %v4335_v41 = vrot.slane %v4330_v6, 2  ;;  %v6677_v29 = vld [vmem:[%s8342_s12 + $0x78] sm:$0xff] }
 0x691   :  { %v6588_v25 = vpop.eup %6587  ;;  %v6325_v33 = vpop.f32.mrf.mxu1 }
 0x692   :  { %v4027_v7 = vadd.f32 1.0, %v6588_v25  ;;  %v4017_v8 = vadd.f32 %v4013_v59, %v3944_v32  ;;  %v4337_v23 = vadd.f32 %v4335_v41, %v7556_v30  ;;  %v6679_v32 = vld [vmem:[%s8342_s12 + $0x68] sm:$0xff]  ;;  %v6680_v25 = vld [vmem:[%s8342_s12 + $0x60] sm:$0xff]  ;;  %v4963_v33 = vld [vmem:[%s8345_s15 + $0x18] sm:$0xff] }
 0x694   :  { %6593 = vrcp.f32 %v4027_v7  ;;  %v5330_v13 = vmul.f32 -1.442695, %v4017_v8  ;;  %v4962_v7 = vld [vmem:[%s8345_s15 + $0x10] sm:$0xff]  ;;  %v4961_v8 = vld [vmem:[%s8345_s15 + $0x8] sm:$0xff] }
 0x696   :  { %6595 = vpow2.f32 %v5330_v13  ;;  %v5052_v13 = vld [vmem:[%s8347_s17 + $0x38] sm:$0xff] }
 0x697   :  { %v4108_v14 = vpop.f32.mrf.mxu1  ;;  %6597 = vpow2.f32 %v5336_v10  ;;  %v4960_v10 = vld [vmem:[%s8345_s15] sm:$0xff] }
 0x698   :  { %v4113_v42 = vrot.slane %v4108_v14, 2  ;;  %v5051_v14 = vld [vmem:[%s8347_s17 + $0x30] sm:$0xff] }
 0x699   :  { %v6347_v15 = vpop.f32.mrf.mxu1  ;;  %v6590_v24 = vpop.eup %6589 }
 0x69a   :  { %v4115_v12 = vadd.f32 %v4113_v42, %v7544_v16  ;;  %v6592_v26 = vpop.eup %6591  ;;  %v5337_v16 = vmul.f32 -1.442695, %v4337_v23  ;;  %v5050_v42 = vld [vmem:[%s8347_s17 + $0x28] sm:$0xff]  ;;  %v5049_v15 = vld [vmem:[%s8347_s17 + $0x20] sm:$0xff] }
 0x69b   :  { %v4038_v40 = vmul.f32 %v6592_v26, %v6590_v24 }
 0x69c   :  { %v5335_v4 = vmul.f32 -1.442695, %v4115_v12  ;;  %v5048_v12 = vld [vmem:[%s8347_s17 + $0x18] sm:$0xff] }
 0x69e   :  { %6599 = vpow2.f32 %v5335_v4 }
 0x69f   :  { %v4256_v17 = vpop.f32.mrf.mxu1 }
 0x6a0   :  { %v4261_v11 = vrot.slane %v4256_v17, 2 }
 0x6a1   :  { %v6594_v37 = vpop.eup %6593  ;;  %v6369_v21 = vpop.f32.mrf.mxu1 }
 0x6a2   :  { %v4037_v22 = vmul.f32 %v6594_v37, %v7911_v63  ;;  %v4263_v59 = vadd.f32 %v4261_v11, %v7562_v9 }
 0x6a3   :  { %v6596_v35 = vpop.eup %6595 }
 0x6a4   :  { %v8147_v20 = vadd.f32 %v4038_v40, %v4037_v22  ;;  %v4034_v56 = vadd.f32 1.0, %v6596_v35  ;;  %v6598_v57 = vpop.eup %6597  ;;  %v6681_v35 = vld [vmem:[%s8344_s14] ss:$0 sm:$0xff] }
 0x6a5   :  { %v4347_v58 = vadd.f32 1.0, %v6598_v57 }
 0x6a6   :  { %6601 = vtanh.f32 %v8147_v20 }
 0x6a7   :  { %6603 = vrcp.f32 %v4034_v56 }
 0x6a8   :  { %6605 = vpow2.f32 %v5337_v16 }
 0x6a9   :  { %6607 = vrcp.f32 %v4347_v58  ;;  %v6682_v58 = vld [vmem:[%s8344_s14 + $0x1] ss:$0 sm:$0xff] }
 0x6aa   :  { %6609 = vtanh.f32 %v4263_v59 }
 0x6ab   :  { %v6600_v34 = vpop.eup %6599 }
 0x6ac   :  { %v4341_v63 = vadd.f32 1.0, %v6600_v34 }
 0x6ae   :  { %6611 = vrcp.f32 %v4341_v63 }
 0x6b3   :  { %v6602_v19 = vpop.eup %6601 }
 0x6b4   :  { %v6604_v30 = vpop.eup %6603 }
 0x6b5   :  { %v4041_v36 = vmul.f32 %v6604_v30, %v6602_v19  ;;  %v6606_v43 = vpop.eup %6605 }
 0x6b6   :  { %v6608_v9 = vpop.eup %6607  ;;  %v4354_v49 = vadd.f32 1.0, %v6606_v43 }
 0x6b7   :  { %6401 = vmatmul.mubr.msk.f32.vlgmr.msra.gmra.mxu0 %vm1219_vm8, %v4041_v36  ;;  %v6610_v45 = vpop.eup %6609  ;;  %v4360_v50 = vmul.f32 %v6608_v9, %v4358_v46 }
 0x6b8   :  { %6415 = vmatpush3.msra.mxu0 %v6663_v44  ;;  %6422 = vmatprep.mubr.msk.f32.mxu0 %vm6709_vm4, %v8392_v39  ;;  %6613 = vrcp.f32 %v4354_v49  ;;  %v6683_v44 = vld [vmem:[%s8344_s14 + $0x2] ss:$0 sm:$0xff] }
 0x6b9   :  { %6416 = vmatprep.subr.mxu0 %v8392_v39 }
 0x6ba   :  { %6417 = vmatpush3.msra.mxu0 %v6664_v47  ;;  %v6684_v47 = vld [vmem:[%s8344_s14 + $0x3] ss:$0 sm:$0xff] }
 0x6bb   :  { %v6612_v48 = vpop.eup %6611  ;;  %6418 = vmatprep.subr.mxu0 %v8392_v39 }
 0x6bc   :  { %v4361_v51 = vmul.f32 %v6612_v48, %v6610_v45  ;;  %6419 = vmatpush3.msra.mxu0 %v7926_v54  ;;  %v6665_v54 = vld [vmem:[%s8343_s13 + $0x78] sm:$0xff] }
 0x6bd   :  { %6420 = vmatprep.subr.mxu0 %v8392_v39 }
 0x6be   :  { %v4362_v18 = vadd.f32 %v4361_v51, %v4360_v50  ;;  %6421 = vmatpush3.msra.mxu0 %v7935_v55 }
 0x6bf   :  { %6423 = vmatmul.mubr.msk.f32.vlgmr.msra.gmra.mxu0 %vm1219_vm8, %v4041_v36  ;;  %6436 = vmatprep.subr.mxu0 %v8392_v39 }
 0x6c0   :  { %6615 = vtanh.f32 %v4362_v18  ;;  %6437 = vmatpush3.msra.mxu0 %v7944_v5  ;;  %6444 = vmatprep.mubr.msk.f32.mxu0 %vm6709_vm4, %v8392_v39  ;;  %v6667_v5 = vld [vmem:[%s8343_s13 + $0x68] sm:$0xff] }
 0x6c1   :  { %6438 = vmatprep.subr.mxu0 %v8392_v39 }
 0x6c2   :  { %6439 = vmatpush3.msra.mxu0 %v7953_v53 }
 0x6c3   :  { %6440 = vmatprep.subr.mxu0 %v8392_v39 }
 0x6c4   :  { %6441 = vmatpush3.msra.mxu0 %v7960_v61  ;;  %v6668_v61 = vld [vmem:[%s8343_s13 + $0x60] sm:$0xff] }
 0x6c5   :  { %6442 = vmatprep.subr.mxu0 %v8392_v39  ;;  %v6614_v55 = vpop.eup %6613 }
 0x6c6   :  { %6443 = vmatpush3.msra.mxu0 %v7967_v38 }
 0x6c7   :  { %6445 = vmatmul.mubr.msk.f32.vlgmr.msra.gmra.mxu0 %vm1219_vm8, %v4041_v36  ;;  %6458 = vmatprep.subr.mxu0 %v8392_v39 }
 0x6c8   :  { %6459 = vmatpush3.msra.mxu0 %v6665_v54  ;;  %6466 = vmatprep.mubr.msk.f32.mxu0 %vm6709_vm4, %v8392_v39 }
 0x6c9   :  { %6460 = vmatprep.subr.mxu0 %v8392_v39 }
 0x6ca   :  { %6461 = vmatpush3.msra.mxu0 %v6666_v52 }
 0x6cb   :  { %6462 = vmatprep.subr.mxu0 %v8392_v39 }
 0x6cc   :  { %6463 = vmatpush3.msra.mxu0 %v6667_v5 }
 0x6cd   :  { %v6616_v53 = vpop.eup %6615  ;;  %6464 = vmatprep.subr.mxu0 %v8392_v39 }
 0x6ce   :  { %6465 = vmatpush3.msra.mxu0 %v6668_v61  ;;  %v4364_v38 = vmul.f32 %v6616_v53, %v6614_v55 }
 0x6cf   :  { %6467 = vmatmul.mubr.msk.f32.vlgmr.msra.gmra.mxu0 %vm1219_vm8, %v4041_v36  ;;  %6480 = vmatprep.subr.mxu0 %v8392_v39 }
 0x6d0   :  { %v4366_v6 = vrot.slane %v4364_v38, 6  ;;  %6496 = vmatprep.mubr.msk.f32.mxu0 %vm6709_vm4, %v8392_v39  ;;  %6481 = vmatpush3.msra.mxu0 %v5052_v13 }
 0x6d1   :  { %6482 = vmatprep.subr.mxu0 %v8392_v39 }
 0x6d2   :  { %6390 = vmatmul.mubr.msk.f32.vlgmr.msra.gmra.mxu1 %vm1219_vm8, %v4366_v6  ;;  %6483 = vmatpush3.msra.mxu0 %v5051_v14 }
 0x6d3   :  { %6404 = vmatpush3.msra.mxu1 %v6669_v60  ;;  %6411 = vmatprep.mubr.msk.f32.mxu1 %vm6709_vm4, %v8392_v39 }
 0x6d4   :  { %6405 = vmatprep.subr.mxu1 %v8392_v39  ;;  %6484 = vmatprep.subr.mxu0 %v8392_v39 }
 0x6d5   :  { %6406 = vmatpush3.msra.mxu1 %v6670_v62  ;;  %6485 = vmatpush3.msra.mxu0 %v5050_v42 }
 0x6d6   :  { %6407 = vmatprep.subr.mxu1 %v8392_v39  ;;  %6486 = vmatprep.subr.mxu0 %v8392_v39 }
 0x6d7   :  { %6408 = vmatpush3.msra.mxu1 %v6671_v0  ;;  %6487 = vmatpush3.msra.mxu0 %v5049_v15 }
 0x6d8   :  { %6409 = vmatprep.subr.mxu1 %v8392_v39  ;;  %6488 = vmatprep.subr.mxu0 %v8392_v39 }
 0x6d9   :  { %6410 = vmatpush3.msra.mxu1 %v6672_v1  ;;  %6489 = vmatpush3.msra.mxu0 %v5048_v12 }
 0x6da   :  { %6412 = vmatmul.mubr.msk.f32.vlgmr.msra.gmra.mxu1 %vm1219_vm8, %v4366_v6  ;;  %6425 = vmatprep.subr.mxu1 %v8392_v39 }
 0x6db   :  { %6426 = vmatpush3.msra.mxu1 %v6673_v3  ;;  %6433 = vmatprep.mubr.msk.f32.mxu1 %vm6709_vm4, %v8392_v39 }
 0x6dc   :  { %6427 = vmatprep.subr.mxu1 %v8392_v39  ;;  %6490 = vmatprep.subr.mxu0 %v8392_v39 }
 0x6dd   :  { %6428 = vmatpush3.msra.mxu1 %v6674_v2  ;;  %v5047_v2 = vld [vmem:[%s8347_s17 + $0x10] sm:$0xff] }
 0x6de   :  { %6429 = vmatprep.subr.mxu1 %v8392_v39  ;;  %6491 = vmatpush3.msra.mxu0 %v5047_v2 }
 0x6df   :  { %6430 = vmatpush3.msra.mxu1 %v6675_v27  ;;  %6492 = vmatprep.subr.mxu0 %v8392_v39  ;;  %v5045_v27 = vld [vmem:[%s8347_s17] sm:$0xff] }
 0x6e0   :  { %6431 = vmatprep.subr.mxu1 %v8392_v39 }
 0x6e1   :  { %6432 = vmatpush3.msra.mxu1 %v6676_v28  ;;  %v5349_v28 = vld [vmem:[%s8346_s16] ss:$0 sm:$0xff] }
 0x6e2   :  { %6434 = vmatmul.mubr.msk.f32.vlgmr.msra.gmra.mxu1 %vm1219_vm8, %v4366_v6  ;;  %6447 = vmatprep.subr.mxu1 %v8392_v39 }
 0x6e3   :  { %6448 = vmatpush3.msra.mxu1 %v6677_v29  ;;  %6455 = vmatprep.mubr.msk.f32.mxu1 %vm6709_vm4, %v8392_v39 }
 0x6e4   :  { %6449 = vmatprep.subr.mxu1 %v8392_v39 }
 0x6e5   :  { %6450 = vmatpush3.msra.mxu1 %v6678_v31 }
 0x6e6   :  { %6451 = vmatprep.subr.mxu1 %v8392_v39 }
 0x6e7   :  { %6452 = vmatpush3.msra.mxu1 %v6679_v32 }
 0x6e8   :  { %6453 = vmatprep.subr.mxu1 %v8392_v39 }
 0x6e9   :  { %6454 = vmatpush3.msra.mxu1 %v6680_v25 }
 0x6ea   :  { %6456 = vmatmul.mubr.msk.f32.vlgmr.msra.gmra.mxu1 %vm1219_vm8, %v4366_v6  ;;  %6469 = vmatprep.subr.mxu1 %v8392_v39 }
 0x6eb   :  { %6477 = vmatprep.mubr.msk.f32.mxu1 %vm6709_vm4, %v8392_v39  ;;  %6470 = vmatpush3.msra.mxu1 %v4963_v33  ;;  %v5351_v33 = vld [vmem:[%s8348_s18] ss:$0 sm:$0xff] }
 0x6ec   :  { %6471 = vmatprep.subr.mxu1 %v8392_v39 }
 0x6ed   :  { %6472 = vmatpush3.msra.mxu1 %v4962_v7 }
 0x6ee   :  { %6473 = vmatprep.subr.mxu1 %v8392_v39 }
 0x6ef   :  { %6474 = vmatpush3.msra.mxu1 %v4961_v8 }
 0x6f0   :  { %6475 = vmatprep.subr.mxu1 %v8392_v39 }
 0x6f1   :  { %6476 = vmatpush3.msra.mxu1 %v4960_v10 }
 0x777   :  { %v4508_v4 = vpop.f32.mrf.mxu0 }
 0x779   :  { %v6402_v24 = vpop.f32.mrf.mxu0 }
 0x77f   :  { %v4649_v41 = vpop.f32.mrf.mxu0 }
 0x781   :  { %v6424_v17 = vpop.f32.mrf.mxu0 }
 0x787   :  { %v4790_v26 = vpop.f32.mrf.mxu0 }
 0x789   :  { %v6446_v37 = vpop.f32.mrf.mxu0 }
 0x78f   :  { %v4931_v21 = vpop.f32.mrf.mxu0 }
 0x791   :  { %v6468_v22 = vpop.f32.mrf.mxu0 }
 0x792   :  { %v4435_v40 = vpop.f32.mrf.mxu1 }
 0x793   :  { %v4436_v23 = vadd.f32 %v6681_v35, %v4435_v40 }
 0x794   :  { %v6391_v56 = vpop.f32.mrf.mxu1 }
 0x795   :  { %v4512_v57 = vadd.f32 %v4508_v4, %v4436_v23 }
 0x797   :  { %v5346_v11 = vmul.f32 -1.442695, %v4512_v57 }
 0x799   :  { %6617 = vpow2.f32 %v5346_v11 }
 0x79a   :  { %v4579_v16 = vpop.f32.mrf.mxu1 }
 0x79b   :  { %v4580_v59 = vadd.f32 %v6682_v58, %v4579_v16 }
 0x79c   :  { %v6413_v34 = vpop.f32.mrf.mxu1 }
 0x79d   :  { %v4653_v63 = vadd.f32 %v4649_v41, %v4580_v59 }
 0x79f   :  { %v5347_v19 = vmul.f32 -1.442695, %v4653_v63 }
 0x7a1   :  { %6619 = vpow2.f32 %v5347_v19 }
 0x7a2   :  { %v4720_v30 = vpop.f32.mrf.mxu1 }
 0x7a3   :  { %v4721_v9 = vadd.f32 %v6683_v44, %v4720_v30 }
 0x7a4   :  { %v6435_v36 = vpop.f32.mrf.mxu1 }
 0x7a5   :  { %v4794_v49 = vadd.f32 %v4790_v26, %v4721_v9 }
 0x7a6   :  { %v6618_v43 = vpop.eup %6617 }
 0x7a7   :  { %v4939_v46 = vadd.f32 1.0, %v6618_v43 }
 0x7a9   :  { %6621 = vrcp.f32 %v4939_v46 }
 0x7aa   :  { %v4861_v45 = vpop.f32.mrf.mxu1  ;;  %6623 = vtanh.f32 %v4794_v49 }
 0x7ab   :  { %v4862_v48 = vadd.f32 %v6684_v47, %v4861_v45 }
 0x7ac   :  { %v6457_v50 = vpop.f32.mrf.mxu1 }
 0x7ad   :  { %v4935_v51 = vadd.f32 %v4931_v21, %v4862_v48 }
 0x7ae   :  { %v6620_v18 = vpop.eup %6619 }
 0x7af   :  { %v4945_v54 = vadd.f32 1.0, %v6620_v18  ;;  %v5348_v52 = vmul.f32 -1.442695, %v4935_v51 }
 0x7b1   :  { %6625 = vrcp.f32 %v4945_v54 }
 0x7b2   :  { %6627 = vpow2.f32 %v5348_v52 }
 0x7b6   :  { %v6622_v55 = vpop.eup %6621 }
 0x7b7   :  { %v6624_v5 = vpop.eup %6623 }
 0x7b8   :  { %v4956_v6 = vmul.f32 %v6624_v5, %v6622_v55 }
 0x7be   :  { %v6626_v53 = vpop.eup %6625 }
 0x7bf   :  { %v6628_v61 = vpop.eup %6627  ;;  %v4955_v38 = vmul.f32 %v6626_v53, %v8147_v20  ;;  %v5046_v20 = vld [vmem:[%s8347_s17 + $0x8] sm:$0xff]  ;;  %s6685_s17 = scalar_lea.vmem %s5142_s11, 32 }
 0x7c0   :  { %v4952_v60 = vadd.f32 1.0, %v6628_v61  ;;  %6493 = vmatpush3.msra.mxu0 %v5046_v20  ;;  %p6686_p0 = scmp.ne.s32.totalorder %s5142_s11, %s6685_s17  ;;  %p6691_p2 = scmp.lt.s32.totalorder %s6685_s17, %s6685_s17 }
 0x7c1   :  { %v4957_v62 = vadd.f32 %v4956_v6, %v4955_v38  ;;  %6494 = vmatprep.subr.mxu0 %v8392_v39 }
 0x7c2   :  { %6629 = vrcp.f32 %v4952_v60  ;;  %6495 = vmatpush3.msra.mxu0 %v5045_v27  ;;  %p6692_p3 = por %p6691_p2, %p6690_p1 }
 0x7c3   :  { %6631 = vtanh.f32 %v4957_v62 }
 0x7c4   :  { %p6693_p4 = pnand %p6692_p3, %p6686_p0 }
 0x7cf   :  { %v6630_v0 = vpop.eup %6629 }
 0x7d0   :  { %v6632_v1 = vpop.eup %6631 }
 0x7d1   :  { %v4959_v3 = vmul.f32 %v6632_v1, %v6630_v0 }
 0x7d3   :  { %6478 = vmatmul.mubr.msk.f32.vlgmr.msra.gmra.mxu1 %vm1219_vm8, %v4959_v3 }
 0x893   :  { %v5040_v29 = vpop.f32.mrf.mxu1 }
 0x894   :  { %v5041_v31 = vadd.f32 %v5349_v28, %v5040_v29 }
 0x895   :  { %v6479_v32 = vpop.f32.mrf.mxu1 }
 0x896   :  { %v5044_v25 = vmax.f32 %v5041_v31, 0.0 }
 0x898   :  { %6497 = vmatmul.mubr.msk.f32.vlgmr.msra.gmra.mxu0 %vm465_vm3, %v5044_v25 }
 0x958   :  { %v5129_v7 = vpop.f32.mrf.mxu0 }
 0x959   :  { %v5130_v39 = vadd.f32 %v5351_v33, %v5129_v7 }
 0x95a   :  { %v6498_v8 = vpop.f32.mrf.mxu0 }
 0x95b   :  { %5134 = vst.msk [vmem:[#allocation4] sm:$0x3] %vm5133_vm9, %v5130_v39 }
 0x95c   :  { %6696 = shalt.err (!%p6693_p4)
}
 0x95d   :  { %5144 = dma.vmem_to_hbm [thread:$0]  %s5142_s11, 32, %s8349_s19, [#allocation5]  }
 0x95e   :  { %6705 = dma.done.wait [#allocation5], 32  }
 0x95f   :  { %6706 = vsyncadd [#allocation5], 4294967264 }
 0x960   :  { %5148 = vsyncpa [#allocation5], 1 }

</bundles_post_ra>
